<compile_context>
chip_gen: v7x
topology: tpu7x:2x2x1
jax: 0.10.0
libtpu: 0.0.40
codegen_flags: <defaults>
</compile_context>

<pallas_src>
import functools
import math

import jax
import jax.numpy as jnp
from jax.experimental import pallas as pl
from jax.experimental.pallas import tpu as pltpu


_MXU_DTYPE = jnp.bfloat16          # MXU operand dtype (accumulation / epilogue stay f32)
_NEG_SLOPE = 0.1                   # LeakyReLU slope of the reference module


def _round_up(x, m):
    return ((x + m - 1) // m) * m


def _tpu_vmem_bytes():
    try:
        return int(pltpu.get_tpu_info().vmem_capacity_bytes)
    except Exception:
        return 64 * 1024 * 1024    # conservative fallback (v7x per-TensorCore VMEM)


_VMEM_PHYS = _tpu_vmem_bytes()
_VMEM_LIMIT = min(int(_VMEM_PHYS * 0.75), 112 * 1024 * 1024)


# ----------------------------------------------------------------------------
# Banded lane-dense conv weights.
#
# For an image row laid out as [W*Cin] (lane-dense), a 3x3 "same" conv becomes
#     out_row[h] = sum_dy  x_row[h + dy - 1] @ band[dy]
# where band[dy] is [W*Cin, W*Cout] and the W-direction zero padding is encoded
# by dropping out-of-range taps from the band.
# ----------------------------------------------------------------------------
def _conv_band(w_taps, W, kw=3):
    """w_taps: [kh*kw, Cin, Cout] (tap-major, (dy, dx)) -> [kh, W*Cin, W*Cout]."""
    kh = w_taps.shape[0] // kw
    Cin, Cout = w_taps.shape[1], w_taps.shape[2]
    wk = w_taps.reshape(kh, kw, Cin, Cout)
    wi = jnp.arange(W)[:, None, None]                        # input column
    wo = jnp.arange(W)[None, :, None]                        # output column
    dx = jnp.arange(kw)[None, None, :]
    sel = (wi == wo + dx - (kw // 2)).astype(wk.dtype)       # [W, W, kw]
    band = jnp.einsum('abx,yxio->yaibo', sel, wk)            # [kh, W, Cin, W, Cout]
    return band.reshape(kh, W * Cin, W * Cout)


# ----------------------------------------------------------------------------
# Tiling planners (generation/VMEM aware)
# ----------------------------------------------------------------------------
def _plan_views(n_views, H, HP, WC):
    """Pick views-per-step TN and padded view count for the lf/sa kernel."""
    wc_pad = _round_up(WC, 128)
    per_view = 5 * 2 * HP * wc_pad * 4            # 3 in + 2 out f32 slabs, double-buffered
    band_bytes = 2 * 21 * WC * wc_pad * 2         # 7 bands x 3 taps, bf16 (x2 conservative)
    budget = int(_VMEM_LIMIT * 0.6)               # leave headroom for in-kernel temps
    avail = max(budget - band_bytes, per_view)
    tn_fit = max(1, min(n_views, avail // per_view))
    tn_cap = max(1, 256 // HP)                    # keep matmul M around the 256-row MXU
    tn = int(min(tn_fit, tn_cap, n_views))
    n_steps = -(-n_views // tn)
    if n_views >= 4:
        n_steps = max(n_steps, 2)                 # >=2 grid steps so both TCs get work
    tn = -(-n_views // n_steps)
    return tn, tn * n_steps


def _plan_hw_tile(HW):
    """Pixel-tile size for the AM branch grid."""
    if HW <= 512:
        tm = _round_up(HW, 8)
    else:
        tm = 256
    return tm, _round_up(HW, tm)


# ----------------------------------------------------------------------------
# Kernel 1: angular-mixed branch (all 1x1 / per-pixel matmuls), fully fused:
#   out_am = lrelu( [am_Conv(x_am) | lrelu(lf_am_conv(x_lf))] @ W2 ) + x_am
# plus the am->lf 1x1 projection (am_lf_conv before PixelShuffle) as a 2nd output,
# fused into the same first matmul (w1 = [am_lf_w | am_w]).
# ----------------------------------------------------------------------------
def _am_branch_kernel(am_ref, feat_ref, w1_ref, wlfam_ref, w2_ref,
                      out_am_ref, out_lf2_ref, *, A2C_OUT):
    x = am_ref[0]                                # [TM, C]     float32
    xm = x.astype(_MXU_DTYPE)
    fm = feat_ref[0].astype(_MXU_DTYPE)          # [TM, a*a*C]

    # one dot gives both the am_lf projection (first A2C_OUT cols) and am_Conv (last C)
    h1 = jnp.dot(xm, w1_ref[...], preferred_element_type=jnp.float32)
    out_lf2_ref[0] = h1[:, :A2C_OUT].astype(out_lf2_ref.dtype)
    a1 = h1[:, A2C_OUT:]                          # am_Conv(x_am), no lrelu (matches ref)

    a2 = jnp.dot(fm, wlfam_ref[...], preferred_element_type=jnp.float32)
    a2 = jnp.where(a2 >= 0, a2, a2 * _NEG_SLOPE)  # lrelu(lf_am_conv(x_lf))

    cat = jnp.concatenate([a1, a2], axis=-1).astype(_MXU_DTYPE)   # concat order (am1, am2)
    h = jnp.dot(cat, w2_ref[...], preferred_element_type=jnp.float32)
    h = jnp.where(h >= 0, h, h * _NEG_SLOPE)
    out_am_ref[0] = (h + x).astype(out_am_ref.dtype)


def am_branch(am2d, lf_feat, w1, w_lfam, w2):
    B, HW, C = am2d.shape
    A2C = w_lfam.shape[0]
    A2C_OUT = w1.shape[1] - C
    TM, hw_pad = _plan_hw_tile(HW)
    if hw_pad != HW:
        pad = ((0, 0), (0, hw_pad - HW), (0, 0))
        am2d = jnp.pad(am2d, pad)
        lf_feat = jnp.pad(lf_feat, pad)

    grid = (B, hw_pad // TM)
    in_specs = [
        pl.BlockSpec((1, TM, C), lambda b, m: (b, m, 0)),
        pl.BlockSpec((1, TM, A2C), lambda b, m: (b, m, 0)),
        pl.BlockSpec(w1.shape, lambda b, m: (0, 0)),
        pl.BlockSpec(w_lfam.shape, lambda b, m: (0, 0)),
        pl.BlockSpec(w2.shape, lambda b, m: (0, 0)),
    ]
    out_specs = (pl.BlockSpec((1, TM, C), lambda b, m: (b, m, 0)),
                 pl.BlockSpec((1, TM, A2C_OUT), lambda b, m: (b, m, 0)))
    out_shape = (jax.ShapeDtypeStruct((B, hw_pad, C), jnp.float32),
                 jax.ShapeDtypeStruct((B, hw_pad, A2C_OUT), jnp.float32))

    kernel = functools.partial(_am_branch_kernel, A2C_OUT=A2C_OUT)
    out_am, out_lf2 = pl.pallas_call(
        kernel,
        out_shape=out_shape,
        grid_spec=pltpu.PrefetchScalarGridSpec(
            num_scalar_prefetch=0,
            grid=grid,
            in_specs=in_specs,
            out_specs=out_specs,
        ),
        compiler_params=pltpu.CompilerParams(
            dimension_semantics=("parallel", "parallel"),
            vmem_limit_bytes=_VMEM_LIMIT),
    )(am2d, lf_feat, w1, w_lfam, w2)

    if hw_pad != HW:
        out_am = out_am[:, :HW]
        out_lf2 = out_lf2[:, :HW]
    return out_am, out_lf2


# ----------------------------------------------------------------------------
# Kernel 2: spatial-angular + light-field branches, fully fused.
#
# Per-view slabs are stacked along rows: slab[(v*HP + 1 + h), w*C + c] = view v,
# image row h; rows v*HP and v*HP+H+1.. are zero pad rows.  Every 3x3 conv is
# three [TN*HP, W*C] x [W*C, W*C] banded matmuls; row taps are realized by
# shifting the matmul RESULTS (so inputs are cast to bf16 once and never copied),
# and all per-view padding rows are masked via an iota mask.
# ----------------------------------------------------------------------------
def _lf_sa_kernel(sa_ref, lfv_ref, lf2_ref,
                  bsa_ref, bsa2a_ref, bsa2b_ref,
                  blf_ref, blf2a_ref, blf2b_ref, blf2c_ref,
                  out_sa_ref, out_lf_ref, *, HP, H):
    R, WC = sa_ref.shape

    rows = jax.lax.broadcasted_iota(jnp.int32, (R, WC), 0)
    if HP & (HP - 1) == 0:
        rm = jnp.bitwise_and(rows, HP - 1)
    else:
        rm = rows % HP
    interior = jnp.logical_and(rm >= 1, rm <= H)          # real image rows of each view

    def lrelu(v):
        return jnp.where(v >= 0, v, v * _NEG_SLOPE)

    def conv3(xb, band_ref):
        # out[r] = x[r-1]@band0 + x[r]@band1 + x[r+1]@band2  (pad-row outputs are junk,
        # masked by the caller; block-boundary neighbours are zero pad rows).
        y0 = jnp.dot(xb, band_ref[0], preferred_element_type=jnp.float32)
        y1 = jnp.dot(xb, band_ref[1], preferred_element_type=jnp.float32)
        y2 = jnp.dot(xb, band_ref[2], preferred_element_type=jnp.float32)
        z = jnp.zeros((1, WC), jnp.float32)
        up = jnp.concatenate([z, y0[:-1, :]], axis=0)     # (X@band0)[r-1]
        dn = jnp.concatenate([y2[1:, :], z], axis=0)      # (X@band2)[r+1]
        return up + y1 + dn

    def chain(xb, inner_ref, outer_ref):
        # conv3 -> zero the per-view pad rows -> conv3, intermediate stays in registers
        mid = jnp.where(interior, conv3(xb, inner_ref), 0.0).astype(_MXU_DTYPE)
        return conv3(mid, outer_ref)

    sa_f = sa_ref[...]                                    # f32, kept for the residual
    lfv_f = lfv_ref[...]
    sa_b = sa_f.astype(_MXU_DTYPE)                        # single bf16 cast per slab
    lfv_b = lfv_f.astype(_MXU_DTYPE)
    lf2_b = lf2_ref[...].astype(_MXU_DTYPE)

    # ---- spatial-angular branch: lrelu(sa_Conv2(cat(sa_Conv(sa), sa_Conv(lf)))) + sa
    acc = chain(sa_b, bsa_ref, bsa2a_ref) + chain(lfv_b, bsa_ref, bsa2b_ref)
    out_sa_ref[...] = jnp.where(interior, lrelu(acc) + sa_f, 0.0).astype(out_sa_ref.dtype)

    # ---- light-field branch: lrelu(lf_Conv2(cat(lf_Conv(lf), am_lf(am), lf_Conv(sa)))) + lf
    acc = (chain(lfv_b, blf_ref, blf2a_ref)
           + conv3(lf2_b, blf2b_ref)
           + chain(sa_b, blf_ref, blf2c_ref))
    out_lf_ref[...] = jnp.where(interior, lrelu(acc) + lfv_f, 0.0).astype(out_lf_ref.dtype)


def lf_sa_branches(sa_slab, lfv_slab, lf2_slab, p, *, H, HP, TN):
    RTOT, WC = sa_slab.shape
    R = TN * HP
    grid = (RTOT // R,)

    slab_spec = pl.BlockSpec((R, WC), lambda n: (n, 0))
    band_spec = pl.BlockSpec((3, WC, WC), lambda n: (0, 0, 0))   # VMEM-resident weights
    bands = [p["band_sa"], p["band_sa2a"], p["band_sa2b"],
             p["band_lf"], p["band_lf2a"], p["band_lf2b"], p["band_lf2c"]]

    out_shape = (jax.ShapeDtypeStruct(sa_slab.shape, jnp.float32),
                 jax.ShapeDtypeStruct(sa_slab.shape, jnp.float32))

    kernel = functools.partial(_lf_sa_kernel, HP=HP, H=H)
    return pl.pallas_call(
        kernel,
        out_shape=out_shape,
        grid_spec=pltpu.PrefetchScalarGridSpec(
            num_scalar_prefetch=0,
            grid=grid,
            in_specs=[slab_spec, slab_spec, slab_spec] + [band_spec] * 7,
            out_specs=(slab_spec, slab_spec),
        ),
        compiler_params=pltpu.CompilerParams(
            dimension_semantics=("parallel",),
            vmem_limit_bytes=_VMEM_LIMIT),
    )(sa_slab, lfv_slab, lf2_slab, *bands)


# ----------------------------------------------------------------------------
# One-time parameter preprocessing (banded bf16 weights, fused 1x1 weights)
# ----------------------------------------------------------------------------
def prepare_block(p, *, W, C):
    band = lambda w9: _conv_band(w9, W).astype(_MXU_DTYPE)
    return dict(
        # AM branch (1x1): first matmul produces [am_lf_conv | am_Conv] together
        w1=jnp.concatenate([p["am_lf_w"], p["am_w"]], axis=1).astype(_MXU_DTYPE),
        w_lfam=p["lf_am_w"].astype(_MXU_DTYPE),
        w2=p["am2_w"].astype(_MXU_DTYPE),
        # banded lane-dense 3x3 weights (split by concat-input order of the reference)
        band_sa=band(p["sa_w9"]),
        band_sa2a=band(p["sa2_w9"][:, :C, :]),        # on inter_sa1 = sa_Conv(x_sa)
        band_sa2b=band(p["sa2_w9"][:, C:, :]),        # on inter_sa2 = sa_Conv(LF_to_SA(x_lf))
        band_lf=band(p["lf_w9"]),
        band_lf2a=band(p["lf2_w9"][:, :C, :]),        # on inter_lf1 = lf_Conv(x_lf)
        band_lf2b=band(p["lf2_w9"][:, C:2 * C, :]),   # on inter_lf2 = am_lf_conv(x_am)
        band_lf2c=band(p["lf2_w9"][:, 2 * C:, :]),    # on inter_lf3 = lf_Conv(SA_to_LF(x_sa))
    )


# ----------------------------------------------------------------------------
# InterBlock / Cascaded_InterGroups forward (layout glue stays in plain JAX)
# ----------------------------------------------------------------------------
def interblock_forward(p, am2d, lfv_slab, sa_slab, *, a, B, H, W, C, HP, N, N_pad, TN):
    WC = W * C

    # ---- angular-mixed branch (+ the fused am->lf 1x1 projection) ----
    lfv_int = lfv_slab.reshape(N_pad, HP, WC)[:N, 1:H + 1, :]
    lf_feat = (lfv_int.reshape(B, a, a, H, W, C)
               .transpose(0, 3, 4, 1, 2, 5)
               .reshape(B, H * W, a * a * C))                 # per-pixel (u,v,c) stack
    am_new, lf2flat = am_branch(am2d, lf_feat, p["w1"], p["w_lfam"], p["w2"])

    # am_lf_conv + PixelShuffle(a): scatter the a*a*C outputs onto the views and pad
    lf2 = (lf2flat.reshape(B, H, W, C, a, a)
           .transpose(0, 4, 5, 1, 2, 3)
           .reshape(N, H, WC))
    lf2_slab = jnp.pad(lf2, ((0, N_pad - N), (1, HP - H - 1), (0, 0))).reshape(N_pad * HP, WC)

    # ---- spatial-angular + light-field branches (fully fused kernel) ----
    sa_new, lfv_new = lf_sa_branches(sa_slab, lfv_slab, lf2_slab, p, H=H, HP=HP, TN=TN)
    return am_new, lfv_new, sa_new


def cascaded_forward(prepared, x_am, x_lf, x_sa, *, a, K, n_block):
    B, C, H, W = x_am.shape
    N = B * a * a
    WC = W * C
    HP = _round_up(H + 2, 8)                 # per-view rows: 1 + H + pad, sublane aligned
    TN, N_pad = _plan_views(N, H, HP, WC)

    # PyTorch-facing NCHW / MacPI -> internal lane-dense per-view slabs
    am2d = x_am.transpose(0, 2, 3, 1).reshape(B, H * W, C)
    lfv = (x_lf.reshape(B, C, H, a, W, a)
           .transpose(0, 3, 5, 2, 4, 1)
           .reshape(N, H, WC))                              # view order (b, u, v)
    sa = x_sa.transpose(0, 2, 3, 1).reshape(N, H, WC)

    def to_slab(v):
        v = jnp.pad(v, ((0, N_pad - N), (1, HP - H - 1), (0, 0)))
        return v.reshape(N_pad * HP, WC)

    lfv_slab = to_slab(lfv)
    sa_slab = to_slab(sa)

    cas_am, cas_lf, cas_sa = [], [], []
    idx = 0
    for _k in range(K):
        for _b in range(n_block):
            am2d, lfv_slab, sa_slab = interblock_forward(
                prepared[idx], am2d, lfv_slab, sa_slab,
                a=a, B=B, H=H, W=W, C=C, HP=HP, N=N, N_pad=N_pad, TN=TN)
            idx += 1
        cas_am.append(am2d)
        cas_lf.append(lfv_slab)
        cas_sa.append(sa_slab)

    def am_to_nchw(x):
        return x.reshape(B, H, W, C).transpose(0, 3, 1, 2)

    def slab_views(xs):
        return xs.reshape(N_pad, HP, WC)[:N, 1:H + 1, :]

    def views_to_lf_nchw(xs):
        v = slab_views(xs).reshape(B, a, a, H, W, C)
        return v.transpose(0, 5, 3, 1, 4, 2).reshape(B, C, a * H, a * W)

    def views_to_sa_nchw(xs):
        return slab_views(xs).reshape(N, H, W, C).transpose(0, 3, 1, 2)

    out_am = jnp.concatenate([am_to_nchw(x) for x in cas_am], axis=1)
    out_lf = jnp.concatenate([views_to_lf_nchw(x) for x in cas_lf], axis=1)
    out_sa = jnp.concatenate([views_to_sa_nchw(x) for x in cas_sa], axis=1)
    return out_am, out_lf, out_sa


# ----------------------------------------------------------------------------
# Deterministic parameter init (PyTorch conv weight shapes, re-laid out)
# ----------------------------------------------------------------------------
def init_params(key, a, K, n_block, C):
    def mk(k, shape):
        fan_in = shape[1] * shape[2] * shape[3]
        return jax.random.normal(k, shape, jnp.float32) / math.sqrt(fan_in)

    blocks = []
    for _ in range(K * n_block):
        key, *ks = jax.random.split(key, 9)
        sa_w = mk(ks[0], (C, C, 3, 3))
        sa2_w = mk(ks[1], (C, 2 * C, 3, 3))
        am_w = mk(ks[2], (C, C, 1, 1))
        am2_w = mk(ks[3], (C, 2 * C, 1, 1))
        lf_w = mk(ks[4], (C, C, 3, 3))
        lf2_w = mk(ks[5], (C, 3 * C, 3, 3))
        lf_am_w = mk(ks[6], (C, C, a, a))
        am_lf_w = mk(ks[7], (a * a * C, C, 1, 1))
        blocks.append(dict(
            am_w=am_w[:, :, 0, 0].T,                                    # [Cin, Cout]
            am2_w=am2_w[:, :, 0, 0].T,                                  # [2C, C]
            am_lf_w=am_lf_w[:, :, 0, 0].T,                              # [C, a*a*C]
            lf_am_w=jnp.transpose(lf_am_w, (2, 3, 1, 0)).reshape(a * a * C, C),
            sa_w9=jnp.transpose(sa_w, (2, 3, 1, 0)).reshape(9, C, C),   # tap-major
            sa2_w9=jnp.transpose(sa2_w, (2, 3, 1, 0)).reshape(9, 2 * C, C),
            lf_w9=jnp.transpose(lf_w, (2, 3, 1, 0)).reshape(9, C, C),
            lf2_w9=jnp.transpose(lf2_w, (2, 3, 1, 0)).reshape(9, 3 * C, C),
        ))
    return blocks


# ----------------------------------------------------------------------------
if __name__ == "__main__":
    a, K, n_block, C = 3, 2, 1, 8
    B, H, W = 1, 8, 8

    key = jax.random.PRNGKey(0)
    k1, k2, k3, kp = jax.random.split(key, 4)
    x_am = jax.random.normal(k1, (B, C, H, W), jnp.float32)
    x_lf = jax.random.normal(k2, (B, C, a * H, a * W), jnp.float32)
    x_sa = jax.random.normal(k3, (B * a * a, C, H, W), jnp.float32)

    params = init_params(kp, a, K, n_block, C)
    prepared = [prepare_block(p, W=W, C=C) for p in params]   # one-time band/bf16 prep

    fwd = jax.jit(functools.partial(cascaded_forward, a=a, K=K, n_block=n_block))
    cas_am, cas_lf, cas_sa = fwd(prepared, x_am, x_lf, x_sa)
    jax.block_until_ready((cas_am, cas_lf, cas_sa))

    assert cas_am.shape == (B, K * C, H, W)
    assert cas_lf.shape == (B, K * C, a * H, a * W)
    assert cas_sa.shape == (B * a * a, K * C, H, W)
    assert all(bool(jnp.all(jnp.isfinite(t))) for t in (cas_am, cas_lf, cas_sa))

    print("KERNEL_OK")
</pallas_src>

<mosaic_0001>
module attributes {stable_mosaic.version = 11 : i64} {
  func.func @_am_branch_kernel(%arg0: i32, %arg1: i32, %arg2: memref<1x64x8xf32, #tpu.memory_space<vmem>>, %arg3: memref<1x64x72xf32, #tpu.memory_space<vmem>>, %arg4: memref<8x80xbf16, #tpu.memory_space<vmem>>, %arg5: memref<72x8xbf16, #tpu.memory_space<vmem>>, %arg6: memref<16x8xbf16, #tpu.memory_space<vmem>>, %arg7: memref<1x64x8xf32, #tpu.memory_space<vmem>>, %arg8: memref<1x64x72xf32, #tpu.memory_space<vmem>>) attributes {dimension_semantics = [#tpu.dimension_semantics<parallel>, #tpu.dimension_semantics<parallel>], iteration_bounds = array<i64: 1, 1>, scalar_prefetch = 0 : i64, scratch_operands = 0 : i64, tpu.core_type = #tpu.core_type<tc>, window_params = [{transform_indices = @transform_0, window_bounds = array<i64: 1, 64, 8>}, {transform_indices = @transform_1, window_bounds = array<i64: 1, 64, 72>}, {pipeline_mode = #tpu.pipeline_mode<synchronous>, transform_indices = @transform_2, window_bounds = array<i64: 8, 80>}, {pipeline_mode = #tpu.pipeline_mode<synchronous>, transform_indices = @transform_3, window_bounds = array<i64: 72, 8>}, {pipeline_mode = #tpu.pipeline_mode<synchronous>, transform_indices = @transform_4, window_bounds = array<i64: 16, 8>}, {transform_indices = @transform_5, window_bounds = array<i64: 1, 64, 8>}, {transform_indices = @transform_6, window_bounds = array<i64: 1, 64, 72>}]} {
    %c0 = arith.constant 0 : index
    %c0_0 = arith.constant 0 : index
    %c0_1 = arith.constant 0 : index
    %0 = vector.load %arg2[%c0, %c0_0, %c0_1] : memref<1x64x8xf32, #tpu.memory_space<vmem>>, vector<1x64x8xf32>
    %1 = vector.shape_cast %0 : vector<1x64x8xf32> to vector<64x8xf32>
    %2 = arith.truncf %1 : vector<64x8xf32> to vector<64x8xbf16>
    %c0_2 = arith.constant 0 : index
    %c0_3 = arith.constant 0 : index
    %c0_4 = arith.constant 0 : index
    %3 = vector.load %arg3[%c0_2, %c0_3, %c0_4] : memref<1x64x72xf32, #tpu.memory_space<vmem>>, vector<1x64x72xf32>
    %4 = vector.shape_cast %3 : vector<1x64x72xf32> to vector<64x72xf32>
    %5 = arith.truncf %4 : vector<64x72xf32> to vector<64x72xbf16>
    %c0_5 = arith.constant 0 : index
    %c0_6 = arith.constant 0 : index
    %6 = vector.load %arg4[%c0_5, %c0_6] : memref<8x80xbf16, #tpu.memory_space<vmem>>, vector<8x80xbf16>
    %cst = arith.constant dense<0.000000e+00> : vector<64x80xf32>
    %7 = tpu.matmul %2, %6, %cst {dimension_numbers = #tpu.dot_dimension_numbers<[1], [0], [0], [1], [0, 0, 1, 1], [], []>} : vector<64x8xbf16>, vector<8x80xbf16>, vector<64x80xf32> -> vector<64x80xf32>
    %8 = vector.extract_strided_slice %7 {offsets = [0, 0], sizes = [64, 72], strides = [1, 1]} : vector<64x80xf32> to vector<64x72xf32>
    %c0_7 = arith.constant 0 : index
    %c0_8 = arith.constant 0 : index
    %c0_9 = arith.constant 0 : index
    %9 = vector.load %arg8[%c0_7, %c0_8, %c0_9] : memref<1x64x72xf32, #tpu.memory_space<vmem>>, vector<1x64x72xf32>
    %10 = vector.shape_cast %9 : vector<1x64x72xf32> to vector<64x72xf32>
    %11 = vector.shape_cast %8 : vector<64x72xf32> to vector<1x64x72xf32>
    tpu.vector_store %arg8[%c0_7, %c0_8, %c0_9], %11 {strides = array<i32>} : memref<1x64x72xf32, #tpu.memory_space<vmem>>, vector<1x64x72xf32>,
    %12 = vector.extract_strided_slice %7 {offsets = [0, 72], sizes = [64, 8], strides = [1, 1]} : vector<64x80xf32> to vector<64x8xf32>
    %c0_10 = arith.constant 0 : index
    %c0_11 = arith.constant 0 : index
    %13 = vector.load %arg5[%c0_10, %c0_11] : memref<72x8xbf16, #tpu.memory_space<vmem>>, vector<72x8xbf16>
    %cst_12 = arith.constant dense<0.000000e+00> : vector<64x8xf32>
    %14 = tpu.matmul %5, %13, %cst_12 {dimension_numbers = #tpu.dot_dimension_numbers<[1], [0], [0], [1], [0, 0, 1, 1], [], []>} : vector<64x72xbf16>, vector<72x8xbf16>, vector<64x8xf32> -> vector<64x8xf32>
    %cst_13 = arith.constant 0.000000e+00 : f32
    %15 = vector.broadcast %cst_13 : f32 to vector<64x8xf32>
    %16 = arith.cmpf oge, %14, %15 : vector<64x8xf32>
    %cst_14 = arith.constant 1.000000e-01 : f32
    %17 = vector.broadcast %cst_14 : f32 to vector<64x8xf32>
    %18 = arith.mulf %14, %17 : vector<64x8xf32>
    %19 = arith.select %16, %14, %18 : vector<64x8xi1>, vector<64x8xf32>
    %20 = tpu.concatenate %12, %19 in 1 : vector<64x8xf32>, vector<64x8xf32> -> vector<64x16xf32>
    %21 = arith.truncf %20 : vector<64x16xf32> to vector<64x16xbf16>
    %c0_15 = arith.constant 0 : index
    %c0_16 = arith.constant 0 : index
    %22 = vector.load %arg6[%c0_15, %c0_16] : memref<16x8xbf16, #tpu.memory_space<vmem>>, vector<16x8xbf16>
    %cst_17 = arith.constant dense<0.000000e+00> : vector<64x8xf32>
    %23 = tpu.matmul %21, %22, %cst_17 {dimension_numbers = #tpu.dot_dimension_numbers<[1], [0], [0], [1], [0, 0, 1, 1], [], []>} : vector<64x16xbf16>, vector<16x8xbf16>, vector<64x8xf32> -> vector<64x8xf32>
    %cst_18 = arith.constant 0.000000e+00 : f32
    %24 = vector.broadcast %cst_18 : f32 to vector<64x8xf32>
    %25 = arith.cmpf oge, %23, %24 : vector<64x8xf32>
    %cst_19 = arith.constant 1.000000e-01 : f32
    %26 = vector.broadcast %cst_19 : f32 to vector<64x8xf32>
    %27 = arith.mulf %23, %26 : vector<64x8xf32>
    %28 = arith.select %25, %23, %27 : vector<64x8xi1>, vector<64x8xf32>
    %29 = arith.addf %28, %1 : vector<64x8xf32>
    %c0_20 = arith.constant 0 : index
    %c0_21 = arith.constant 0 : index
    %c0_22 = arith.constant 0 : index
    %30 = vector.load %arg7[%c0_20, %c0_21, %c0_22] : memref<1x64x8xf32, #tpu.memory_space<vmem>>, vector<1x64x8xf32>
    %31 = vector.shape_cast %30 : vector<1x64x8xf32> to vector<64x8xf32>
    %32 = vector.shape_cast %29 : vector<64x8xf32> to vector<1x64x8xf32>
    tpu.vector_store %arg7[%c0_20, %c0_21, %c0_22], %32 {strides = array<i32>} : memref<1x64x8xf32, #tpu.memory_space<vmem>>, vector<1x64x8xf32>,
    return
  }
  func.func @transform_0(%arg0: i32, %arg1: i32) -> (i32, i32, i32) {
    %c0_i32 = arith.constant 0 : i32
    %c0_i32_0 = arith.constant 0 : i32
    return %arg0, %arg1, %c0_i32 : i32, i32, i32
  }
  func.func @transform_1(%arg0: i32, %arg1: i32) -> (i32, i32, i32) {
    %c0_i32 = arith.constant 0 : i32
    %c0_i32_0 = arith.constant 0 : i32
    return %arg0, %arg1, %c0_i32 : i32, i32, i32
  }
  func.func @transform_2(%arg0: i32, %arg1: i32) -> (i32, i32) {
    %c0_i32 = arith.constant 0 : i32
    %c0_i32_0 = arith.constant 0 : i32
    %c0_i32_1 = arith.constant 0 : i32
    return %c0_i32, %c0_i32_0 : i32, i32
  }
  func.func @transform_3(%arg0: i32, %arg1: i32) -> (i32, i32) {
    %c0_i32 = arith.constant 0 : i32
    %c0_i32_0 = arith.constant 0 : i32
    %c0_i32_1 = arith.constant 0 : i32
    return %c0_i32, %c0_i32_0 : i32, i32
  }
  func.func @transform_4(%arg0: i32, %arg1: i32) -> (i32, i32) {
    %c0_i32 = arith.constant 0 : i32
    %c0_i32_0 = arith.constant 0 : i32
    %c0_i32_1 = arith.constant 0 : i32
    return %c0_i32, %c0_i32_0 : i32, i32
  }
  func.func @transform_5(%arg0: i32, %arg1: i32) -> (i32, i32, i32) {
    %c0_i32 = arith.constant 0 : i32
    %c0_i32_0 = arith.constant 0 : i32
    return %arg0, %arg1, %c0_i32 : i32, i32, i32
  }
  func.func @transform_6(%arg0: i32, %arg1: i32) -> (i32, i32, i32) {
    %c0_i32 = arith.constant 0 : i32
    %c0_i32_0 = arith.constant 0 : i32
    return %arg0, %arg1, %c0_i32 : i32, i32, i32
  }
}

module attributes {stable_mosaic.version = 11 : i64} {
  func.func @_lf_sa_kernel(%arg0: i32, %arg1: memref<80x64xf32, #tpu.memory_space<vmem>>, %arg2: memref<80x64xf32, #tpu.memory_space<vmem>>, %arg3: memref<80x64xf32, #tpu.memory_space<vmem>>, %arg4: memref<3x64x64xbf16, #tpu.memory_space<vmem>>, %arg5: memref<3x64x64xbf16, #tpu.memory_space<vmem>>, %arg6: memref<3x64x64xbf16, #tpu.memory_space<vmem>>, %arg7: memref<3x64x64xbf16, #tpu.memory_space<vmem>>, %arg8: memref<3x64x64xbf16, #tpu.memory_space<vmem>>, %arg9: memref<3x64x64xbf16, #tpu.memory_space<vmem>>, %arg10: memref<3x64x64xbf16, #tpu.memory_space<vmem>>, %arg11: memref<80x64xf32, #tpu.memory_space<vmem>>, %arg12: memref<80x64xf32, #tpu.memory_space<vmem>>) attributes {dimension_semantics = [#tpu.dimension_semantics<parallel>], iteration_bounds = array<i64: 2>, scalar_prefetch = 0 : i64, scratch_operands = 0 : i64, tpu.core_type = #tpu.core_type<tc>, window_params = [{transform_indices = @transform_0, window_bounds = array<i64: 80, 64>}, {transform_indices = @transform_1, window_bounds = array<i64: 80, 64>}, {transform_indices = @transform_2, window_bounds = array<i64: 80, 64>}, {pipeline_mode = #tpu.pipeline_mode<synchronous>, transform_indices = @transform_3, window_bounds = array<i64: 3, 64, 64>}, {pipeline_mode = #tpu.pipeline_mode<synchronous>, transform_indices = @transform_4, window_bounds = array<i64: 3, 64, 64>}, {pipeline_mode = #tpu.pipeline_mode<synchronous>, transform_indices = @transform_5, window_bounds = array<i64: 3, 64, 64>}, {pipeline_mode = #tpu.pipeline_mode<synchronous>, transform_indices = @transform_6, window_bounds = array<i64: 3, 64, 64>}, {pipeline_mode = #tpu.pipeline_mode<synchronous>, transform_indices = @transform_7, window_bounds = array<i64: 3, 64, 64>}, {pipeline_mode = #tpu.pipeline_mode<synchronous>, transform_indices = @transform_8, window_bounds = array<i64: 3, 64, 64>}, {pipeline_mode = #tpu.pipeline_mode<synchronous>, transform_indices = @transform_9, window_bounds = array<i64: 3, 64, 64>}, {transform_indices = @transform_10, window_bounds = array<i64: 80, 64>}, {transform_indices = @transform_11, window_bounds = array<i64: 80, 64>}]} {
    %0 = tpu.iota {dimensions = array<i32: 0>} : vector<80x64xi32>
    %c15_i32 = arith.constant 15 : i32
    %1 = vector.broadcast %c15_i32 : i32 to vector<80x64xi32>
    %2 = arith.andi %0, %1 : vector<80x64xi32>
    %c1_i32 = arith.constant 1 : i32
    %3 = vector.broadcast %c1_i32 : i32 to vector<80x64xi32>
    %4 = arith.cmpi sge, %2, %3 : vector<80x64xi32>
    %c8_i32 = arith.constant 8 : i32
    %5 = vector.broadcast %c8_i32 : i32 to vector<80x64xi32>
    %6 = arith.cmpi sle, %2, %5 : vector<80x64xi32>
    %7 = arith.andi %4, %6 : vector<80x64xi1>
    %c0 = arith.constant 0 : index
    %c0_0 = arith.constant 0 : index
    %8 = vector.load %arg1[%c0, %c0_0] : memref<80x64xf32, #tpu.memory_space<vmem>>, vector<80x64xf32>
    %c0_1 = arith.constant 0 : index
    %c0_2 = arith.constant 0 : index
    %9 = vector.load %arg2[%c0_1, %c0_2] : memref<80x64xf32, #tpu.memory_space<vmem>>, vector<80x64xf32>
    %10 = arith.truncf %8 : vector<80x64xf32> to vector<80x64xbf16>
    %11 = arith.truncf %9 : vector<80x64xf32> to vector<80x64xbf16>
    %c0_3 = arith.constant 0 : index
    %c0_4 = arith.constant 0 : index
    %12 = vector.load %arg3[%c0_3, %c0_4] : memref<80x64xf32, #tpu.memory_space<vmem>>, vector<80x64xf32>
    %13 = arith.truncf %12 : vector<80x64xf32> to vector<80x64xbf16>
    %c0_5 = arith.constant 0 : index
    %c0_6 = arith.constant 0 : index
    %c0_7 = arith.constant 0 : index
    %14 = vector.load %arg4[%c0_5, %c0_6, %c0_7] : memref<3x64x64xbf16, #tpu.memory_space<vmem>>, vector<1x64x64xbf16>
    %15 = vector.shape_cast %14 : vector<1x64x64xbf16> to vector<64x64xbf16>
    %cst = arith.constant dense<0.000000e+00> : vector<80x64xf32>
    %16 = tpu.matmul %10, %15, %cst {dimension_numbers = #tpu.dot_dimension_numbers<[1], [0], [0], [1], [0, 0, 1, 1], [], []>} : vector<80x64xbf16>, vector<64x64xbf16>, vector<80x64xf32> -> vector<80x64xf32>
    %c1 = arith.constant 1 : index
    %c0_8 = arith.constant 0 : index
    %c0_9 = arith.constant 0 : index
    %17 = vector.load %arg4[%c1, %c0_8, %c0_9] : memref<3x64x64xbf16, #tpu.memory_space<vmem>>, vector<1x64x64xbf16>
    %18 = vector.shape_cast %17 : vector<1x64x64xbf16> to vector<64x64xbf16>
    %cst_10 = arith.constant dense<0.000000e+00> : vector<80x64xf32>
    %19 = tpu.matmul %10, %18, %cst_10 {dimension_numbers = #tpu.dot_dimension_numbers<[1], [0], [0], [1], [0, 0, 1, 1], [], []>} : vector<80x64xbf16>, vector<64x64xbf16>, vector<80x64xf32> -> vector<80x64xf32>
    %c2 = arith.constant 2 : index
    %c0_11 = arith.constant 0 : index
    %c0_12 = arith.constant 0 : index
    %20 = vector.load %arg4[%c2, %c0_11, %c0_12] : memref<3x64x64xbf16, #tpu.memory_space<vmem>>, vector<1x64x64xbf16>
    %21 = vector.shape_cast %20 : vector<1x64x64xbf16> to vector<64x64xbf16>
    %cst_13 = arith.constant dense<0.000000e+00> : vector<80x64xf32>
    %22 = tpu.matmul %10, %21, %cst_13 {dimension_numbers = #tpu.dot_dimension_numbers<[1], [0], [0], [1], [0, 0, 1, 1], [], []>} : vector<80x64xbf16>, vector<64x64xbf16>, vector<80x64xf32> -> vector<80x64xf32>
    %cst_14 = arith.constant 0.000000e+00 : f32
    %23 = vector.broadcast %cst_14 : f32 to vector<1x64xf32>
    %24 = vector.extract_strided_slice %16 {offsets = [0, 0], sizes = [79, 64], strides = [1, 1]} : vector<80x64xf32> to vector<79x64xf32>
    %25 = tpu.concatenate %23, %24 in 0 : vector<1x64xf32>, vector<79x64xf32> -> vector<80x64xf32>
    %26 = vector.extract_strided_slice %22 {offsets = [1, 0], sizes = [79, 64], strides = [1, 1]} : vector<80x64xf32> to vector<79x64xf32>
    %27 = tpu.concatenate %26, %23 in 0 : vector<79x64xf32>, vector<1x64xf32> -> vector<80x64xf32>
    %28 = arith.addf %25, %19 : vector<80x64xf32>
    %29 = arith.addf %28, %27 : vector<80x64xf32>
    %cst_15 = arith.constant 0.000000e+00 : f32
    %30 = vector.broadcast %cst_15 : f32 to vector<80x64xf32>
    %31 = arith.select %7, %29, %30 : vector<80x64xi1>, vector<80x64xf32>
    %32 = arith.truncf %31 : vector<80x64xf32> to vector<80x64xbf16>
    %c0_16 = arith.constant 0 : index
    %c0_17 = arith.constant 0 : index
    %c0_18 = arith.constant 0 : index
    %33 = vector.load %arg5[%c0_16, %c0_17, %c0_18] : memref<3x64x64xbf16, #tpu.memory_space<vmem>>, vector<1x64x64xbf16>
    %34 = vector.shape_cast %33 : vector<1x64x64xbf16> to vector<64x64xbf16>
    %cst_19 = arith.constant dense<0.000000e+00> : vector<80x64xf32>
    %35 = tpu.matmul %32, %34, %cst_19 {dimension_numbers = #tpu.dot_dimension_numbers<[1], [0], [0], [1], [0, 0, 1, 1], [], []>} : vector<80x64xbf16>, vector<64x64xbf16>, vector<80x64xf32> -> vector<80x64xf32>
    %c1_20 = arith.constant 1 : index
    %c0_21 = arith.constant 0 : index
    %c0_22 = arith.constant 0 : index
    %36 = vector.load %arg5[%c1_20, %c0_21, %c0_22] : memref<3x64x64xbf16, #tpu.memory_space<vmem>>, vector<1x64x64xbf16>
    %37 = vector.shape_cast %36 : vector<1x64x64xbf16> to vector<64x64xbf16>
    %cst_23 = arith.constant dense<0.000000e+00> : vector<80x64xf32>
    %38 = tpu.matmul %32, %37, %cst_23 {dimension_numbers = #tpu.dot_dimension_numbers<[1], [0], [0], [1], [0, 0, 1, 1], [], []>} : vector<80x64xbf16>, vector<64x64xbf16>, vector<80x64xf32> -> vector<80x64xf32>
    %c2_24 = arith.constant 2 : index
    %c0_25 = arith.constant 0 : index
    %c0_26 = arith.constant 0 : index
    %39 = vector.load %arg5[%c2_24, %c0_25, %c0_26] : memref<3x64x64xbf16, #tpu.memory_space<vmem>>, vector<1x64x64xbf16>
    %40 = vector.shape_cast %39 : vector<1x64x64xbf16> to vector<64x64xbf16>
    %cst_27 = arith.constant dense<0.000000e+00> : vector<80x64xf32>
    %41 = tpu.matmul %32, %40, %cst_27 {dimension_numbers = #tpu.dot_dimension_numbers<[1], [0], [0], [1], [0, 0, 1, 1], [], []>} : vector<80x64xbf16>, vector<64x64xbf16>, vector<80x64xf32> -> vector<80x64xf32>
    %cst_28 = arith.constant 0.000000e+00 : f32
    %42 = vector.broadcast %cst_28 : f32 to vector<1x64xf32>
    %43 = vector.extract_strided_slice %35 {offsets = [0, 0], sizes = [79, 64], strides = [1, 1]} : vector<80x64xf32> to vector<79x64xf32>
    %44 = tpu.concatenate %42, %43 in 0 : vector<1x64xf32>, vector<79x64xf32> -> vector<80x64xf32>
    %45 = vector.extract_strided_slice %41 {offsets = [1, 0], sizes = [79, 64], strides = [1, 1]} : vector<80x64xf32> to vector<79x64xf32>
    %46 = tpu.concatenate %45, %42 in 0 : vector<79x64xf32>, vector<1x64xf32> -> vector<80x64xf32>
    %47 = arith.addf %44, %38 : vector<80x64xf32>
    %48 = arith.addf %47, %46 : vector<80x64xf32>
    %c0_29 = arith.constant 0 : index
    %c0_30 = arith.constant 0 : index
    %c0_31 = arith.constant 0 : index
    %49 = vector.load %arg4[%c0_29, %c0_30, %c0_31] : memref<3x64x64xbf16, #tpu.memory_space<vmem>>, vector<1x64x64xbf16>
    %50 = vector.shape_cast %49 : vector<1x64x64xbf16> to vector<64x64xbf16>
    %cst_32 = arith.constant dense<0.000000e+00> : vector<80x64xf32>
    %51 = tpu.matmul %11, %50, %cst_32 {dimension_numbers = #tpu.dot_dimension_numbers<[1], [0], [0], [1], [0, 0, 1, 1], [], []>} : vector<80x64xbf16>, vector<64x64xbf16>, vector<80x64xf32> -> vector<80x64xf32>
    %c1_33 = arith.constant 1 : index
    %c0_34 = arith.constant 0 : index
    %c0_35 = arith.constant 0 : index
    %52 = vector.load %arg4[%c1_33, %c0_34, %c0_35] : memref<3x64x64xbf16, #tpu.memory_space<vmem>>, vector<1x64x64xbf16>
    %53 = vector.shape_cast %52 : vector<1x64x64xbf16> to vector<64x64xbf16>
    %cst_36 = arith.constant dense<0.000000e+00> : vector<80x64xf32>
    %54 = tpu.matmul %11, %53, %cst_36 {dimension_numbers = #tpu.dot_dimension_numbers<[1], [0], [0], [1], [0, 0, 1, 1], [], []>} : vector<80x64xbf16>, vector<64x64xbf16>, vector<80x64xf32> -> vector<80x64xf32>
    %c2_37 = arith.constant 2 : index
    %c0_38 = arith.constant 0 : index
    %c0_39 = arith.constant 0 : index
    %55 = vector.load %arg4[%c2_37, %c0_38, %c0_39] : memref<3x64x64xbf16, #tpu.memory_space<vmem>>, vector<1x64x64xbf16>
    %56 = vector.shape_cast %55 : vector<1x64x64xbf16> to vector<64x64xbf16>
    %cst_40 = arith.constant dense<0.000000e+00> : vector<80x64xf32>
    %57 = tpu.matmul %11, %56, %cst_40 {dimension_numbers = #tpu.dot_dimension_numbers<[1], [0], [0], [1], [0, 0, 1, 1], [], []>} : vector<80x64xbf16>, vector<64x64xbf16>, vector<80x64xf32> -> vector<80x64xf32>
    %cst_41 = arith.constant 0.000000e+00 : f32
    %58 = vector.broadcast %cst_41 : f32 to vector<1x64xf32>
    %59 = vector.extract_strided_slice %51 {offsets = [0, 0], sizes = [79, 64], strides = [1, 1]} : vector<80x64xf32> to vector<79x64xf32>
    %60 = tpu.concatenate %58, %59 in 0 : vector<1x64xf32>, vector<79x64xf32> -> vector<80x64xf32>
    %61 = vector.extract_strided_slice %57 {offsets = [1, 0], sizes = [79, 64], strides = [1, 1]} : vector<80x64xf32> to vector<79x64xf32>
    %62 = tpu.concatenate %61, %58 in 0 : vector<79x64xf32>, vector<1x64xf32> -> vector<80x64xf32>
    %63 = arith.addf %60, %54 : vector<80x64xf32>
    %64 = arith.addf %63, %62 : vector<80x64xf32>
    %cst_42 = arith.constant 0.000000e+00 : f32
    %65 = vector.broadcast %cst_42 : f32 to vector<80x64xf32>
    %66 = arith.select %7, %64, %65 : vector<80x64xi1>, vector<80x64xf32>
    %67 = arith.truncf %66 : vector<80x64xf32> to vector<80x64xbf16>
    %c0_43 = arith.constant 0 : index
    %c0_44 = arith.constant 0 : index
    %c0_45 = arith.constant 0 : index
    %68 = vector.load %arg6[%c0_43, %c0_44, %c0_45] : memref<3x64x64xbf16, #tpu.memory_space<vmem>>, vector<1x64x64xbf16>
    %69 = vector.shape_cast %68 : vector<1x64x64xbf16> to vector<64x64xbf16>
    %cst_46 = arith.constant dense<0.000000e+00> : vector<80x64xf32>
    %70 = tpu.matmul %67, %69, %cst_46 {dimension_numbers = #tpu.dot_dimension_numbers<[1], [0], [0], [1], [0, 0, 1, 1], [], []>} : vector<80x64xbf16>, vector<64x64xbf16>, vector<80x64xf32> -> vector<80x64xf32>
    %c1_47 = arith.constant 1 : index
    %c0_48 = arith.constant 0 : index
    %c0_49 = arith.constant 0 : index
    %71 = vector.load %arg6[%c1_47, %c0_48, %c0_49] : memref<3x64x64xbf16, #tpu.memory_space<vmem>>, vector<1x64x64xbf16>
    %72 = vector.shape_cast %71 : vector<1x64x64xbf16> to vector<64x64xbf16>
    %cst_50 = arith.constant dense<0.000000e+00> : vector<80x64xf32>
    %73 = tpu.matmul %67, %72, %cst_50 {dimension_numbers = #tpu.dot_dimension_numbers<[1], [0], [0], [1], [0, 0, 1, 1], [], []>} : vector<80x64xbf16>, vector<64x64xbf16>, vector<80x64xf32> -> vector<80x64xf32>
    %c2_51 = arith.constant 2 : index
    %c0_52 = arith.constant 0 : index
    %c0_53 = arith.constant 0 : index
    %74 = vector.load %arg6[%c2_51, %c0_52, %c0_53] : memref<3x64x64xbf16, #tpu.memory_space<vmem>>, vector<1x64x64xbf16>
    %75 = vector.shape_cast %74 : vector<1x64x64xbf16> to vector<64x64xbf16>
    %cst_54 = arith.constant dense<0.000000e+00> : vector<80x64xf32>
    %76 = tpu.matmul %67, %75, %cst_54 {dimension_numbers = #tpu.dot_dimension_numbers<[1], [0], [0], [1], [0, 0, 1, 1], [], []>} : vector<80x64xbf16>, vector<64x64xbf16>, vector<80x64xf32> -> vector<80x64xf32>
    %cst_55 = arith.constant 0.000000e+00 : f32
    %77 = vector.broadcast %cst_55 : f32 to vector<1x64xf32>
    %78 = vector.extract_strided_slice %70 {offsets = [0, 0], sizes = [79, 64], strides = [1, 1]} : vector<80x64xf32> to vector<79x64xf32>
    %79 = tpu.concatenate %77, %78 in 0 : vector<1x64xf32>, vector<79x64xf32> -> vector<80x64xf32>
    %80 = vector.extract_strided_slice %76 {offsets = [1, 0], sizes = [79, 64], strides = [1, 1]} : vector<80x64xf32> to vector<79x64xf32>
    %81 = tpu.concatenate %80, %77 in 0 : vector<79x64xf32>, vector<1x64xf32> -> vector<80x64xf32>
    %82 = arith.addf %79, %73 : vector<80x64xf32>
    %83 = arith.addf %82, %81 : vector<80x64xf32>
    %84 = arith.addf %48, %83 : vector<80x64xf32>
    %cst_56 = arith.constant 0.000000e+00 : f32
    %85 = vector.broadcast %cst_56 : f32 to vector<80x64xf32>
    %86 = arith.cmpf oge, %84, %85 : vector<80x64xf32>
    %cst_57 = arith.constant 1.000000e-01 : f32
    %87 = vector.broadcast %cst_57 : f32 to vector<80x64xf32>
    %88 = arith.mulf %84, %87 : vector<80x64xf32>
    %89 = arith.select %86, %84, %88 : vector<80x64xi1>, vector<80x64xf32>
    %90 = arith.addf %89, %8 : vector<80x64xf32>
    %cst_58 = arith.constant 0.000000e+00 : f32
    %91 = vector.broadcast %cst_58 : f32 to vector<80x64xf32>
    %92 = arith.select %7, %90, %91 : vector<80x64xi1>, vector<80x64xf32>
    %c0_59 = arith.constant 0 : index
    %c0_60 = arith.constant 0 : index
    %93 = vector.load %arg11[%c0_59, %c0_60] : memref<80x64xf32, #tpu.memory_space<vmem>>, vector<80x64xf32>
    tpu.vector_store %arg11[%c0_59, %c0_60], %92 {strides = array<i32>} : memref<80x64xf32, #tpu.memory_space<vmem>>, vector<80x64xf32>,
    %c0_61 = arith.constant 0 : index
    %c0_62 = arith.constant 0 : index
    %c0_63 = arith.constant 0 : index
    %94 = vector.load %arg7[%c0_61, %c0_62, %c0_63] : memref<3x64x64xbf16, #tpu.memory_space<vmem>>, vector<1x64x64xbf16>
    %95 = vector.shape_cast %94 : vector<1x64x64xbf16> to vector<64x64xbf16>
    %cst_64 = arith.constant dense<0.000000e+00> : vector<80x64xf32>
    %96 = tpu.matmul %11, %95, %cst_64 {dimension_numbers = #tpu.dot_dimension_numbers<[1], [0], [0], [1], [0, 0, 1, 1], [], []>} : vector<80x64xbf16>, vector<64x64xbf16>, vector<80x64xf32> -> vector<80x64xf32>
    %c1_65 = arith.constant 1 : index
    %c0_66 = arith.constant 0 : index
    %c0_67 = arith.constant 0 : index
    %97 = vector.load %arg7[%c1_65, %c0_66, %c0_67] : memref<3x64x64xbf16, #tpu.memory_space<vmem>>, vector<1x64x64xbf16>
    %98 = vector.shape_cast %97 : vector<1x64x64xbf16> to vector<64x64xbf16>
    %cst_68 = arith.constant dense<0.000000e+00> : vector<80x64xf32>
    %99 = tpu.matmul %11, %98, %cst_68 {dimension_numbers = #tpu.dot_dimension_numbers<[1], [0], [0], [1], [0, 0, 1, 1], [], []>} : vector<80x64xbf16>, vector<64x64xbf16>, vector<80x64xf32> -> vector<80x64xf32>
    %c2_69 = arith.constant 2 : index
    %c0_70 = arith.constant 0 : index
    %c0_71 = arith.constant 0 : index
    %100 = vector.load %arg7[%c2_69, %c0_70, %c0_71] : memref<3x64x64xbf16, #tpu.memory_space<vmem>>, vector<1x64x64xbf16>
    %101 = vector.shape_cast %100 : vector<1x64x64xbf16> to vector<64x64xbf16>
    %cst_72 = arith.constant dense<0.000000e+00> : vector<80x64xf32>
    %102 = tpu.matmul %11, %101, %cst_72 {dimension_numbers = #tpu.dot_dimension_numbers<[1], [0], [0], [1], [0, 0, 1, 1], [], []>} : vector<80x64xbf16>, vector<64x64xbf16>, vector<80x64xf32> -> vector<80x64xf32>
    %cst_73 = arith.constant 0.000000e+00 : f32
    %103 = vector.broadcast %cst_73 : f32 to vector<1x64xf32>
    %104 = vector.extract_strided_slice %96 {offsets = [0, 0], sizes = [79, 64], strides = [1, 1]} : vector<80x64xf32> to vector<79x64xf32>
    %105 = tpu.concatenate %103, %104 in 0 : vector<1x64xf32>, vector<79x64xf32> -> vector<80x64xf32>
    %106 = vector.extract_strided_slice %102 {offsets = [1, 0], sizes = [79, 64], strides = [1, 1]} : vector<80x64xf32> to vector<79x64xf32>
    %107 = tpu.concatenate %106, %103 in 0 : vector<79x64xf32>, vector<1x64xf32> -> vector<80x64xf32>
    %108 = arith.addf %105, %99 : vector<80x64xf32>
    %109 = arith.addf %108, %107 : vector<80x64xf32>
    %cst_74 = arith.constant 0.000000e+00 : f32
    %110 = vector.broadcast %cst_74 : f32 to vector<80x64xf32>
    %111 = arith.select %7, %109, %110 : vector<80x64xi1>, vector<80x64xf32>
    %112 = arith.truncf %111 : vector<80x64xf32> to vector<80x64xbf16>
    %c0_75 = arith.constant 0 : index
    %c0_76 = arith.constant 0 : index
    %c0_77 = arith.constant 0 : index
    %113 = vector.load %arg8[%c0_75, %c0_76, %c0_77] : memref<3x64x64xbf16, #tpu.memory_space<vmem>>, vector<1x64x64xbf16>
    %114 = vector.shape_cast %113 : vector<1x64x64xbf16> to vector<64x64xbf16>
    %cst_78 = arith.constant dense<0.000000e+00> : vector<80x64xf32>
    %115 = tpu.matmul %112, %114, %cst_78 {dimension_numbers = #tpu.dot_dimension_numbers<[1], [0], [0], [1], [0, 0, 1, 1], [], []>} : vector<80x64xbf16>, vector<64x64xbf16>, vector<80x64xf32> -> vector<80x64xf32>
    %c1_79 = arith.constant 1 : index
    %c0_80 = arith.constant 0 : index
    %c0_81 = arith.constant 0 : index
    %116 = vector.load %arg8[%c1_79, %c0_80, %c0_81] : memref<3x64x64xbf16, #tpu.memory_space<vmem>>, vector<1x64x64xbf16>
    %117 = vector.shape_cast %116 : vector<1x64x64xbf16> to vector<64x64xbf16>
    %cst_82 = arith.constant dense<0.000000e+00> : vector<80x64xf32>
    %118 = tpu.matmul %112, %117, %cst_82 {dimension_numbers = #tpu.dot_dimension_numbers<[1], [0], [0], [1], [0, 0, 1, 1], [], []>} : vector<80x64xbf16>, vector<64x64xbf16>, vector<80x64xf32> -> vector<80x64xf32>
    %c2_83 = arith.constant 2 : index
    %c0_84 = arith.constant 0 : index
    %c0_85 = arith.constant 0 : index
    %119 = vector.load %arg8[%c2_83, %c0_84, %c0_85] : memref<3x64x64xbf16, #tpu.memory_space<vmem>>, vector<1x64x64xbf16>
    %120 = vector.shape_cast %119 : vector<1x64x64xbf16> to vector<64x64xbf16>
    %cst_86 = arith.constant dense<0.000000e+00> : vector<80x64xf32>
    %121 = tpu.matmul %112, %120, %cst_86 {dimension_numbers = #tpu.dot_dimension_numbers<[1], [0], [0], [1], [0, 0, 1, 1], [], []>} : vector<80x64xbf16>, vector<64x64xbf16>, vector<80x64xf32> -> vector<80x64xf32>
    %cst_87 = arith.constant 0.000000e+00 : f32
    %122 = vector.broadcast %cst_87 : f32 to vector<1x64xf32>
    %123 = vector.extract_strided_slice %115 {offsets = [0, 0], sizes = [79, 64], strides = [1, 1]} : vector<80x64xf32> to vector<79x64xf32>
    %124 = tpu.concatenate %122, %123 in 0 : vector<1x64xf32>, vector<79x64xf32> -> vector<80x64xf32>
    %125 = vector.extract_strided_slice %121 {offsets = [1, 0], sizes = [79, 64], strides = [1, 1]} : vector<80x64xf32> to vector<79x64xf32>
    %126 = tpu.concatenate %125, %122 in 0 : vector<79x64xf32>, vector<1x64xf32> -> vector<80x64xf32>
    %127 = arith.addf %124, %118 : vector<80x64xf32>
    %128 = arith.addf %127, %126 : vector<80x64xf32>
    %c0_88 = arith.constant 0 : index
    %c0_89 = arith.constant 0 : index
    %c0_90 = arith.constant 0 : index
    %129 = vector.load %arg9[%c0_88, %c0_89, %c0_90] : memref<3x64x64xbf16, #tpu.memory_space<vmem>>, vector<1x64x64xbf16>
    %130 = vector.shape_cast %129 : vector<1x64x64xbf16> to vector<64x64xbf16>
    %cst_91 = arith.constant dense<0.000000e+00> : vector<80x64xf32>
    %131 = tpu.matmul %13, %130, %cst_91 {dimension_numbers = #tpu.dot_dimension_numbers<[1], [0], [0], [1], [0, 0, 1, 1], [], []>} : vector<80x64xbf16>, vector<64x64xbf16>, vector<80x64xf32> -> vector<80x64xf32>
    %c1_92 = arith.constant 1 : index
    %c0_93 = arith.constant 0 : index
    %c0_94 = arith.constant 0 : index
    %132 = vector.load %arg9[%c1_92, %c0_93, %c0_94] : memref<3x64x64xbf16, #tpu.memory_space<vmem>>, vector<1x64x64xbf16>
    %133 = vector.shape_cast %132 : vector<1x64x64xbf16> to vector<64x64xbf16>
    %cst_95 = arith.constant dense<0.000000e+00> : vector<80x64xf32>
    %134 = tpu.matmul %13, %133, %cst_95 {dimension_numbers = #tpu.dot_dimension_numbers<[1], [0], [0], [1], [0, 0, 1, 1], [], []>} : vector<80x64xbf16>, vector<64x64xbf16>, vector<80x64xf32> -> vector<80x64xf32>
    %c2_96 = arith.constant 2 : index
    %c0_97 = arith.constant 0 : index
    %c0_98 = arith.constant 0 : index
    %135 = vector.load %arg9[%c2_96, %c0_97, %c0_98] : memref<3x64x64xbf16, #tpu.memory_space<vmem>>, vector<1x64x64xbf16>
    %136 = vector.shape_cast %135 : vector<1x64x64xbf16> to vector<64x64xbf16>
    %cst_99 = arith.constant dense<0.000000e+00> : vector<80x64xf32>
    %137 = tpu.matmul %13, %136, %cst_99 {dimension_numbers = #tpu.dot_dimension_numbers<[1], [0], [0], [1], [0, 0, 1, 1], [], []>} : vector<80x64xbf16>, vector<64x64xbf16>, vector<80x64xf32> -> vector<80x64xf32>
    %cst_100 = arith.constant 0.000000e+00 : f32
    %138 = vector.broadcast %cst_100 : f32 to vector<1x64xf32>
    %139 = vector.extract_strided_slice %131 {offsets = [0, 0], sizes = [79, 64], strides = [1, 1]} : vector<80x64xf32> to vector<79x64xf32>
    %140 = tpu.concatenate %138, %139 in 0 : vector<1x64xf32>, vector<79x64xf32> -> vector<80x64xf32>
    %141 = vector.extract_strided_slice %137 {offsets = [1, 0], sizes = [79, 64], strides = [1, 1]} : vector<80x64xf32> to vector<79x64xf32>
    %142 = tpu.concatenate %141, %138 in 0 : vector<79x64xf32>, vector<1x64xf32> -> vector<80x64xf32>
    %143 = arith.addf %140, %134 : vector<80x64xf32>
    %144 = arith.addf %143, %142 : vector<80x64xf32>
    %145 = arith.addf %128, %144 : vector<80x64xf32>
    %c0_101 = arith.constant 0 : index
    %c0_102 = arith.constant 0 : index
    %c0_103 = arith.constant 0 : index
    %146 = vector.load %arg7[%c0_101, %c0_102, %c0_103] : memref<3x64x64xbf16, #tpu.memory_space<vmem>>, vector<1x64x64xbf16>
    %147 = vector.shape_cast %146 : vector<1x64x64xbf16> to vector<64x64xbf16>
    %cst_104 = arith.constant dense<0.000000e+00> : vector<80x64xf32>
    %148 = tpu.matmul %10, %147, %cst_104 {dimension_numbers = #tpu.dot_dimension_numbers<[1], [0], [0], [1], [0, 0, 1, 1], [], []>} : vector<80x64xbf16>, vector<64x64xbf16>, vector<80x64xf32> -> vector<80x64xf32>
    %c1_105 = arith.constant 1 : index
    %c0_106 = arith.constant 0 : index
    %c0_107 = arith.constant 0 : index
    %149 = vector.load %arg7[%c1_105, %c0_106, %c0_107] : memref<3x64x64xbf16, #tpu.memory_space<vmem>>, vector<1x64x64xbf16>
    %150 = vector.shape_cast %149 : vector<1x64x64xbf16> to vector<64x64xbf16>
    %cst_108 = arith.constant dense<0.000000e+00> : vector<80x64xf32>
    %151 = tpu.matmul %10, %150, %cst_108 {dimension_numbers = #tpu.dot_dimension_numbers<[1], [0], [0], [1], [0, 0, 1, 1], [], []>} : vector<80x64xbf16>, vector<64x64xbf16>, vector<80x64xf32> -> vector<80x64xf32>
    %c2_109 = arith.constant 2 : index
    %c0_110 = arith.constant 0 : index
    %c0_111 = arith.constant 0 : index
    %152 = vector.load %arg7[%c2_109, %c0_110, %c0_111] : memref<3x64x64xbf16, #tpu.memory_space<vmem>>, vector<1x64x64xbf16>
    %153 = vector.shape_cast %152 : vector<1x64x64xbf16> to vector<64x64xbf16>
    %cst_112 = arith.constant dense<0.000000e+00> : vector<80x64xf32>
    %154 = tpu.matmul %10, %153, %cst_112 {dimension_numbers = #tpu.dot_dimension_numbers<[1], [0], [0], [1], [0, 0, 1, 1], [], []>} : vector<80x64xbf16>, vector<64x64xbf16>, vector<80x64xf32> -> vector<80x64xf32>
    %cst_113 = arith.constant 0.000000e+00 : f32
    %155 = vector.broadcast %cst_113 : f32 to vector<1x64xf32>
    %156 = vector.extract_strided_slice %148 {offsets = [0, 0], sizes = [79, 64], strides = [1, 1]} : vector<80x64xf32> to vector<79x64xf32>
    %157 = tpu.concatenate %155, %156 in 0 : vector<1x64xf32>, vector<79x64xf32> -> vector<80x64xf32>
    %158 = vector.extract_strided_slice %154 {offsets = [1, 0], sizes = [79, 64], strides = [1, 1]} : vector<80x64xf32> to vector<79x64xf32>
    %159 = tpu.concatenate %158, %155 in 0 : vector<79x64xf32>, vector<1x64xf32> -> vector<80x64xf32>
    %160 = arith.addf %157, %151 : vector<80x64xf32>
    %161 = arith.addf %160, %159 : vector<80x64xf32>
    %cst_114 = arith.constant 0.000000e+00 : f32
    %162 = vector.broadcast %cst_114 : f32 to vector<80x64xf32>
    %163 = arith.select %7, %161, %162 : vector<80x64xi1>, vector<80x64xf32>
    %164 = arith.truncf %163 : vector<80x64xf32> to vector<80x64xbf16>
    %c0_115 = arith.constant 0 : index
    %c0_116 = arith.constant 0 : index
    %c0_117 = arith.constant 0 : index
    %165 = vector.load %arg10[%c0_115, %c0_116, %c0_117] : memref<3x64x64xbf16, #tpu.memory_space<vmem>>, vector<1x64x64xbf16>
    %166 = vector.shape_cast %165 : vector<1x64x64xbf16> to vector<64x64xbf16>
    %cst_118 = arith.constant dense<0.000000e+00> : vector<80x64xf32>
    %167 = tpu.matmul %164, %166, %cst_118 {dimension_numbers = #tpu.dot_dimension_numbers<[1], [0], [0], [1], [0, 0, 1, 1], [], []>} : vector<80x64xbf16>, vector<64x64xbf16>, vector<80x64xf32> -> vector<80x64xf32>
    %c1_119 = arith.constant 1 : index
    %c0_120 = arith.constant 0 : index
    %c0_121 = arith.constant 0 : index
    %168 = vector.load %arg10[%c1_119, %c0_120, %c0_121] : memref<3x64x64xbf16, #tpu.memory_space<vmem>>, vector<1x64x64xbf16>
    %169 = vector.shape_cast %168 : vector<1x64x64xbf16> to vector<64x64xbf16>
    %cst_122 = arith.constant dense<0.000000e+00> : vector<80x64xf32>
    %170 = tpu.matmul %164, %169, %cst_122 {dimension_numbers = #tpu.dot_dimension_numbers<[1], [0], [0], [1], [0, 0, 1, 1], [], []>} : vector<80x64xbf16>, vector<64x64xbf16>, vector<80x64xf32> -> vector<80x64xf32>
    %c2_123 = arith.constant 2 : index
    %c0_124 = arith.constant 0 : index
    %c0_125 = arith.constant 0 : index
    %171 = vector.load %arg10[%c2_123, %c0_124, %c0_125] : memref<3x64x64xbf16, #tpu.memory_space<vmem>>, vector<1x64x64xbf16>
    %172 = vector.shape_cast %171 : vector<1x64x64xbf16> to vector<64x64xbf16>
    %cst_126 = arith.constant dense<0.000000e+00> : vector<80x64xf32>
    %173 = tpu.matmul %164, %172, %cst_126 {dimension_numbers = #tpu.dot_dimension_numbers<[1], [0], [0], [1], [0, 0, 1, 1], [], []>} : vector<80x64xbf16>, vector<64x64xbf16>, vector<80x64xf32> -> vector<80x64xf32>
    %cst_127 = arith.constant 0.000000e+00 : f32
    %174 = vector.broadcast %cst_127 : f32 to vector<1x64xf32>
    %175 = vector.extract_strided_slice %167 {offsets = [0, 0], sizes = [79, 64], strides = [1, 1]} : vector<80x64xf32> to vector<79x64xf32>
    %176 = tpu.concatenate %174, %175 in 0 : vector<1x64xf32>, vector<79x64xf32> -> vector<80x64xf32>
    %177 = vector.extract_strided_slice %173 {offsets = [1, 0], sizes = [79, 64], strides = [1, 1]} : vector<80x64xf32> to vector<79x64xf32>
    %178 = tpu.concatenate %177, %174 in 0 : vector<79x64xf32>, vector<1x64xf32> -> vector<80x64xf32>
    %179 = arith.addf %176, %170 : vector<80x64xf32>
    %180 = arith.addf %179, %178 : vector<80x64xf32>
    %181 = arith.addf %145, %180 : vector<80x64xf32>
    %cst_128 = arith.constant 0.000000e+00 : f32
    %182 = vector.broadcast %cst_128 : f32 to vector<80x64xf32>
    %183 = arith.cmpf oge, %181, %182 : vector<80x64xf32>
    %cst_129 = arith.constant 1.000000e-01 : f32
    %184 = vector.broadcast %cst_129 : f32 to vector<80x64xf32>
    %185 = arith.mulf %181, %184 : vector<80x64xf32>
    %186 = arith.select %183, %181, %185 : vector<80x64xi1>, vector<80x64xf32>
    %187 = arith.addf %186, %9 : vector<80x64xf32>
    %cst_130 = arith.constant 0.000000e+00 : f32
    %188 = vector.broadcast %cst_130 : f32 to vector<80x64xf32>
    %189 = arith.select %7, %187, %188 : vector<80x64xi1>, vector<80x64xf32>
    %c0_131 = arith.constant 0 : index
    %c0_132 = arith.constant 0 : index
    %190 = vector.load %arg12[%c0_131, %c0_132] : memref<80x64xf32, #tpu.memory_space<vmem>>, vector<80x64xf32>
    tpu.vector_store %arg12[%c0_131, %c0_132], %189 {strides = array<i32>} : memref<80x64xf32, #tpu.memory_space<vmem>>, vector<80x64xf32>,
    return
  }
  func.func @transform_0(%arg0: i32) -> (i32, i32) {
    %c0_i32 = arith.constant 0 : i32
    %c0_i32_0 = arith.constant 0 : i32
    return %arg0, %c0_i32 : i32, i32
  }
  func.func @transform_1(%arg0: i32) -> (i32, i32) {
    %c0_i32 = arith.constant 0 : i32
    %c0_i32_0 = arith.constant 0 : i32
    return %arg0, %c0_i32 : i32, i32
  }
  func.func @transform_2(%arg0: i32) -> (i32, i32) {
    %c0_i32 = arith.constant 0 : i32
    %c0_i32_0 = arith.constant 0 : i32
    return %arg0, %c0_i32 : i32, i32
  }
  func.func @transform_3(%arg0: i32) -> (i32, i32, i32) {
    %c0_i32 = arith.constant 0 : i32
    %c0_i32_0 = arith.constant 0 : i32
    %c0_i32_1 = arith.constant 0 : i32
    %c0_i32_2 = arith.constant 0 : i32
    return %c0_i32, %c0_i32_0, %c0_i32_1 : i32, i32, i32
  }
  func.func @transform_4(%arg0: i32) -> (i32, i32, i32) {
    %c0_i32 = arith.constant 0 : i32
    %c0_i32_0 = arith.constant 0 : i32
    %c0_i32_1 = arith.constant 0 : i32
    %c0_i32_2 = arith.constant 0 : i32
    return %c0_i32, %c0_i32_0, %c0_i32_1 : i32, i32, i32
  }
  func.func @transform_5(%arg0: i32) -> (i32, i32, i32) {
    %c0_i32 = arith.constant 0 : i32
    %c0_i32_0 = arith.constant 0 : i32
    %c0_i32_1 = arith.constant 0 : i32
    %c0_i32_2 = arith.constant 0 : i32
    return %c0_i32, %c0_i32_0, %c0_i32_1 : i32, i32, i32
  }
  func.func @transform_6(%arg0: i32) -> (i32, i32, i32) {
    %c0_i32 = arith.constant 0 : i32
    %c0_i32_0 = arith.constant 0 : i32
    %c0_i32_1 = arith.constant 0 : i32
    %c0_i32_2 = arith.constant 0 : i32
    return %c0_i32, %c0_i32_0, %c0_i32_1 : i32, i32, i32
  }
  func.func @transform_7(%arg0: i32) -> (i32, i32, i32) {
    %c0_i32 = arith.constant 0 : i32
    %c0_i32_0 = arith.constant 0 : i32
    %c0_i32_1 = arith.constant 0 : i32
    %c0_i32_2 = arith.constant 0 : i32
    return %c0_i32, %c0_i32_0, %c0_i32_1 : i32, i32, i32
  }
  func.func @transform_8(%arg0: i32) -> (i32, i32, i32) {
    %c0_i32 = arith.constant 0 : i32
    %c0_i32_0 = arith.constant 0 : i32
    %c0_i32_1 = arith.constant 0 : i32
    %c0_i32_2 = arith.constant 0 : i32
    return %c0_i32, %c0_i32_0, %c0_i32_1 : i32, i32, i32
  }
  func.func @transform_9(%arg0: i32) -> (i32, i32, i32) {
    %c0_i32 = arith.constant 0 : i32
    %c0_i32_0 = arith.constant 0 : i32
    %c0_i32_1 = arith.constant 0 : i32
    %c0_i32_2 = arith.constant 0 : i32
    return %c0_i32, %c0_i32_0, %c0_i32_1 : i32, i32, i32
  }
  func.func @transform_10(%arg0: i32) -> (i32, i32) {
    %c0_i32 = arith.constant 0 : i32
    %c0_i32_0 = arith.constant 0 : i32
    return %arg0, %c0_i32 : i32, i32
  }
  func.func @transform_11(%arg0: i32) -> (i32, i32) {
    %c0_i32 = arith.constant 0 : i32
    %c0_i32_0 = arith.constant 0 : i32
    return %arg0, %c0_i32 : i32, i32
  }
}

</mosaic_0001>

<bundles_post_ra>
// kernel: cascaded_forward.4
= control target key start
LH: loop header
LB: loop body
LE: loop exit
PB: predicated region body
PF: predicated region fallthrough
CT: control target
= control target key end

     0   :  { %vm61_vm0 = vcmask 1043456   ;;  %vm48_vm1 = vcmask 64512   ;;  %vm130_vm2 = vcmask 588800   ;;  %s614_s21 = smov 56   ;;  %vm363_vm11 = vcmask 130048   ;;  %s844_s3 = inlined_call_operand.vmem [shape: bf16[72,8], index: 3, kind: input, shape index: {}]   ;;  %s845_s2 = inlined_call_operand.vmem [shape: bf16[8,80], index: 2, kind: input, shape index: {}]   ;;  %s846_s0 = inlined_call_operand.vmem [shape: f32[1,64,8], index: 0, kind: input, shape index: {}]   ;;  %s847_s1 = inlined_call_operand.vmem [shape: f32[1,64,72], index: 1, kind: input, shape index: {}]   ;;  %s848_s4 = inlined_call_operand.vmem [shape: bf16[16,8], index: 4, kind: input, shape index: {}]   ;;  %s849_s6 = inlined_call_operand.vmem [shape: f32[1,64,72], index: 6, kind: output, shape index: {1}]   ;;  %s850_s5 = inlined_call_operand.vmem [shape: f32[1,64,8], index: 5, kind: output, shape index: {0}]  }
   0x1   :  { %v608_v0 = vld [vmem:[%s844_s3] sm:$0xff]   ;;  %v609_v1 = vld [vmem:[%s844_s3 + $0x8] sm:$0xff]   ;;  %v610_v2 = vld [vmem:[%s844_s3 + $0x10] sm:$0xff]  }
   0x2   :  { %536 = vmatprep.subr.bf16.mxu1 %v608_v0  ;;  %v47_v3 = vld [vmem:[%s845_s2] sm:$0xf]  ;;  %v673_v6 = vld [vmem:[%s846_s0 + $0x8] sm:$0xff]  ;;  %v678_v7 = vld [vmem:[%s846_s0 + $0x10] sm:$0xff] }
   0x3   :  { %537 = vmatpush3.bf16.msra.mxu1 %v608_v0  ;;  %564 = vmatprep.subr.msk.bf16.mxu0 %vm61_vm0, %v47_v3  ;;  %v63_v4 = vsel %vm61_vm0, %v47_v3, 0  ;;  %v668_v5 = vld [vmem:[%s846_s0] sm:$0xff]  ;;  %v685_v9 = vld [vmem:[%s846_s0 + $0x18] sm:$0xff]  ;;  %v36_v11 = vld [vmem:[%s847_s1 + $0x8] sm:$0xff] }
   0x4   :  { %538 = vmatprep.subr.bf16.mxu1 %v609_v1  ;;  %527 = vmatpush3.bf16.msra.mxu0 %v63_v4  ;;  %v31_v8 = vpack.c.bf16 %v673_v6, %v668_v5  ;;  %v35_v10 = vld [vmem:[%s847_s1] sm:$0xff]  ;;  %v32_v12 = vpack.c.bf16 %v685_v9, %v678_v7  ;;  %v611_v15 = vld [vmem:[%s844_s3 + $0x18] sm:$0xff]   ;;  %v707_v16 = vld [vmem:[%s846_s0 + $0x28] sm:$0xff] }
   0x5   :  { %v43_v13 = vpack.c.bf16 %v36_v11, %v35_v10  ;;  %v698_v14 = vld [vmem:[%s846_s0 + $0x20] sm:$0xff]  ;;  %v716_v18 = vld [vmem:[%s846_s0 + $0x30] sm:$0xff]  ;;  %v721_v19 = vld [vmem:[%s846_s0 + $0x38] sm:$0xff] }
   0x6   :  { %528 = vmatprep.mubr.msk.bf16.mxu0 %vm48_vm1, %v31_v8  ;;  %v33_v17 = vpack.c.bf16 %v707_v16, %v698_v14  ;;  %v612_v20 = vld [vmem:[%s844_s3 + $0x20] ss:$0 sps:$4 sm:$0xff]   ;;  %v34_v21 = vpack.c.bf16 %v721_v19, %v716_v18  ;;  %v37_v22 = vld [vmem:[%s847_s1 + $0x10] sm:$0xff]  ;;  %v38_v23 = vld [vmem:[%s847_s1 + $0x18] sm:$0xff] }
   0x7   :  { %539 = vmatpush3.bf16.msra.mxu1 %v609_v1  ;;  %529 = vmatmul.mubr.msk.bf16.vlgmr.msra.gmra.mrb[0].mxu0 %vm48_vm1, %v32_v12  ;;  %v188_v24 = vsel %vm61_vm0, %v612_v20, 0  ;;  %v39_v25 = vld [vmem:[%s847_s1 + $0x20] sm:$0xff]  ;;  %v40_v26 = vld [vmem:[%s847_s1 + $0x28] sm:$0xff]  ;;  %v44_v27 = vpack.c.bf16 %v38_v23, %v37_v22  ;;  %v41_v29 = vld [vmem:[%s847_s1 + $0x30] sm:$0xff] }
   0x8   :  { %540 = vmatprep.subr.bf16.mxu1 %v610_v2  ;;  %546 = vmatprep.mubr.msk.bf16.mxu1 %vm130_vm2, %v43_v13  ;;  %v45_v28 = vpack.c.bf16 %v40_v26, %v39_v25  ;;  %v42_v30 = vld [vmem:[%s847_s1 + $0x38] sm:$0xff]  ;;  %v613_v32 = vld [vmem:[%s848_s4] sm:$0xff]  }
   0x9   :  { %532 = vmatprep.mubr.msk.bf16.mxu0 %vm48_vm1, %v33_v17  ;;  %v46_v31 = vpack.c.bf16 %v42_v30, %v41_v29  ;;  %554 = vmatprep.subr.bf16.mxu0 %v613_v32 }
   0xa   :  { %555 = vmatpush3.bf16.msra.mxu0 %v613_v32 }
   0xb   :  { %541 = vmatpush3.bf16.msra.mxu1 %v610_v2 }
   0xc   :  { %542 = vmatprep.subr.bf16.mxu1 %v611_v15 }
   0xf   :  { %543 = vmatpush3.bf16.msra.mxu1 %v611_v15  ;;  %533 = vmatmul.mubr.msk.bf16.gmra.mrb[4].mxu0 %vm48_vm1, %v34_v21 }
  0x10   :  { %565 = vmatprep.subr.msk.bf16.mxu1 %vm61_vm0, %v612_v20 }
  0x13   :  { %545 = vmatpush3.bf16.msra.mxu1 %v188_v24 }
  0x16   :  { %547 = vmatmul.mubr.msk.bf16.vlgmr.msra.gmra.mrb[0].mxu1 %vm130_vm2, %v44_v27 }
  0x17   :  { %550 = vmatprep.mubr.msk.bf16.mxu1 %vm130_vm2, %v45_v28 }
  0x1e   :  { %551 = vmatmul.mubr.msk.bf16.gmra.mrb[4].mxu1 %vm130_vm2, %v46_v31 }
  0xda   :  { %v530_v33 = vpop.f32.mrb[0].mxu0 }
  0xdb   :  { %133 = vst.msk [vmem:[%s849_s6 + $0x10] sm:$0xff] %vm130_vm2, %v530_v33  ;;  %v99_v34 = vpop.f32.mrb[1].mxu0 }
  0xdc   :  { %131 = vst.msk [vmem:[%s849_s6] sm:$0xff] %vm130_vm2, %v99_v34  ;;  %v531_v35 = vpop.f32.mrb[2].mxu0 }
  0xdd   :  { %134 = vst.msk [vmem:[%s849_s6 + $0x18] sm:$0xff] %vm130_vm2, %v531_v35  ;;  %v102_v36 = vpop.f32.mrb[3].mxu0  ;;  %v578_v37 = vpack.i.bf16 %v531_v35, %v530_v33 }
  0xde   :  { %132 = vst.msk [vmem:[%s849_s6 + $0x8] sm:$0xff] %vm130_vm2, %v102_v36  ;;  %v568_v38 = vpack.i.bf16 %v102_v36, %v99_v34 }
  0xdf   :  { %579 = vrot.lane.b32.xlu1 %v578_v37, %s614_s21 }
  0xe0   :  { %569 = vrot.lane.b32.xlu0 %v568_v38, %s614_s21 }
  0xe2   :  { %v534_v39 = vpop.f32.mrb[4].mxu0 }
  0xe3   :  { %137 = vst.msk [vmem:[%s849_s6 + $0x30] sm:$0xff] %vm130_vm2, %v534_v39  ;;  %v115_v40 = vpop.f32.mrb[5].mxu0 }
  0xe4   :  { %135 = vst.msk [vmem:[%s849_s6 + $0x20] sm:$0xff] %vm130_vm2, %v115_v40  ;;  %v535_v41 = vpop.f32.mrb[6].mxu0 }
  0xe5   :  { %v598_v42 = vpack.i.bf16 %v535_v41, %v534_v39  ;;  %138 = vst.msk [vmem:[%s849_s6 + $0x38] sm:$0xff] %vm130_vm2, %v535_v41  ;;  %v118_v43 = vpop.f32.mrb[7].mxu0 }
  0xe6   :  { %v588_v44 = vpack.i.bf16 %v118_v43, %v115_v40  ;;  %136 = vst.msk [vmem:[%s849_s6 + $0x28] sm:$0xff] %vm130_vm2, %v118_v43  ;;  %s615_s6 = smov 8  }
  0xe9   :  { %v548_v45 = vpop.f32.mrb[0].mxu1 }
  0xea   :  { %v265_v46 = vmul.f32 0.1, %v548_v45  ;;  %v224_v47 = vpop.f32.mrb[1].mxu1  ;;  %vm257_vm3 = vcmp.ge.f32.partialorder %v548_v45, 0.0 }
  0xeb   :  { %v263_v48 = vmul.f32 0.1, %v224_v47  ;;  %v549_v49 = vpop.f32.mrb[2].mxu1  ;;  %vm255_vm4 = vcmp.ge.f32.partialorder %v224_v47, 0.0 }
  0xec   :  { %vm258_vm5 = vcmp.ge.f32.partialorder %v549_v49, 0.0  ;;  %v266_v50 = vmul.f32 0.1, %v549_v49  ;;  %v227_v51 = vpop.f32.mrb[3].mxu1  ;;  %v273_v53 = vsel %vm257_vm3, %v548_v45, %v265_v46 }
  0xed   :  { %vm256_vm6 = vcmp.ge.f32.partialorder %v227_v51, 0.0  ;;  %v264_v52 = vmul.f32 0.1, %v227_v51  ;;  %v271_v55 = vsel %vm255_vm4, %v224_v47, %v263_v48 }
  0xee   :  { %v274_v54 = vsel %vm258_vm5, %v549_v49, %v266_v50 }
  0xef   :  { %v272_v56 = vsel %vm256_vm6, %v227_v51, %v264_v52  ;;  %v583_v57 = vpack.i.bf16 %v274_v54, %v273_v53 }
  0xf0   :  { %v573_v58 = vpack.i.bf16 %v272_v56, %v271_v55 }
  0xf1   :  { %v552_v59 = vpop.f32.mrb[4].mxu1  ;;  %584 = vrot.lane.b32.xlu1 %v583_v57, %s615_s6 }
  0xf2   :  { %v269_v60 = vmul.f32 0.1, %v552_v59  ;;  %v240_v61 = vpop.f32.mrb[5].mxu1  ;;  %574 = vrot.lane.b32.xlu0 %v573_v58, %s615_s6  ;;  %vm261_vm7 = vcmp.ge.f32.partialorder %v552_v59, 0.0 }
  0xf3   :  { %v267_v62 = vmul.f32 0.1, %v240_v61  ;;  %v553_v63 = vpop.f32.mrb[6].mxu1  ;;  %vm259_vm8 = vcmp.ge.f32.partialorder %v240_v61, 0.0 }
  0xf4   :  { %vm262_vm9 = vcmp.ge.f32.partialorder %v553_v63, 0.0  ;;  %v270_v0 = vmul.f32 0.1, %v553_v63  ;;  %v243_v1 = vpop.f32.mrb[7].mxu1  ;;  %v277_v3 = vsel %vm261_vm7, %v552_v59, %v269_v60 }
  0xf5   :  { %vm260_vm10 = vcmp.ge.f32.partialorder %v243_v1, 0.0  ;;  %v268_v2 = vmul.f32 0.1, %v243_v1  ;;  %v275_v8 = vsel %vm259_vm8, %v240_v61, %v267_v62 }
  0xf6   :  { %v278_v4 = vsel %vm262_vm9, %v553_v63, %v270_v0  ;;  %589 = vrot.lane.b32.xlu0 %v588_v44, %s614_s21 }
  0xf7   :  { %v276_v10 = vsel %vm260_vm10, %v243_v1, %v268_v2  ;;  %v603_v11 = vpack.i.bf16 %v278_v4, %v277_v3 }
  0xf8   :  { %v593_v12 = vpack.i.bf16 %v276_v10, %v275_v8 }
  0xfa   :  { %594 = vrot.lane.b32.xlu1 %v593_v12, %s615_s6  ;;  %599 = vrot.lane.b32.xlu0 %v598_v42, %s614_s21 }
  0xfe   :  { %604 = vrot.lane.b32.xlu1 %v603_v11, %s615_s6 }
 0x151   :  { %v580_v13 = vpop.permute.xlu1 %579 }
 0x152   :  { %v570_v15 = vpop.permute.xlu0 %569  ;;  %v582_v20 = vunpack.i.h.bf16 %v580_v13  ;;  %v581_v21 = vunpack.i.l.bf16 %v580_v13 }
 0x153   :  { %v572_v25 = vunpack.i.h.bf16 %v570_v15  ;;  %v571_v26 = vunpack.i.l.bf16 %v570_v15 }
 0x163   :  { %v585_v17 = vpop.permute.xlu1 %584 }
 0x164   :  { %v587_v22 = vunpack.i.h.bf16 %v585_v17  ;;  %v586_v23 = vunpack.i.l.bf16 %v585_v17  ;;  %v575_v24 = vpop.permute.xlu0 %574 }
 0x165   :  { %v577_v27 = vunpack.i.h.bf16 %v575_v24  ;;  %v576_v28 = vunpack.i.l.bf16 %v575_v24 }
 0x166   :  { %v345_v29 = vsel %vm48_vm1, %v581_v21, %v586_v23  ;;  %v346_v30 = vsel %vm48_vm1, %v582_v20, %v587_v22 }
 0x167   :  { %v343_v31 = vsel %vm48_vm1, %v571_v26, %v576_v28  ;;  %v344_v32 = vsel %vm48_vm1, %v572_v25, %v577_v27  ;;  %v352_v35 = vpack.c.bf16 %v346_v30, %v345_v29 }
 0x168   :  { %v351_v33 = vpack.c.bf16 %v344_v32, %v343_v31  ;;  %v590_v34 = vpop.permute.xlu0 %589 }
 0x169   :  { %v592_v37 = vunpack.i.h.bf16 %v590_v34  ;;  %v591_v38 = vunpack.i.l.bf16 %v590_v34 }
 0x16a   :  { %556 = vmatprep.mubr.msk.bf16.mxu0 %vm363_vm11, %v351_v33 }
 0x16b   :  { %557 = vmatmul.mubr.msk.bf16.vlgmr.msra.gmra.mrb[8].mxu0 %vm363_vm11, %v352_v35 }
 0x16c   :  { %v595_v36 = vpop.permute.xlu1 %594  ;;  %v600_v41 = vpop.permute.xlu0 %599 }
 0x16d   :  { %v597_v39 = vunpack.i.h.bf16 %v595_v36  ;;  %v596_v40 = vunpack.i.l.bf16 %v595_v36  ;;  %v602_v46 = vunpack.i.h.bf16 %v600_v41  ;;  %v601_v47 = vunpack.i.l.bf16 %v600_v41 }
 0x16f   :  { %v347_v42 = vsel %vm48_vm1, %v591_v38, %v596_v40  ;;  %v348_v43 = vsel %vm48_vm1, %v592_v37, %v597_v39 }
 0x170   :  { %v353_v44 = vpack.c.bf16 %v348_v43, %v347_v42  ;;  %v605_v45 = vpop.permute.xlu1 %604 }
 0x171   :  { %v607_v48 = vunpack.i.h.bf16 %v605_v45  ;;  %v606_v49 = vunpack.i.l.bf16 %v605_v45 }
 0x172   :  { %560 = vmatprep.mubr.msk.bf16.mxu0 %vm363_vm11, %v353_v44 }
 0x173   :  { %v349_v50 = vsel %vm48_vm1, %v601_v47, %v606_v49  ;;  %v350_v51 = vsel %vm48_vm1, %v602_v46, %v607_v48 }
 0x174   :  { %v354_v52 = vpack.c.bf16 %v350_v51, %v349_v50 }
 0x176   :  { %561 = vmatmul.mubr.msk.bf16.gmra.mrb[12].mxu0 %vm363_vm11, %v354_v52 }
 0x23e   :  { %v558_v53 = vpop.f32.mrb[8].mxu0 }
 0x23f   :  { %vm443_vm12 = vcmp.ge.f32.partialorder %v558_v53, 0.0  ;;  %v451_v54 = vmul.f32 0.1, %v558_v53  ;;  %v410_v55 = vpop.f32.mrb[9].mxu0 }
 0x240   :  { %vm441_vm13 = vcmp.ge.f32.partialorder %v410_v55, 0.0  ;;  %v449_v56 = vmul.f32 0.1, %v410_v55  ;;  %v559_v57 = vpop.f32.mrb[10].mxu0 }
 0x241   :  { %v459_v58 = vsel %vm443_vm12, %v558_v53, %v451_v54  ;;  %vm444_vm14 = vcmp.ge.f32.partialorder %v559_v57, 0.0  ;;  %v452_v59 = vmul.f32 0.1, %v559_v57  ;;  %v413_v60 = vpop.f32.mrb[11].mxu0 }
 0x242   :  { %v467_v61 = vadd.f32 %v459_v58, %v678_v7  ;;  %v457_v62 = vsel %vm441_vm13, %v410_v55, %v449_v56  ;;  %vm442_vm15 = vcmp.ge.f32.partialorder %v413_v60, 0.0  ;;  %v450_v63 = vmul.f32 0.1, %v413_v60 }
 0x243   :  { %v465_v0 = vadd.f32 %v457_v62, %v668_v5  ;;  %v460_v1 = vsel %vm444_vm14, %v559_v57, %v452_v59 }
 0x244   :  { %475 = vst.msk [vmem:[%s850_s5 + $0x10] sm:$0xff] %vm48_vm1, %v467_v61  ;;  %v468_v2 = vadd.f32 %v460_v1, %v685_v9  ;;  %v458_v3 = vsel %vm442_vm15, %v413_v60, %v450_v63 }
 0x245   :  { %473 = vst.msk [vmem:[%s850_s5] sm:$0xff] %vm48_vm1, %v465_v0  ;;  %v466_v7 = vadd.f32 %v458_v3, %v673_v6 }
 0x246   :  { %476 = vst.msk [vmem:[%s850_s5 + $0x18] sm:$0xff] %vm48_vm1, %v468_v2 }
 0x247   :  { %474 = vst.msk [vmem:[%s850_s5 + $0x8] sm:$0xff] %vm48_vm1, %v466_v7 }
 0x249   :  { %v562_v5 = vpop.f32.mrb[12].mxu0 }
 0x24a   :  { %vm447_vm0 = vcmp.ge.f32.partialorder %v562_v5, 0.0  ;;  %v455_v9 = vmul.f32 0.1, %v562_v5  ;;  %v426_v4 = vpop.f32.mrb[13].mxu0 }
 0x24b   :  { %vm445_vm2 = vcmp.ge.f32.partialorder %v426_v4, 0.0  ;;  %v453_v8 = vmul.f32 0.1, %v426_v4  ;;  %v563_v10 = vpop.f32.mrb[14].mxu0 }
 0x24c   :  { %v463_v11 = vsel %vm447_vm0, %v562_v5, %v455_v9  ;;  %vm448_vm3 = vcmp.ge.f32.partialorder %v563_v10, 0.0  ;;  %v456_v6 = vmul.f32 0.1, %v563_v10  ;;  %v429_v12 = vpop.f32.mrb[15].mxu0 }
 0x24d   :  { %v471_v13 = vadd.f32 %v463_v11, %v716_v18  ;;  %v461_v15 = vsel %vm445_vm2, %v426_v4, %v453_v8  ;;  %vm446_vm4 = vcmp.ge.f32.partialorder %v429_v12, 0.0  ;;  %v454_v17 = vmul.f32 0.1, %v429_v12 }
 0x24e   :  { %v469_v20 = vadd.f32 %v461_v15, %v698_v14  ;;  %v464_v21 = vsel %vm448_vm3, %v563_v10, %v456_v6 }
 0x24f   :  { %479 = vst.msk [vmem:[%s850_s5 + $0x30] sm:$0xff] %vm48_vm1, %v471_v13  ;;  %v472_v22 = vadd.f32 %v464_v21, %v721_v19  ;;  %v462_v23 = vsel %vm446_vm4, %v429_v12, %v454_v17 }
 0x250   :  { %477 = vst.msk [vmem:[%s850_s5 + $0x20] sm:$0xff] %vm48_vm1, %v469_v20  ;;  %v470_v18 = vadd.f32 %v462_v23, %v707_v16 }
 0x251   :  { %480 = vst.msk [vmem:[%s850_s5 + $0x38] sm:$0xff] %vm48_vm1, %v472_v22 }
 0x252   :  { %478 = vst.msk [vmem:[%s850_s5 + $0x28] sm:$0xff] %vm48_vm1, %v470_v18 }

// kernel: cascaded_forward.5
= control target key start
LH: loop header
LB: loop body
LE: loop exit
PB: predicated region body
PF: predicated region fallthrough
CT: control target
= control target key end

     0   :  { %s6240_s17 = smov 0   ;;  %s8072_s0 = inlined_call_operand.vmem [shape: f32[160,64], index: 0, kind: input, shape index: {}]   ;;  %s8073_s1 = inlined_call_operand.vmem [shape: f32[160,64], index: 1, kind: input, shape index: {}]   ;;  %s8074_s2 = inlined_call_operand.vmem [shape: f32[160,64], index: 2, kind: input, shape index: {}]   ;;  %s8075_s3 = inlined_call_operand.vmem [shape: bf16[3,64,64], index: 3, kind: input, shape index: {}]   ;;  %s8076_s4 = inlined_call_operand.vmem [shape: bf16[3,64,64], index: 4, kind: input, shape index: {}]   ;;  %s8077_s5 = inlined_call_operand.vmem [shape: bf16[3,64,64], index: 5, kind: input, shape index: {}]   ;;  %s8078_s6 = inlined_call_operand.vmem [shape: bf16[3,64,64], index: 6, kind: input, shape index: {}]   ;;  %s8079_s7 = inlined_call_operand.vmem [shape: bf16[3,64,64], index: 7, kind: input, shape index: {}]   ;;  %s8080_s8 = inlined_call_operand.vmem [shape: bf16[3,64,64], index: 8, kind: input, shape index: {}]   ;;  %s8081_s9 = inlined_call_operand.vmem [shape: bf16[3,64,64], index: 9, kind: input, shape index: {}]   ;;  %s8082_s10 = inlined_call_operand.vmem [shape: f32[160,64], index: 10, kind: output, shape index: {0}]   ;;  %s8083_s11 = inlined_call_operand.vmem [shape: f32[160,64], index: 11, kind: output, shape index: {1}]  }
   0x1 LB: > { %s4534_s18 = sadd.s32 4294967295, %s6176_s17   ;;  %p4538_p0 = scmp.ge.s32.totalorder %s6176_s17, 1  ;;  %s6176_s17 = sphi %s6240_s17, %s22_s17  }
   0x2   : > { %p363_p1 = scmp.lt.s32.totalorder %s6176_s17, 3 }
   0x4   : > { %p364_p2 = pnand %p4538_p0, %p363_p1 }
   0x5   : > { %v6251_v0 = vld [vmem:[%s8075_s3] sm:$0xff] (!%p364_p2)   ;;  %v6178_v1 = vmov (!%p364_p2), 0.0   ;;  %v6260_v2 = vld [vmem:[%s8075_s3 + $0x8] sm:$0xff] (!%p364_p2)   ;;  %s418_s23 = smul.u32 (!%p364_p2), 10, %s4534_s18  ;;  %vm8084_vm0 = vmmov (!%p364_p2), 0   ;;  %v6273_v3 = vld [vmem:[%s8075_s3 + $0x10] sm:$0xff] (!%p364_p2)  }
   0x6   : > { %367 = sbr.rel (%p364_p2) target bundleno = 1570 (0x622), region = 60  ;;  %5120 = vmatprep.subr.bf16.mxu0 (!%p364_p2), %v6178_v1  ;;  %5876 = vmatprep.subr.bf16.mxu1 (!%p364_p2), %v6178_v1  ;;  %v6282_v4 = vld [vmem:[%s8075_s3 + $0x18] sm:$0xff] (!%p364_p2)   ;;  %v6305_v11 = vld [vmem:[%s8075_s3 + $0x20] sm:$0xff] (!%p364_p2)   ;;  %vm577_vm1 = vcmask (!%p364_p2), 523264   ;;  %v6319_v13 = vld [vmem:[%s8075_s3 + $0x48] sm:$0xff] (!%p364_p2)   ;;  %vm888_vm2 = vcmask (!%p364_p2), 1040384  }
   0x7   : > { %5121 = vmatpush3.bf16.msra.mxu0 (!%p364_p2), %v6251_v0  ;;  %5880 = vmatpush3.bf16.msra.mxu1 (!%p364_p2), %v6251_v0  ;;  %p419_p3 = scmp.lt.s32.totalorder (!%p364_p2), %s418_s23, 19  ;;  %v6312_v12 = vld [vmem:[%s8075_s3 + $0x40] sm:$0xff] (!%p364_p2)   ;;  %v6324_v14 = vld [vmem:[%s8075_s3 + $0x28] sm:$0xff] (!%p364_p2)   ;;  %v6345_v19 = vld [vmem:[%s8075_s3 + $0x50] sm:$0xff] (!%p364_p2)   ;;  %vm929_vm3 = vcmask (!%p364_p2), 1046528  }
   0x8   : > { %5122 = vmatprep.subr.bf16.mxu0 (!%p364_p2), %v6178_v1  ;;  %5877 = vmatprep.subr.bf16.mxu1 (!%p364_p2), %v6178_v1  ;;  %v6350_v20 = vld [vmem:[%s8075_s3 + $0x30] sm:$0xff] (!%p364_p2)   ;;  %v6363_v23 = vld [vmem:[%s8075_s3 + $0x58] sm:$0xff] (!%p364_p2)   ;;  %v6066_v28 = vld [vmem:[%s8076_s4 + $0x20] sm:$0xff] (!%p364_p2)  }
   0x9   : > { %5128 = vmatprep.mubr.msk.bf16.mxu0 (!%p364_p2), %vm8084_vm0, %v6178_v1  ;;  %5136 = vmatprep.mubr.msk.bf16.mxu1 (!%p364_p2), %vm8084_vm0, %v6178_v1  ;;  %v6370_v26 = vld [vmem:[%s8075_s3 + $0x38] sm:$0xff] (!%p364_p2)   ;;  %v6067_v29 = vld [vmem:[%s8076_s4] sm:$0xff] (!%p364_p2)   ;;  %v6068_v30 = vld [vmem:[%s8076_s4 + $0x28] sm:$0xff] (!%p364_p2)  }
   0xa   : > { %v6069_v31 = vld [vmem:[%s8076_s4 + $0x8] sm:$0xff] (!%p364_p2)   ;;  %v6070_v32 = vld [vmem:[%s8076_s4 + $0x30] sm:$0xff] (!%p364_p2)   ;;  %v6072_v34 = vld [vmem:[%s8076_s4 + $0x38] sm:$0xff] (!%p364_p2)  }
   0xb   : > { %5123 = vmatpush3.bf16.msra.mxu0 (!%p364_p2), %v6260_v2  ;;  %5881 = vmatpush3.bf16.msra.mxu1 (!%p364_p2), %v6260_v2  ;;  %v6071_v33 = vld [vmem:[%s8076_s4 + $0x10] sm:$0xff] (!%p364_p2)   ;;  %v6073_v35 = vld [vmem:[%s8076_s4 + $0x18] sm:$0xff] (!%p364_p2)  }
   0xc   : > { %5124 = vmatprep.subr.bf16.mxu0 (!%p364_p2), %v6178_v1  ;;  %5878 = vmatprep.subr.bf16.mxu1 (!%p364_p2), %v6178_v1 }
   0xd   : > { %s8108_s23 = smov (!%p419_p3, %s418_s23), 19 }
   0xe   : > { %s6277_s26 = sshll.u32 %s8108_s23, 3 }
   0xf   : > { %s6288_s12 = scalar_lea.vmem %s8072_s0, %s6277_s26  ;;  %5125 = vmatpush3.bf16.msra.mxu0 %v6273_v3  ;;  %5882 = vmatpush3.bf16.msra.mxu1 %v6273_v3  ;;  %s6647_s24 = scalar_lea.vmem %s8073_s1, %s6277_s26 }
  0x10   : > { %v500_v5 = vld [vmem:[%s6288_s12] sm:$0xff]  ;;  %v501_v6 = vld [vmem:[%s6288_s12 + $0x8] sm:$0xff]  ;;  %5126 = vmatprep.subr.bf16.mxu0 %v6178_v1  ;;  %5879 = vmatprep.subr.bf16.mxu1 %v6178_v1  ;;  %v502_v15 = vld [vmem:[%s6288_s12 + $0x10] sm:$0xff]  ;;  %s7210_s14 = scalar_lea.vmem %s8082_s10, %s6277_s26  ;;  %s7420_s16 = scalar_lea.vmem %s8074_s2, %s6277_s26 }
  0x11   : > { %v504_v7 = vld [vmem:[%s6288_s12 + $0x20] sm:$0xff]  ;;  %v505_v8 = vld [vmem:[%s6288_s12 + $0x28] sm:$0xff]  ;;  %v6298_v9 = vpack.c.bf16 %v501_v6, %v500_v5  ;;  %v503_v16 = vld [vmem:[%s6288_s12 + $0x18] sm:$0xff]  ;;  %v449_v5 = vlaneseq }
  0x12   : > { %v6300_v10 = vpack.c.bf16 %v505_v8, %v504_v7  ;;  %v506_v17 = vld [vmem:[%s6288_s12 + $0x30] sm:$0xff]  ;;  %v507_v18 = vld [vmem:[%s6288_s12 + $0x38] sm:$0xff]  ;;  %v6352_v21 = vpack.c.bf16 %v503_v16, %v502_v15  ;;  %v508_v24 = vld [vmem:[%s6288_s12 + $0x40] sm:$0xff] }
  0x13   : > { %5127 = vmatpush3.bf16.msra.mxu0 %v6282_v4  ;;  %5883 = vmatpush3.bf16.msra.mxu1 %v6282_v4  ;;  %v6354_v22 = vpack.c.bf16 %v507_v18, %v506_v17  ;;  %v509_v25 = vld [vmem:[%s6288_s12 + $0x48] sm:$0xff]  ;;  %v6483_v17 = vshrl.u32 %v449_v5, 7 }
  0x14   : > { %5148 = vmatprep.subr.bf16.mxu1 %v6178_v1  ;;  %5176 = vmatprep.subr.bf16.mxu0 %v6178_v1  ;;  %v6384_v27 = vpack.c.bf16 %v509_v25, %v508_v24 }
  0x16   : > { %5129 = vmatmul.mubr.msk.bf16.vlgmr.msra.gmra.mrb[0].mxu0 %vm577_vm1, %v6298_v9  ;;  %5137 = vmatmul.mubr.msk.bf16.vlgmr.msra.gmra.mrb[0].mxu1 %vm577_vm1, %v6300_v10 }
  0x17   : > { %5149 = vmatpush3.bf16.msra.mxu1 %v6305_v11  ;;  %5177 = vmatpush3.bf16.msra.mxu0 %v6312_v12 }
  0x18   : > { %5178 = vmatprep.subr.bf16.mxu0 %v6178_v1  ;;  %5150 = vmatprep.subr.bf16.mxu1 %v6178_v1 }
  0x19   : > { %5132 = vmatprep.mubr.msk.bf16.mxu0 %vm8084_vm0, %v6178_v1  ;;  %5140 = vmatprep.mubr.msk.bf16.mxu1 %vm8084_vm0, %v6178_v1 }
  0x1b   : > { %5179 = vmatpush3.bf16.msra.mxu0 %v6319_v13  ;;  %5151 = vmatpush3.bf16.msra.mxu1 %v6324_v14 }
  0x1c   : > { %5180 = vmatprep.subr.bf16.mxu0 %v6178_v1  ;;  %5152 = vmatprep.subr.bf16.mxu1 %v6178_v1 }
  0x1e   : > { %5133 = vmatmul.mubr.msk.bf16.gmra.mrb[4].mxu0 %vm577_vm1, %v6352_v21  ;;  %5141 = vmatmul.mubr.msk.bf16.gmra.mrb[4].mxu1 %vm577_vm1, %v6354_v22 }
  0x1f   : > { %5181 = vmatpush3.bf16.msra.mxu0 %v6345_v19  ;;  %5153 = vmatpush3.bf16.msra.mxu1 %v6350_v20 }
  0x20   : > { %5182 = vmatprep.subr.bf16.mxu0 %v6178_v1  ;;  %5144 = vmatprep.mubr.msk.bf16.mxu1 %vm8084_vm0, %v6178_v1 }
  0x21   : > { %5184 = vmatprep.mubr.msk.bf16.mxu0 %vm8084_vm0, %v6178_v1  ;;  %5154 = vmatprep.subr.bf16.mxu1 %v6178_v1 }
  0x23   : > { %5183 = vmatpush3.bf16.msra.mxu0 %v6363_v23  ;;  %5155 = vmatpush3.bf16.msra.mxu1 %v6370_v26 }
  0x24   : > { %5232 = vmatprep.subr.bf16.mxu0 %v6178_v1  ;;  %5204 = vmatprep.subr.bf16.mxu1 %v6178_v1 }
  0x26   : > { %5145 = vmatmul.mubr.msk.bf16.gmra.mrb[8].mxu1 %vm577_vm1, %v6384_v27  ;;  %5185 = vmatmul.mubr.msk.bf16.vlgmr.msra.gmra.mrb[8].mxu0 %vm577_vm1, %v6298_v9 }
  0x27   : > { %5156 = vmatprep.mubr.msk.bf16.mxu1 %vm8084_vm0, %v6178_v1  ;;  %5188 = vmatprep.mubr.msk.bf16.mxu0 %vm8084_vm0, %v6178_v1 }
  0x28   : > { %5233 = vmatpush3.bf16.msra.mxu0 %v6066_v28 }
  0x29   : > { %5234 = vmatprep.subr.bf16.mxu0 %v6178_v1 }
  0x2c   : > { %5235 = vmatpush3.bf16.msra.mxu0 %v6068_v30 }
  0x2d   : > { %5236 = vmatprep.subr.bf16.mxu0 %v6178_v1 }
  0x2e   : > { %5157 = vmatmul.mubr.msk.bf16.vlgmr.msra.gmra.mrb[12].mxu1 %vm577_vm1, %v6298_v9  ;;  %5189 = vmatmul.mubr.msk.bf16.gmra.mrb[12].mxu0 %vm577_vm1, %v6352_v21 }
  0x2f   : > { %5160 = vmatprep.mubr.msk.bf16.mxu1 %vm8084_vm0, %v6178_v1  ;;  %5192 = vmatprep.mubr.msk.bf16.mxu0 %vm8084_vm0, %v6178_v1 }
  0x30   : > { %5205 = vmatpush3.bf16.msra.mxu1 %v6067_v29  ;;  %5237 = vmatpush3.bf16.msra.mxu0 %v6070_v32 }
  0x31   : > { %5206 = vmatprep.subr.bf16.mxu1 %v6178_v1  ;;  %5238 = vmatprep.subr.bf16.mxu0 %v6178_v1 }
  0x34   : > { %5207 = vmatpush3.bf16.msra.mxu1 %v6069_v31  ;;  %5239 = vmatpush3.bf16.msra.mxu0 %v6072_v34 }
  0x35   : > { %5208 = vmatprep.subr.bf16.mxu1 %v6178_v1  ;;  %5288 = vmatprep.subr.bf16.mxu0 %v6178_v1 }
  0x36   : > { %5161 = vmatmul.mubr.msk.bf16.gmra.mrb[16].mxu1 %vm577_vm1, %v6352_v21  ;;  %5193 = vmatmul.mubr.msk.bf16.gmra.mrb[16].mxu0 %vm577_vm1, %v6300_v10 }
  0x37   : > { %5164 = vmatprep.mubr.msk.bf16.mxu1 %vm8084_vm0, %v6178_v1  ;;  %5196 = vmatprep.mubr.msk.bf16.mxu0 %vm8084_vm0, %v6178_v1 }
  0x38   : > { %5209 = vmatpush3.bf16.msra.mxu1 %v6071_v33 }
  0x39   : > { %5210 = vmatprep.subr.bf16.mxu1 %v6178_v1 }
  0x3c   : > { %5211 = vmatpush3.bf16.msra.mxu1 %v6073_v35 }
  0x3d   : > { %5260 = vmatprep.subr.bf16.mxu1 %v6178_v1 }
  0x3e   : > { %5165 = vmatmul.mubr.msk.bf16.gmra.mrb[20].mxu1 %vm577_vm1, %v6300_v10  ;;  %5197 = vmatmul.mubr.msk.bf16.gmra.mrb[20].mxu0 %vm577_vm1, %v6354_v22 }
  0x3f   : > { %5168 = vmatprep.mubr.msk.bf16.mxu1 %vm8084_vm0, %v6178_v1  ;;  %5200 = vmatprep.mubr.msk.bf16.mxu0 %vm8084_vm0, %v6178_v1 }
  0x46   : > { %5169 = vmatmul.mubr.msk.bf16.gmra.mrb[24].mxu1 %vm577_vm1, %v6354_v22  ;;  %5201 = vmatmul.mubr.msk.bf16.gmra.mrb[24].mxu0 %vm577_vm1, %v6384_v27 }
  0x47   : > { %5172 = vmatprep.mubr.msk.bf16.mxu1 %vm8084_vm0, %v6178_v1  ;;  %5240 = vmatprep.mubr.msk.bf16.mxu0 %vm8084_vm0, %v6178_v1 }
  0x4e   : > { %5173 = vmatmul.mubr.msk.bf16.gmra.mrb[28].mxu1 %vm577_vm1, %v6384_v27 }
  0x4f   : > { %5212 = vmatprep.mubr.msk.bf16.mxu1 %vm8084_vm0, %v6178_v1 }
  0xe9   : > { %v627_v36 = vpop.f32.mrb[0].mxu0  ;;  %v643_v37 = vpop.f32.mrb[0].mxu1 }
  0xea   : > { %v889_v38 = vrot.slane %v627_v36, 7  ;;  %v5130_v39 = vpop.f32.mrb[1].mxu0  ;;  %v5138_v40 = vpop.f32.mrb[1].mxu1  ;;  %v896_v43 = vrot.slane %v643_v37, 7  ;;  %v451_v36 = vadd.s32 8, %v6483_v17 }
  0xeb   : > { %v630_v41 = vpop.f32.mrb[2].mxu0  ;;  %v646_v42 = vpop.f32.mrb[2].mxu1 }
  0xec   : > { %v890_v44 = vrot.slane %v630_v41, 7  ;;  %v898_v45 = vrot.slane %v646_v42, 7  ;;  %v5131_v46 = vpop.f32.mrb[3].mxu0  ;;  %v5139_v47 = vpop.f32.mrb[3].mxu1  ;;  %v918_v40 = vsel %vm888_vm2, 0.0, %v889_v38  ;;  %v460_v41 = vand.u32 15, %v6483_v17 }
  0xee   : > { %v891_v48 = vsel %vm888_vm2, %v889_v38, %v890_v44  ;;  %v6468_v49 = vsel %vm888_vm2, %v896_v43, %v898_v45  ;;  %vm6496_vm4 = vcmp.ge.s32.totalorder %v460_v41, 1 }
  0xf1   : > { %v635_v50 = vpop.f32.mrb[4].mxu0  ;;  %v651_v51 = vpop.f32.mrb[4].mxu1 }
  0xf2   : > { %v892_v52 = vrot.slane %v635_v50, 7  ;;  %v900_v53 = vrot.slane %v651_v51, 7  ;;  %v5134_v54 = vpop.f32.mrb[5].mxu0  ;;  %v5142_v55 = vpop.f32.mrb[5].mxu1 }
  0xf3   : > { %v638_v56 = vpop.f32.mrb[6].mxu0  ;;  %v654_v57 = vpop.f32.mrb[6].mxu1 }
  0xf4   : > { %v894_v58 = vrot.slane %v638_v56, 7  ;;  %v902_v59 = vrot.slane %v654_v57, 7  ;;  %v5135_v60 = vpop.f32.mrb[7].mxu0  ;;  %v5143_v61 = vpop.f32.mrb[7].mxu1  ;;  %v893_v62 = vsel %vm888_vm2, %v890_v44, %v892_v52  ;;  %v6472_v63 = vsel %vm888_vm2, %v898_v45, %v900_v53 }
  0xf5   : > { %v461_v44 = vand.u32 15, %v451_v36  ;;  %v452_v60 = vadd.s32 16, %v6483_v17  ;;  %v453_v61 = vadd.s32 24, %v6483_v17 }
  0xf6   : > { %v6475_v6 = vsel %vm888_vm2, %v892_v52, %v894_v58  ;;  %v6478_v7 = vsel %vm888_vm2, %v894_v58, %v896_v43  ;;  %v6481_v8 = vsel %vm888_vm2, %v900_v53, %v902_v59 }
  0xf7   : > { %vm6500_vm5 = vcmp.le.s32.totalorder %v461_v44, 8 }
  0xf9   : > { %v659_v15 = vpop.f32.mrb[8].mxu1  ;;  %v839_v16 = vpop.f32.mrb[8].mxu0 }
  0xfa   : > { %v904_v18 = vrot.slane %v659_v15, 7  ;;  %v930_v24 = vrot.slane %v839_v16, 1  ;;  %v5146_v25 = vpop.f32.mrb[9].mxu1  ;;  %v5186_v28 = vpop.f32.mrb[9].mxu0 }
  0xfb   : > { %v662_v29 = vpop.f32.mrb[10].mxu1  ;;  %v842_v30 = vpop.f32.mrb[10].mxu0 }
  0xfc   : > { %v906_v31 = vrot.slane %v662_v29, 7  ;;  %v931_v32 = vrot.slane %v842_v30, 1  ;;  %v5147_v33 = vpop.f32.mrb[11].mxu1  ;;  %v5187_v34 = vpop.f32.mrb[11].mxu0  ;;  %v6486_v35 = vsel %vm888_vm2, %v902_v59, %v904_v18  ;;  %v463_v29 = vand.u32 15, %v453_v61  ;;  %v6074_v30 = vld [vmem:[%s8076_s4 + $0x40] sm:$0xff]  }
  0xfe   : > { %v932_v37 = vsel %vm929_vm3, %v930_v24, %v931_v32  ;;  %v6491_v39 = vsel %vm888_vm2, %v904_v18, %v906_v31  ;;  %v462_v24 = vand.u32 15, %v452_v60  ;;  %vm6529_vm7 = vcmp.le.s32.totalorder %v463_v29, 8  ;;  %v6076_v60 = vld [vmem:[%s8076_s4 + $0x50] sm:$0xff]  }
 0x100   : > { %vm6525_vm6 = vcmp.ge.s32.totalorder %v462_v24, 1 }
 0x101   : > { %v733_v42 = vpop.f32.mrb[12].mxu1  ;;  %v847_v43 = vpop.f32.mrb[12].mxu0 }
 0x102   : > { %v960_v45 = vadd.f32 %v918_v40, %v733_v42  ;;  %v933_v46 = vrot.slane %v847_v43, 1  ;;  %v5158_v47 = vpop.f32.mrb[13].mxu1  ;;  %v5190_v50 = vpop.f32.mrb[13].mxu0 }
 0x103   : > { %v736_v51 = vpop.f32.mrb[14].mxu1  ;;  %v850_v52 = vpop.f32.mrb[14].mxu0  ;;  %v454_v47 = vadd.s32 32, %v6483_v17 }
 0x104   : > { %v970_v53 = vadd.f32 %v960_v45, %v932_v37  ;;  %v934_v54 = vsel %vm929_vm3, %v931_v32, %v933_v46  ;;  %v961_v55 = vadd.f32 %v891_v48, %v736_v51  ;;  %v935_v56 = vrot.slane %v850_v52, 1  ;;  %v5159_v57 = vpop.f32.mrb[15].mxu1  ;;  %v5191_v58 = vpop.f32.mrb[15].mxu0 }
 0x106   : > { %v971_v5 = vadd.f32 %v961_v55, %v934_v54  ;;  %v936_v15 = vsel %vm929_vm3, %v933_v46, %v935_v56  ;;  %v980_v48 = vsel %vm6496_vm4, %v970_v53, 0.0  ;;  %v464_v55 = vand.u32 15, %v454_v47 }
 0x108   : > { %v981_v16 = vsel %vm6500_vm5, %v971_v5, 0.0  ;;  %vm6566_vm8 = vcmp.ge.s32.totalorder %v464_v55, 1 }
 0x109   : > { %v6511_v18 = vpack.c.bf16 %v981_v16, %v980_v48  ;;  %v741_v25 = vpop.f32.mrb[16].mxu1  ;;  %v855_v28 = vpop.f32.mrb[16].mxu0 }
 0x10a   : > { %v962_v31 = vadd.f32 %v893_v62, %v741_v25  ;;  %v937_v32 = vrot.slane %v855_v28, 1  ;;  %v5162_v33 = vpop.f32.mrb[17].mxu1  ;;  %v5194_v34 = vpop.f32.mrb[17].mxu0 }
 0x10b   : > { %v744_v36 = vpop.f32.mrb[18].mxu1  ;;  %v858_v37 = vpop.f32.mrb[18].mxu0  ;;  %5213 = vmatmul.mubr.msk.bf16.vlgmr.msra.gmra.mrb[32].mxu1 %vm577_vm1, %v6511_v18  ;;  %5241 = vmatmul.mubr.msk.bf16.vlgmr.msra.gmra.mrb[28].mxu0 %vm577_vm1, %v6511_v18  ;;  %v456_v33 = vadd.s32 48, %v6483_v17  ;;  %v6077_v34 = vld [vmem:[%s8076_s4 + $0x58] sm:$0xff]  }
 0x10c   : > { %v972_v40 = vadd.f32 %v962_v31, %v936_v15  ;;  %v938_v41 = vsel %vm929_vm3, %v935_v56, %v937_v32  ;;  %v963_v42 = vadd.f32 %v6475_v6, %v744_v36  ;;  %v939_v43 = vrot.slane %v858_v37, 1  ;;  %v5163_v44 = vpop.f32.mrb[19].mxu1  ;;  %v5195_v45 = vpop.f32.mrb[19].mxu0  ;;  %5289 = vmatpush3.bf16.msra.mxu0 %v6251_v0  ;;  %5216 = vmatprep.mubr.msk.bf16.mxu1 %vm8084_vm0, %v6178_v1  ;;  %v6075_v0 = vld [vmem:[%s8076_s4 + $0x48] sm:$0xff]  }
 0x10d   : > { %5244 = vmatprep.mubr.msk.bf16.mxu0 %vm8084_vm0, %v6178_v1  ;;  %v455_v6 = vadd.s32 40, %v6483_v17  ;;  %5261 = vmatpush3.bf16.msra.mxu1 %v6074_v30 }
 0x10e   : > { %v973_v50 = vadd.f32 %v963_v42, %v938_v41  ;;  %v940_v51 = vsel %vm929_vm3, %v937_v32, %v939_v43  ;;  %5290 = vmatprep.subr.bf16.mxu0 %v6178_v1  ;;  %5262 = vmatprep.subr.bf16.mxu1 %v6178_v1  ;;  %v982_v52 = vsel %vm6525_vm6, %v972_v40, 0.0 }
 0x10f   : > { %v465_v58 = vand.u32 15, %v455_v6 }
 0x110   : > { %v983_v53 = vsel %vm6529_vm7, %v973_v50, 0.0  ;;  %5291 = vmatpush3.bf16.msra.mxu0 %v6260_v2 }
 0x111   : > { %v6548_v54 = vpack.c.bf16 %v983_v53, %v982_v52  ;;  %v749_v56 = vpop.f32.mrb[20].mxu1  ;;  %v863_v57 = vpop.f32.mrb[20].mxu0  ;;  %5263 = vmatpush3.bf16.msra.mxu1 %v6075_v0  ;;  %5292 = vmatprep.subr.bf16.mxu0 %v6178_v1  ;;  %vm6570_vm9 = vcmp.le.s32.totalorder %v465_v58, 8 }
 0x112   : > { %v964_v61 = vadd.f32 %v6478_v7, %v749_v56  ;;  %v941_v5 = vrot.slane %v863_v57, 1  ;;  %v5166_v15 = vpop.f32.mrb[21].mxu1  ;;  %v5198_v48 = vpop.f32.mrb[21].mxu0  ;;  %5264 = vmatprep.subr.bf16.mxu1 %v6178_v1 }
 0x113   : > { %v752_v2 = vpop.f32.mrb[22].mxu1  ;;  %v866_v16 = vpop.f32.mrb[22].mxu0  ;;  %5217 = vmatmul.mubr.msk.bf16.gmra.mrb[36].mxu1 %vm577_vm1, %v6548_v54  ;;  %5245 = vmatmul.mubr.msk.bf16.gmra.mrb[32].mxu0 %vm577_vm1, %v6548_v54 }
 0x114   : > { %v974_v24 = vadd.f32 %v964_v61, %v940_v51  ;;  %v942_v25 = vsel %vm929_vm3, %v939_v43, %v941_v5  ;;  %v965_v28 = vadd.f32 %v6468_v49, %v752_v2  ;;  %v943_v29 = vrot.slane %v866_v16, 1  ;;  %v5167_v7 = vpop.f32.mrb[23].mxu1  ;;  %v5199_v30 = vpop.f32.mrb[23].mxu0  ;;  %5220 = vmatprep.mubr.msk.bf16.mxu1 %vm8084_vm0, %v6178_v1  ;;  %5248 = vmatprep.mubr.msk.bf16.mxu0 %vm8084_vm0, %v6178_v1 }
 0x115   : > { %v457_v49 = vadd.s32 56, %v6483_v17  ;;  %5293 = vmatpush3.bf16.msra.mxu0 %v6273_v3  ;;  %5265 = vmatpush3.bf16.msra.mxu1 %v6076_v60  ;;  %v466_v3 = vand.u32 15, %v456_v33  ;;  %v458_v61 = vadd.s32 64, %v6483_v17 }
 0x116   : > { %v975_v36 = vadd.f32 %v965_v28, %v942_v25  ;;  %v944_v37 = vsel %vm929_vm3, %v941_v5, %v943_v29  ;;  %5294 = vmatprep.subr.bf16.mxu0 %v6178_v1  ;;  %5266 = vmatprep.subr.bf16.mxu1 %v6178_v1  ;;  %v984_v40 = vsel %vm6566_vm8, %v974_v24, 0.0 }
 0x117   : > { %v467_v45 = vand.u32 15, %v457_v49  ;;  %vm6603_vm10 = vcmp.ge.s32.totalorder %v466_v3, 1  ;;  %v468_v24 = vand.u32 15, %v458_v61  ;;  %v510_v3 = vld [vmem:[%s6647_s24] sm:$0xff] }
 0x118   : > { %v985_v41 = vsel %vm6570_vm9, %v975_v36, 0.0 }
 0x119   : > { %v6587_v42 = vpack.c.bf16 %v985_v41, %v984_v40  ;;  %v757_v43 = vpop.f32.mrb[24].mxu1  ;;  %v871_v44 = vpop.f32.mrb[24].mxu0  ;;  %5295 = vmatpush3.bf16.msra.mxu0 %v6282_v4  ;;  %5267 = vmatpush3.bf16.msra.mxu1 %v6077_v34  ;;  %vm6607_vm11 = vcmp.le.s32.totalorder %v467_v45, 8  ;;  %vm6631_vm12 = vcmp.ge.s32.totalorder %v468_v24, 1  ;;  %v512_v45 = vld [vmem:[%s6647_s24 + $0x10] sm:$0xff] }
 0x11a   : > { %v966_v47 = vadd.f32 %v6472_v63, %v757_v43  ;;  %v945_v6 = vrot.slane %v871_v44, 1  ;;  %v5170_v0 = vpop.f32.mrb[25].mxu1  ;;  %v5202_v50 = vpop.f32.mrb[25].mxu0  ;;  %5344 = vmatprep.subr.bf16.mxu0 %v6178_v1  ;;  %5316 = vmatprep.subr.bf16.mxu1 %v6178_v1  ;;  %v511_v43 = vld [vmem:[%s6647_s24 + $0x8] sm:$0xff] }
 0x11b   : > { %v760_v51 = vpop.f32.mrb[26].mxu1  ;;  %v874_v52 = vpop.f32.mrb[26].mxu0  ;;  %5221 = vmatmul.mubr.msk.bf16.gmra.mrb[40].mxu1 %vm577_vm1, %v6587_v42  ;;  %5249 = vmatmul.mubr.msk.bf16.gmra.mrb[36].mxu0 %vm577_vm1, %v6587_v42  ;;  %v6657_v44 = vpack.c.bf16 %v511_v43, %v510_v3  ;;  %v6080_v0 = vld [vmem:[%s8077_s5 + $0x28] sm:$0xff]  }
 0x11c   : > { %v976_v53 = vadd.f32 %v966_v47, %v944_v37  ;;  %v946_v4 = vsel %vm929_vm3, %v943_v29, %v945_v6  ;;  %v967_v63 = vadd.f32 %v6481_v8, %v760_v51  ;;  %v947_v55 = vrot.slane %v874_v52, 1  ;;  %v5171_v56 = vpop.f32.mrb[27].mxu1  ;;  %v5203_v57 = vpop.f32.mrb[27].mxu0  ;;  %5224 = vmatprep.mubr.msk.bf16.mxu1 %vm8084_vm0, %v6178_v1  ;;  %5252 = vmatprep.mubr.msk.bf16.mxu0 %vm8084_vm0, %v6178_v1  ;;  %v513_v47 = vld [vmem:[%s6647_s24 + $0x18] sm:$0xff]  ;;  %v6081_v50 = vld [vmem:[%s8077_s5 + $0x8] sm:$0xff]   ;;  %v6082_v51 = vld [vmem:[%s8077_s5 + $0x30] sm:$0xff]  }
 0x11d   : > { %v459_v8 = vadd.s32 72, %v6483_v17  ;;  %v6083_v52 = vld [vmem:[%s8077_s5 + $0x10] sm:$0xff]  }
 0x11e   : > { %v977_v5 = vadd.f32 %v967_v63, %v946_v4  ;;  %v948_v15 = vsel %vm929_vm3, %v945_v6, %v947_v55  ;;  %v986_v48 = vsel %vm6603_vm10, %v976_v53, 0.0  ;;  %v6079_v6 = vld [vmem:[%s8077_s5] sm:$0xff]   ;;  %v6084_v53 = vld [vmem:[%s8077_s5 + $0x38] sm:$0xff]  }
 0x11f   : > { %v469_v28 = vand.u32 15, %v459_v8  ;;  %v6085_v4 = vld [vmem:[%s8077_s5 + $0x18] sm:$0xff]  }
 0x120   : > { %v987_v2 = vsel %vm6607_vm11, %v977_v5, 0.0 }
 0x121   : > { %v6618_v16 = vpack.c.bf16 %v987_v2, %v986_v48  ;;  %v765_v25 = vpop.f32.mrb[28].mxu1  ;;  %vm6635_vm13 = vcmp.le.s32.totalorder %v469_v28, 8 }
 0x122   : > { %v968_v29 = vadd.f32 %v6486_v35, %v765_v25  ;;  %v5174_v7 = vpop.f32.mrb[29].mxu1  ;;  %v959_v35 = vsel %vm929_vm3, %v947_v55, 0.0 }
 0x123   : > { %v768_v30 = vpop.f32.mrb[30].mxu1  ;;  %5225 = vmatmul.mubr.msk.bf16.gmra.mrb[44].mxu1 %vm577_vm1, %v6618_v16  ;;  %5253 = vmatmul.mubr.msk.bf16.gmra.mrb[40].mxu0 %vm577_vm1, %v6618_v16 }
 0x124   : > { %v978_v17 = vadd.f32 %v968_v29, %v948_v15  ;;  %v969_v33 = vadd.f32 %v6491_v39, %v768_v30  ;;  %v5175_v49 = vpop.f32.mrb[31].mxu1  ;;  %5228 = vmatprep.mubr.msk.bf16.mxu1 %vm8084_vm0, %v6178_v1  ;;  %5256 = vmatprep.mubr.msk.bf16.mxu0 %vm8084_vm0, %v6178_v1 }
 0x126   : > { %v979_v37 = vadd.f32 %v969_v33, %v959_v35  ;;  %v988_v39 = vsel %vm6631_vm12, %v978_v17, 0.0 }
 0x128   : > { %v989_v40 = vsel %vm6635_vm13, %v979_v37, 0.0 }
 0x129   : > { %v994_v41 = vpack.c.bf16 %v989_v40, %v988_v39 }
 0x12b   : > { %5229 = vmatmul.mubr.msk.bf16.gmra.mrb[48].mxu1 %vm577_vm1, %v994_v41  ;;  %5257 = vmatmul.mubr.msk.bf16.gmra.mrb[44].mxu0 %vm577_vm1, %v994_v41 }
 0x12c   : > { %5268 = vmatprep.mubr.msk.bf16.mxu1 %vm8084_vm0, %v6178_v1  ;;  %5296 = vmatprep.mubr.msk.bf16.mxu0 %vm8084_vm0, %v6178_v1 }
 0x133   : > { %5269 = vmatmul.mubr.msk.bf16.vlgmr.msra.gmra.mrb[52].mxu1 %vm577_vm1, %v6511_v18  ;;  %5297 = vmatmul.mubr.msk.bf16.vlgmr.msra.gmra.mrb[48].mxu0 %vm577_vm1, %v6657_v44  ;;  %v6673_v18 = vpack.c.bf16 %v513_v47, %v512_v45 }
 0x134   : > { %5345 = vmatpush3.bf16.msra.mxu0 %v6312_v12  ;;  %5272 = vmatprep.mubr.msk.bf16.mxu1 %vm8084_vm0, %v6178_v1  ;;  %v515_v12 = vld [vmem:[%s6647_s24 + $0x28] sm:$0xff] }
 0x135   : > { %5300 = vmatprep.mubr.msk.bf16.mxu0 %vm8084_vm0, %v6178_v1  ;;  %5317 = vmatpush3.bf16.msra.mxu1 %v6305_v11  ;;  %v514_v11 = vld [vmem:[%s6647_s24 + $0x20] sm:$0xff] }
 0x136   : > { %5346 = vmatprep.subr.bf16.mxu0 %v6178_v1  ;;  %5318 = vmatprep.subr.bf16.mxu1 %v6178_v1 }
 0x138   : > { %5347 = vmatpush3.bf16.msra.mxu0 %v6319_v13  ;;  %v6693_v13 = vpack.c.bf16 %v515_v12, %v514_v11 }
 0x139   : > { %5319 = vmatpush3.bf16.msra.mxu1 %v6324_v14  ;;  %5348 = vmatprep.subr.bf16.mxu0 %v6178_v1  ;;  %v516_v14 = vld [vmem:[%s6647_s24 + $0x30] sm:$0xff] }
 0x13a   : > { %5320 = vmatprep.subr.bf16.mxu1 %v6178_v1 }
 0x13b   : > { %5273 = vmatmul.mubr.msk.bf16.gmra.mrb[56].mxu1 %vm577_vm1, %v6548_v54  ;;  %5301 = vmatmul.mubr.msk.bf16.gmra.mrb[52].mxu0 %vm577_vm1, %v6673_v18 }
 0x13c   : > { %5276 = vmatprep.mubr.msk.bf16.mxu1 %vm8084_vm0, %v6178_v1  ;;  %5304 = vmatprep.mubr.msk.bf16.mxu0 %vm8084_vm0, %v6178_v1 }
 0x13d   : > { %5349 = vmatpush3.bf16.msra.mxu0 %v6345_v19  ;;  %5321 = vmatpush3.bf16.msra.mxu1 %v6350_v20  ;;  %v517_v19 = vld [vmem:[%s6647_s24 + $0x38] sm:$0xff] }
 0x13e   : > { %5350 = vmatprep.subr.bf16.mxu0 %v6178_v1  ;;  %5322 = vmatprep.subr.bf16.mxu1 %v6178_v1  ;;  %v6709_v20 = vpack.c.bf16 %v517_v19, %v516_v14 }
 0x141   : > { %5351 = vmatpush3.bf16.msra.mxu0 %v6363_v23  ;;  %5323 = vmatpush3.bf16.msra.mxu1 %v6370_v26  ;;  %v518_v23 = vld [vmem:[%s6647_s24 + $0x40] sm:$0xff]  ;;  %v519_v26 = vld [vmem:[%s6647_s24 + $0x48] sm:$0xff] }
 0x142   : > { %5400 = vmatprep.subr.bf16.mxu0 %v6178_v1  ;;  %5372 = vmatprep.subr.bf16.mxu1 %v6178_v1  ;;  %v6721_v54 = vpack.c.bf16 %v519_v26, %v518_v23 }
 0x143   : > { %5277 = vmatmul.mubr.msk.bf16.gmra.mrb[60].mxu1 %vm577_vm1, %v6587_v42  ;;  %5305 = vmatmul.mubr.msk.bf16.gmra.mrb[56].mxu0 %vm577_vm1, %v6693_v13  ;;  %v6078_v42 = vld [vmem:[%s8077_s5 + $0x20] sm:$0xff]  }
 0x144   : > { %5280 = vmatprep.mubr.msk.bf16.mxu1 %vm8084_vm0, %v6178_v1  ;;  %5308 = vmatprep.mubr.msk.bf16.mxu0 %vm8084_vm0, %v6178_v1 }
 0x14b   : > { %5281 = vmatmul.mubr.msk.bf16.gmra.mrb[64].mxu1 %vm577_vm1, %v6618_v16  ;;  %5309 = vmatmul.mubr.msk.bf16.gmra.mrb[60].mxu0 %vm577_vm1, %v6709_v20 }
 0x14c   : > { %5284 = vmatprep.mubr.msk.bf16.mxu1 %vm8084_vm0, %v6178_v1  ;;  %5312 = vmatprep.mubr.msk.bf16.mxu0 %vm8084_vm0, %v6178_v1 }
 0x153   : > { %5285 = vmatmul.mubr.msk.bf16.gmra.mrb[68].mxu1 %vm577_vm1, %v994_v41  ;;  %5313 = vmatmul.mubr.msk.bf16.gmra.mrb[64].mxu0 %vm577_vm1, %v6721_v54 }
 0x154   : > { %5324 = vmatprep.mubr.msk.bf16.mxu1 %vm8084_vm0, %v6178_v1  ;;  %5352 = vmatprep.mubr.msk.bf16.mxu0 %vm8084_vm0, %v6178_v1 }
 0x15b   : > { %5325 = vmatmul.mubr.msk.bf16.vlgmr.msra.gmra.mrb[72].mxu1 %vm577_vm1, %v6657_v44  ;;  %5353 = vmatmul.mubr.msk.bf16.vlgmr.msra.gmra.mrb[68].mxu0 %vm577_vm1, %v6657_v44 }
 0x15c   : > { %5328 = vmatprep.mubr.msk.bf16.mxu1 %vm8084_vm0, %v6178_v1  ;;  %5356 = vmatprep.mubr.msk.bf16.mxu0 %vm8084_vm0, %v6178_v1 }
 0x15d   : > { %5401 = vmatpush3.bf16.msra.mxu0 %v6078_v42  ;;  %5373 = vmatpush3.bf16.msra.mxu1 %v6079_v6 }
 0x15e   : > { %5402 = vmatprep.subr.bf16.mxu0 %v6178_v1  ;;  %5374 = vmatprep.subr.bf16.mxu1 %v6178_v1 }
 0x161   : > { %5403 = vmatpush3.bf16.msra.mxu0 %v6080_v0  ;;  %5375 = vmatpush3.bf16.msra.mxu1 %v6081_v50 }
 0x162   : > { %5404 = vmatprep.subr.bf16.mxu0 %v6178_v1  ;;  %5376 = vmatprep.subr.bf16.mxu1 %v6178_v1 }
 0x163   : > { %5329 = vmatmul.mubr.msk.bf16.gmra.mrb[76].mxu1 %vm577_vm1, %v6673_v18  ;;  %5357 = vmatmul.mubr.msk.bf16.gmra.mrb[72].mxu0 %vm577_vm1, %v6673_v18 }
 0x164   : > { %5332 = vmatprep.mubr.msk.bf16.mxu1 %vm8084_vm0, %v6178_v1  ;;  %5360 = vmatprep.mubr.msk.bf16.mxu0 %vm8084_vm0, %v6178_v1 }
 0x165   : > { %5405 = vmatpush3.bf16.msra.mxu0 %v6082_v51  ;;  %5377 = vmatpush3.bf16.msra.mxu1 %v6083_v52 }
 0x166   : > { %5406 = vmatprep.subr.bf16.mxu0 %v6178_v1  ;;  %5378 = vmatprep.subr.bf16.mxu1 %v6178_v1 }
 0x169   : > { %5407 = vmatpush3.bf16.msra.mxu0 %v6084_v53  ;;  %5379 = vmatpush3.bf16.msra.mxu1 %v6085_v4 }
 0x16a   : > { %5456 = vmatprep.subr.bf16.mxu0 %v6178_v1  ;;  %5428 = vmatprep.subr.bf16.mxu1 %v6178_v1 }
 0x16b   : > { %5333 = vmatmul.mubr.msk.bf16.gmra.mrb[80].mxu1 %vm577_vm1, %v6693_v13  ;;  %5361 = vmatmul.mubr.msk.bf16.gmra.mrb[76].mxu0 %vm577_vm1, %v6693_v13 }
 0x16c   : > { %5336 = vmatprep.mubr.msk.bf16.mxu1 %vm8084_vm0, %v6178_v1  ;;  %5364 = vmatprep.mubr.msk.bf16.mxu0 %vm8084_vm0, %v6178_v1 }
 0x173   : > { %5337 = vmatmul.mubr.msk.bf16.gmra.mrb[84].mxu1 %vm577_vm1, %v6709_v20  ;;  %5365 = vmatmul.mubr.msk.bf16.gmra.mrb[80].mxu0 %vm577_vm1, %v6709_v20 }
 0x174   : > { %5340 = vmatprep.mubr.msk.bf16.mxu1 %vm8084_vm0, %v6178_v1  ;;  %5368 = vmatprep.mubr.msk.bf16.mxu0 %vm8084_vm0, %v6178_v1 }
 0x17b   : > { %5341 = vmatmul.mubr.msk.bf16.gmra.mrb[88].mxu1 %vm577_vm1, %v6721_v54  ;;  %5369 = vmatmul.mubr.msk.bf16.gmra.mrb[84].mxu0 %vm577_vm1, %v6721_v54 }
 0x17c   : > { %5380 = vmatprep.mubr.msk.bf16.mxu1 %vm8084_vm0, %v6178_v1  ;;  %5408 = vmatprep.mubr.msk.bf16.mxu0 %vm8084_vm0, %v6178_v1 }
 0x1de   : > { %v1076_v63 = vpop.f32.mrb[32].mxu1 }
 0x1df   : > { %v5214_v55 = vpop.f32.mrb[33].mxu1  ;;  %v1337_v57 = vrot.slane %v1076_v63, 7 }
 0x1e0   : > { %v1079_v56 = vpop.f32.mrb[34].mxu1 }
 0x1e1   : > { %v1338_v61 = vrot.slane %v1079_v56, 7  ;;  %v5215_v8 = vpop.f32.mrb[35].mxu1 }
 0x1e3   : > { %v6803_v5 = vsel %vm888_vm2, %v1337_v57, %v1338_v61 }
 0x1e6   : > { %v1084_v15 = vpop.f32.mrb[36].mxu1 }
 0x1e7   : > { %v1340_v48 = vrot.slane %v1084_v15, 7  ;;  %v5218_v2 = vpop.f32.mrb[37].mxu1 }
 0x1e8   : > { %v1087_v16 = vpop.f32.mrb[38].mxu1 }
 0x1e9   : > { %v1342_v24 = vrot.slane %v1087_v16, 7  ;;  %v5219_v25 = vpop.f32.mrb[39].mxu1  ;;  %v1341_v28 = vsel %vm888_vm2, %v1338_v61, %v1340_v48  ;;  %v1366_v16 = vsel %vm888_vm2, 0.0, %v1337_v57 }
 0x1eb   : > { %v6807_v29 = vsel %vm888_vm2, %v1340_v48, %v1342_v24 }
 0x1ee   : > { %v1092_v7 = vpop.f32.mrb[40].mxu1 }
 0x1ef   : > { %v1344_v30 = vrot.slane %v1092_v7, 7  ;;  %v5222_v17 = vpop.f32.mrb[41].mxu1 }
 0x1f0   : > { %v1095_v33 = vpop.f32.mrb[42].mxu1 }
 0x1f1   : > { %v1346_v49 = vrot.slane %v1095_v33, 7  ;;  %v5223_v35 = vpop.f32.mrb[43].mxu1  ;;  %v6810_v37 = vsel %vm888_vm2, %v1342_v24, %v1344_v30 }
 0x1f3   : > { %v6813_v39 = vsel %vm888_vm2, %v1344_v30, %v1346_v49 }
 0x1f6   : > { %v1100_v40 = vpop.f32.mrb[44].mxu1 }
 0x1f7   : > { %v1348_v41 = vrot.slane %v1100_v40, 7  ;;  %v5226_v3 = vpop.f32.mrb[45].mxu1 }
 0x1f8   : > { %v1103_v43 = vpop.f32.mrb[46].mxu1 }
 0x1f9   : > { %v1350_v45 = vrot.slane %v1103_v43, 7  ;;  %v5227_v47 = vpop.f32.mrb[47].mxu1  ;;  %v6816_v11 = vsel %vm888_vm2, %v1346_v49, %v1348_v41 }
 0x1fb   : > { %v6819_v12 = vsel %vm888_vm2, %v1348_v41, %v1350_v45 }
 0x1fe   : > { %v1108_v14 = vpop.f32.mrb[48].mxu1 }
 0x1ff   : > { %v1352_v19 = vrot.slane %v1108_v14, 7  ;;  %v5230_v23 = vpop.f32.mrb[49].mxu1 }
 0x200   : > { %v1111_v26 = vpop.f32.mrb[50].mxu1 }
 0x201   : > { %v1354_v42 = vrot.slane %v1111_v26, 7  ;;  %v5231_v6 = vpop.f32.mrb[51].mxu1  ;;  %v6822_v0 = vsel %vm888_vm2, %v1350_v45, %v1352_v19 }
 0x203   : > { %v6825_v50 = vsel %vm888_vm2, %v1352_v19, %v1354_v42 }
 0x206   : > { %v1288_v51 = vpop.f32.mrb[52].mxu1  ;;  %v6827_v52 = vpop.f32.mrb[48].mxu0 }
 0x207   : > { %v5270_v53 = vpop.f32.mrb[53].mxu1  ;;  %v5298_v4 = vpop.f32.mrb[49].mxu0  ;;  %v1377_v56 = vrot.slane %v1288_v51, 1  ;;  %v1671_v61 = vrot.slane %v6827_v52, 7 }
 0x208   : > { %v1291_v63 = vpop.f32.mrb[54].mxu1  ;;  %v1479_v55 = vpop.f32.mrb[50].mxu0 }
 0x209   : > { %v1378_v8 = vrot.slane %v1291_v63, 1  ;;  %v1672_v15 = vrot.slane %v1479_v55, 7  ;;  %v5271_v48 = vpop.f32.mrb[55].mxu1  ;;  %v5299_v2 = vpop.f32.mrb[51].mxu0 }
 0x20b   : > { %v6834_v24 = vsel %vm888_vm2, %v1671_v61, %v1672_v15  ;;  %v1379_v25 = vsel %vm929_vm3, %v1377_v56, %v1378_v8 }
 0x20c   : > { %v6837_v7 = vadd.f32 %v1379_v25, %v1366_v16 }
 0x20e   : > { %v1296_v30 = vpop.f32.mrb[56].mxu1  ;;  %v1484_v17 = vpop.f32.mrb[52].mxu0 }
 0x20f   : > { %v1380_v33 = vrot.slane %v1296_v30, 1  ;;  %v1674_v49 = vrot.slane %v1484_v17, 7  ;;  %v5274_v35 = vpop.f32.mrb[57].mxu1  ;;  %v5302_v40 = vpop.f32.mrb[53].mxu0 }
 0x210   : > { %v1299_v41 = vpop.f32.mrb[58].mxu1  ;;  %v1487_v3 = vpop.f32.mrb[54].mxu0 }
 0x211   : > { %v1382_v43 = vrot.slane %v1299_v41, 1  ;;  %v1676_v45 = vrot.slane %v1487_v3, 7  ;;  %v5275_v57 = vpop.f32.mrb[59].mxu1  ;;  %v5303_v47 = vpop.f32.mrb[55].mxu0  ;;  %v6840_v14 = vsel %vm888_vm2, %v1672_v15, %v1674_v49  ;;  %v1381_v19 = vsel %vm929_vm3, %v1378_v8, %v1380_v33 }
 0x212   : > { %v6844_v23 = vadd.f32 %v1381_v19, %v6803_v5 }
 0x213   : > { %v6847_v26 = vsel %vm888_vm2, %v1674_v49, %v1676_v45  ;;  %v1383_v42 = vsel %vm929_vm3, %v1380_v33, %v1382_v43 }
 0x214   : > { %v6850_v6 = vadd.f32 %v1383_v42, %v1341_v28 }
 0x216   : > { %v1304_v51 = vpop.f32.mrb[60].mxu1  ;;  %v1492_v53 = vpop.f32.mrb[56].mxu0 }
 0x217   : > { %v1384_v4 = vrot.slane %v1304_v51, 1  ;;  %v1678_v63 = vrot.slane %v1492_v53, 7  ;;  %v5278_v55 = vpop.f32.mrb[61].mxu1  ;;  %v5306_v56 = vpop.f32.mrb[57].mxu0 }
 0x218   : > { %v1307_v15 = vpop.f32.mrb[62].mxu1  ;;  %v1495_v48 = vpop.f32.mrb[58].mxu0 }
 0x219   : > { %v1386_v2 = vrot.slane %v1307_v15, 1  ;;  %v1680_v8 = vrot.slane %v1495_v48, 7  ;;  %v5279_v16 = vpop.f32.mrb[63].mxu1  ;;  %v5307_v5 = vpop.f32.mrb[59].mxu0  ;;  %v6853_v25 = vsel %vm888_vm2, %v1676_v45, %v1678_v63  ;;  %v1385_v30 = vsel %vm929_vm3, %v1382_v43, %v1384_v4 }
 0x21a   : > { %v6857_v28 = vadd.f32 %v1385_v30, %v6807_v29 }
 0x21b   : > { %v6860_v17 = vsel %vm888_vm2, %v1678_v63, %v1680_v8  ;;  %v1387_v33 = vsel %vm929_vm3, %v1384_v4, %v1386_v2 }
 0x21c   : > { %v6864_v49 = vadd.f32 %v1387_v33, %v6810_v37 }
 0x21e   : > { %v1312_v35 = vpop.f32.mrb[64].mxu1  ;;  %v1500_v40 = vpop.f32.mrb[60].mxu0 }
 0x21f   : > { %v1388_v41 = vrot.slane %v1312_v35, 1  ;;  %v1682_v3 = vrot.slane %v1500_v40, 7  ;;  %v5282_v57 = vpop.f32.mrb[65].mxu1  ;;  %v5310_v45 = vpop.f32.mrb[61].mxu0 }
 0x220   : > { %v1315_v47 = vpop.f32.mrb[66].mxu1  ;;  %v1503_v19 = vpop.f32.mrb[62].mxu0 }
 0x221   : > { %v1390_v43 = vrot.slane %v1315_v47, 1  ;;  %v1684_v42 = vrot.slane %v1503_v19, 7  ;;  %v5283_v29 = vpop.f32.mrb[67].mxu1  ;;  %v5311_v51 = vpop.f32.mrb[63].mxu0  ;;  %v6867_v53 = vsel %vm888_vm2, %v1680_v8, %v1682_v3  ;;  %v1389_v4 = vsel %vm929_vm3, %v1386_v2, %v1388_v41 }
 0x222   : > { %v6871_v37 = vadd.f32 %v1389_v4, %v6813_v39 }
 0x223   : > { %v6874_v63 = vsel %vm888_vm2, %v1682_v3, %v1684_v42  ;;  %v1391_v55 = vsel %vm929_vm3, %v1388_v41, %v1390_v43 }
 0x224   : > { %v6878_v56 = vadd.f32 %v1391_v55, %v6816_v11 }
 0x226   : > { %v1320_v15 = vpop.f32.mrb[68].mxu1  ;;  %v1508_v48 = vpop.f32.mrb[64].mxu0 }
 0x227   : > { %v1392_v16 = vrot.slane %v1320_v15, 1  ;;  %v1686_v5 = vrot.slane %v1508_v48, 7  ;;  %v5286_v30 = vpop.f32.mrb[69].mxu1  ;;  %v5314_v8 = vpop.f32.mrb[65].mxu0 }
 0x228   : > { %v1323_v33 = vpop.f32.mrb[70].mxu1  ;;  %v1511_v35 = vpop.f32.mrb[66].mxu0 }
 0x229   : > { %v1394_v2 = vrot.slane %v1323_v33, 1  ;;  %v1688_v40 = vrot.slane %v1511_v35, 7  ;;  %v5287_v39 = vpop.f32.mrb[71].mxu1  ;;  %v5315_v57 = vpop.f32.mrb[67].mxu0  ;;  %v6881_v3 = vsel %vm888_vm2, %v1684_v42, %v1686_v5  ;;  %v1393_v41 = vsel %vm929_vm3, %v1390_v43, %v1392_v16 }
 0x22a   : > { %v6885_v11 = vadd.f32 %v1393_v41, %v6819_v12  ;;  %v1700_v43 = vsel %vm888_vm2, 0.0, %v1671_v61 }
 0x22b   : > { %v1406_v45 = vsel %vm929_vm3, %v1394_v2, 0.0  ;;  %v6889_v47 = vsel %vm888_vm2, %v1686_v5, %v1688_v40  ;;  %v1395_v19 = vsel %vm929_vm3, %v1392_v16, %v1394_v2 }
 0x22c   : > { %v6893_v29 = vadd.f32 %v1395_v19, %v6822_v0  ;;  %v6896_v51 = vadd.f32 %v1406_v45, %v6825_v50 }
 0x22e   : > { %v1549_v42 = vpop.f32.mrb[72].mxu1  ;;  %v1622_v12 = vpop.f32.mrb[68].mxu0 }
 0x22f   : > { %v1741_v4 = vadd.f32 %v1700_v43, %v1549_v42  ;;  %v5326_v55 = vpop.f32.mrb[73].mxu1  ;;  %v5354_v15 = vpop.f32.mrb[69].mxu0  ;;  %v1711_v30 = vrot.slane %v1622_v12, 1 }
 0x230   : > { %v1552_v48 = vpop.f32.mrb[74].mxu1  ;;  %v1625_v5 = vpop.f32.mrb[70].mxu0 }
 0x231   : > { %v1742_v16 = vadd.f32 %v6834_v24, %v1552_v48  ;;  %v1712_v8 = vrot.slane %v1625_v5, 1  ;;  %v5355_v0 = vpop.f32.mrb[71].mxu0  ;;  %v5327_v33 = vpop.f32.mrb[75].mxu1  ;;  %v6086_v5 = vld [vmem:[%s8078_s6] sm:$0xff]  }
 0x233   : > { %v1713_v50 = vsel %vm929_vm3, %v1711_v30, %v1712_v8 }
 0x234   : > { %v1751_v35 = vadd.f32 %v1741_v4, %v1713_v50 }
 0x236   : > { %v1557_v2 = vpop.f32.mrb[76].mxu1  ;;  %v1630_v40 = vpop.f32.mrb[72].mxu0  ;;  %v1761_v4 = vsel %vm6496_vm4, %v1751_v35, 0.0 }
 0x237   : > { %v1743_v52 = vadd.f32 %v6840_v14, %v1557_v2  ;;  %v1714_v61 = vrot.slane %v1630_v40, 1  ;;  %v5330_v39 = vpop.f32.mrb[77].mxu1  ;;  %v5358_v57 = vpop.f32.mrb[73].mxu0 }
 0x238   : > { %v1560_v41 = vpop.f32.mrb[78].mxu1  ;;  %v1633_v45 = vpop.f32.mrb[74].mxu0 }
 0x239   : > { %v1715_v19 = vsel %vm929_vm3, %v1712_v8, %v1714_v61  ;;  %v1744_v42 = vadd.f32 %v6847_v26, %v1560_v41  ;;  %v1716_v24 = vrot.slane %v1633_v45, 1  ;;  %v5359_v43 = vpop.f32.mrb[75].mxu0  ;;  %v5331_v12 = vpop.f32.mrb[79].mxu1  ;;  %v6087_v26 = vld [vmem:[%s8077_s5 + $0x40] sm:$0xff]   ;;  %v6089_v45 = vld [vmem:[%s8077_s5 + $0x48] sm:$0xff]  }
 0x23a   : > { %v1752_v55 = vadd.f32 %v1742_v16, %v1715_v19 }
 0x23b   : > { %v1717_v15 = vsel %vm929_vm3, %v1714_v61, %v1716_v24 }
 0x23c   : > { %v1762_v14 = vsel %vm6500_vm5, %v1752_v55, 0.0  ;;  %v1753_v48 = vadd.f32 %v1743_v52, %v1717_v15  ;;  %v6088_v52 = vld [vmem:[%s8078_s6 + $0x8] sm:$0xff]   ;;  %v6091_v15 = vld [vmem:[%s8077_s5 + $0x50] sm:$0xff]  }
 0x23d   : > { %v6914_v30 = vpack.c.bf16 %v1762_v14, %v1761_v4 }
 0x23e   : > { %v1565_v16 = vpop.f32.mrb[80].mxu1  ;;  %v1638_v8 = vpop.f32.mrb[76].mxu0 }
 0x23f   : > { %v1745_v0 = vadd.f32 %v6853_v25, %v1565_v16  ;;  %v1718_v33 = vrot.slane %v1638_v8, 1  ;;  %v5334_v50 = vpop.f32.mrb[81].mxu1  ;;  %v5362_v35 = vpop.f32.mrb[77].mxu0  ;;  %5381 = vmatmul.mubr.msk.bf16.vlgmr.msra.gmra.mrb[92].mxu1 %vm577_vm1, %v6914_v30  ;;  %5409 = vmatmul.mubr.msk.bf16.vlgmr.msra.gmra.mrb[28].mxu0 %vm577_vm1, %v6914_v30 }
 0x240   : > { %v1568_v2 = vpop.f32.mrb[82].mxu1  ;;  %v1641_v40 = vpop.f32.mrb[78].mxu0  ;;  %5457 = vmatpush3.bf16.msra.mxu0 %v6086_v5  ;;  %5384 = vmatprep.mubr.msk.bf16.mxu1 %vm8084_vm0, %v6178_v1 }
 0x241   : > { %v1719_v25 = vsel %vm929_vm3, %v1716_v24, %v1718_v33  ;;  %v1746_v61 = vadd.f32 %v6860_v17, %v1568_v2  ;;  %v1720_v39 = vrot.slane %v1641_v40, 1  ;;  %v5363_v57 = vpop.f32.mrb[79].mxu0  ;;  %v5335_v41 = vpop.f32.mrb[83].mxu1  ;;  %5412 = vmatprep.mubr.msk.bf16.mxu0 %vm8084_vm0, %v6178_v1  ;;  %5429 = vmatpush3.bf16.msra.mxu1 %v6087_v26  ;;  %v1763_v17 = vsel %vm6525_vm6, %v1753_v48, 0.0  ;;  %v6092_v40 = vld [vmem:[%s8078_s6 + $0x18] sm:$0xff]  }
 0x242   : > { %v1754_v19 = vadd.f32 %v1744_v42, %v1719_v25  ;;  %5458 = vmatprep.subr.bf16.mxu0 %v6178_v1  ;;  %5430 = vmatprep.subr.bf16.mxu1 %v6178_v1  ;;  %v6090_v42 = vld [vmem:[%s8078_s6 + $0x10] sm:$0xff]  }
 0x243   : > { %v1721_v24 = vsel %vm929_vm3, %v1718_v33, %v1720_v39 }
 0x244   : > { %v1764_v43 = vsel %vm6529_vm7, %v1754_v19, 0.0  ;;  %v1755_v12 = vadd.f32 %v1745_v0, %v1721_v24  ;;  %5459 = vmatpush3.bf16.msra.mxu0 %v6088_v52  ;;  %v6093_v52 = vld [vmem:[%s8077_s5 + $0x58] sm:$0xff]  }
 0x245   : > { %v6943_v55 = vpack.c.bf16 %v1764_v43, %v1763_v17  ;;  %5431 = vmatpush3.bf16.msra.mxu1 %v6089_v45  ;;  %5460 = vmatprep.subr.bf16.mxu0 %v6178_v1 }
 0x246   : > { %v1573_v4 = vpop.f32.mrb[84].mxu1  ;;  %v1646_v14 = vpop.f32.mrb[80].mxu0  ;;  %5432 = vmatprep.subr.bf16.mxu1 %v6178_v1 }
 0x247   : > { %v1747_v48 = vadd.f32 %v6867_v53, %v1573_v4  ;;  %v1722_v5 = vrot.slane %v1646_v14, 1  ;;  %v5338_v26 = vpop.f32.mrb[85].mxu1  ;;  %v5366_v16 = vpop.f32.mrb[81].mxu0  ;;  %5385 = vmatmul.mubr.msk.bf16.gmra.mrb[96].mxu1 %vm577_vm1, %v6943_v55  ;;  %5413 = vmatmul.mubr.msk.bf16.gmra.mrb[32].mxu0 %vm577_vm1, %v6943_v55 }
 0x248   : > { %v1576_v8 = vpop.f32.mrb[86].mxu1  ;;  %v1649_v0 = vpop.f32.mrb[82].mxu0  ;;  %5388 = vmatprep.mubr.msk.bf16.mxu1 %vm8084_vm0, %v6178_v1  ;;  %5416 = vmatprep.mubr.msk.bf16.mxu0 %vm8084_vm0, %v6178_v1 }
 0x249   : > { %v1723_v33 = vsel %vm929_vm3, %v1720_v39, %v1722_v5  ;;  %v1748_v53 = vadd.f32 %v6874_v63, %v1576_v8  ;;  %v1724_v50 = vrot.slane %v1649_v0, 1  ;;  %v5367_v35 = vpop.f32.mrb[83].mxu0  ;;  %v5339_v2 = vpop.f32.mrb[87].mxu1  ;;  %5461 = vmatpush3.bf16.msra.mxu0 %v6090_v42  ;;  %5433 = vmatpush3.bf16.msra.mxu1 %v6091_v15  ;;  %v1765_v39 = vsel %vm6566_vm8, %v1755_v12, 0.0 }
 0x24a   : > { %v1756_v25 = vadd.f32 %v1746_v61, %v1723_v33  ;;  %5462 = vmatprep.subr.bf16.mxu0 %v6178_v1  ;;  %5434 = vmatprep.subr.bf16.mxu1 %v6178_v1 }
 0x24b   : > { %v1725_v63 = vsel %vm929_vm3, %v1722_v5, %v1724_v50 }
 0x24c   : > { %v1766_v57 = vsel %vm6570_vm9, %v1756_v25, 0.0  ;;  %v1757_v41 = vadd.f32 %v1747_v48, %v1725_v63  ;;  %v6095_v25 = vld [vmem:[%s8078_s6 + $0x20] sm:$0xff]   ;;  %v6096_v63 = vld [vmem:[%s8078_s6 + $0x48] sm:$0xff]  }
 0x24d   : > { %v6977_v45 = vpack.c.bf16 %v1766_v57, %v1765_v39  ;;  %5463 = vmatpush3.bf16.msra.mxu0 %v6092_v40  ;;  %5435 = vmatpush3.bf16.msra.mxu1 %v6093_v52  ;;  %v6094_v52 = vld [vmem:[%s8078_s6 + $0x40] sm:$0xff]   ;;  %v6097_v39 = vld [vmem:[%s8078_s6 + $0x28] sm:$0xff]   ;;  %v6099_v57 = vld [vmem:[%s8078_s6 + $0x30] sm:$0xff]  }
 0x24e   : > { %v1581_v19 = vpop.f32.mrb[88].mxu1  ;;  %v1654_v24 = vpop.f32.mrb[84].mxu0  ;;  %5512 = vmatprep.subr.bf16.mxu0 %v6178_v1  ;;  %5484 = vmatprep.subr.bf16.mxu1 %v6178_v1  ;;  %v1767_v0 = vsel %vm6603_vm10, %v1757_v41, 0.0  ;;  %v6100_v41 = vld [vmem:[%s8078_s6 + $0x58] sm:$0xff]  }
 0x24f   : > { %v1749_v61 = vadd.f32 %v6881_v3, %v1581_v19  ;;  %v1726_v17 = vrot.slane %v1654_v24, 1  ;;  %v5342_v43 = vpop.f32.mrb[89].mxu1  ;;  %v5370_v42 = vpop.f32.mrb[85].mxu0  ;;  %5389 = vmatmul.mubr.msk.bf16.gmra.mrb[100].mxu1 %vm577_vm1, %v6977_v45  ;;  %5417 = vmatmul.mubr.msk.bf16.gmra.mrb[36].mxu0 %vm577_vm1, %v6977_v45  ;;  %v6101_v19 = vld [vmem:[%s8078_s6 + $0x38] sm:$0xff]  }
 0x250   : > { %v1584_v12 = vpop.f32.mrb[90].mxu1  ;;  %v1657_v15 = vpop.f32.mrb[86].mxu0  ;;  %5392 = vmatprep.mubr.msk.bf16.mxu1 %vm8084_vm0, %v6178_v1  ;;  %5420 = vmatprep.mubr.msk.bf16.mxu0 %vm8084_vm0, %v6178_v1  ;;  %v6109_v24 = vld [vmem:[%s8079_s7 + $0x38] sm:$0xff]  }
 0x251   : > { %v1727_v4 = vsel %vm929_vm3, %v1724_v50, %v1726_v17  ;;  %v1750_v3 = vadd.f32 %v6889_v47, %v1584_v12  ;;  %v1728_v14 = vrot.slane %v1657_v15, 1  ;;  %v5371_v48 = vpop.f32.mrb[87].mxu0  ;;  %v5343_v5 = vpop.f32.mrb[91].mxu1 }
 0x252   : > { %v1758_v26 = vadd.f32 %v1748_v53, %v1727_v4 }
 0x253   : > { %v1729_v16 = vsel %vm929_vm3, %v1726_v17, %v1728_v14  ;;  %v1740_v8 = vsel %vm929_vm3, %v1728_v14, 0.0 }
 0x254   : > { %v1768_v33 = vsel %vm6607_vm11, %v1758_v26, 0.0  ;;  %v1759_v35 = vadd.f32 %v1749_v61, %v1729_v16  ;;  %v1760_v2 = vadd.f32 %v1750_v3, %v1740_v8 }
 0x255   : > { %v1774_v40 = vpack.c.bf16 %v1768_v33, %v1767_v0 }
 0x256   : > { %v1769_v47 = vsel %vm6631_vm12, %v1759_v35, 0.0  ;;  %v1770_v50 = vsel %vm6635_vm13, %v1760_v2, 0.0 }
 0x257   : > { %v1775_v53 = vpack.c.bf16 %v1770_v50, %v1769_v47  ;;  %5393 = vmatmul.mubr.msk.bf16.gmra.mrb[104].mxu1 %vm577_vm1, %v1774_v40  ;;  %5421 = vmatmul.mubr.msk.bf16.gmra.mrb[40].mxu0 %vm577_vm1, %v1774_v40 }
 0x258   : > { %5396 = vmatprep.mubr.msk.bf16.mxu1 %vm8084_vm0, %v6178_v1  ;;  %5424 = vmatprep.mubr.msk.bf16.mxu0 %vm8084_vm0, %v6178_v1 }
 0x25f   : > { %5397 = vmatmul.mubr.msk.bf16.gmra.mrb[108].mxu1 %vm577_vm1, %v1775_v53  ;;  %5425 = vmatmul.mubr.msk.bf16.gmra.mrb[44].mxu0 %vm577_vm1, %v1775_v53 }
 0x260   : > { %5436 = vmatprep.mubr.msk.bf16.mxu1 %vm8084_vm0, %v6178_v1  ;;  %5464 = vmatprep.mubr.msk.bf16.mxu0 %vm8084_vm0, %v6178_v1 }
 0x267   : > { %5437 = vmatmul.mubr.msk.bf16.vlgmr.msra.gmra.mrb[112].mxu1 %vm577_vm1, %v6914_v30  ;;  %5465 = vmatmul.mubr.msk.bf16.vlgmr.msra.gmra.mrb[88].mxu0 %vm577_vm1, %v6657_v44  ;;  %v6098_v30 = vld [vmem:[%s8078_s6 + $0x50] sm:$0xff]  }
 0x268   : > { %5513 = vmatpush3.bf16.msra.mxu0 %v6094_v52  ;;  %5440 = vmatprep.mubr.msk.bf16.mxu1 %vm8084_vm0, %v6178_v1 }
 0x269   : > { %5468 = vmatprep.mubr.msk.bf16.mxu0 %vm8084_vm0, %v6178_v1  ;;  %5485 = vmatpush3.bf16.msra.mxu1 %v6095_v25 }
 0x26a   : > { %5514 = vmatprep.subr.bf16.mxu0 %v6178_v1  ;;  %5486 = vmatprep.subr.bf16.mxu1 %v6178_v1 }
 0x26c   : > { %5515 = vmatpush3.bf16.msra.mxu0 %v6096_v63 }
 0x26d   : > { %5487 = vmatpush3.bf16.msra.mxu1 %v6097_v39  ;;  %5516 = vmatprep.subr.bf16.mxu0 %v6178_v1 }
 0x26e   : > { %5488 = vmatprep.subr.bf16.mxu1 %v6178_v1 }
 0x26f   : > { %5441 = vmatmul.mubr.msk.bf16.gmra.mrb[116].mxu1 %vm577_vm1, %v6943_v55  ;;  %5469 = vmatmul.mubr.msk.bf16.gmra.mrb[92].mxu0 %vm577_vm1, %v6673_v18  ;;  %v6108_v55 = vld [vmem:[%s8079_s7 + $0x30] sm:$0xff]  }
 0x270   : > { %5444 = vmatprep.mubr.msk.bf16.mxu1 %vm8084_vm0, %v6178_v1  ;;  %5472 = vmatprep.mubr.msk.bf16.mxu0 %vm8084_vm0, %v6178_v1 }
 0x271   : > { %5517 = vmatpush3.bf16.msra.mxu0 %v6098_v30  ;;  %5489 = vmatpush3.bf16.msra.mxu1 %v6099_v57 }
 0x272   : > { %5518 = vmatprep.subr.bf16.mxu0 %v6178_v1  ;;  %5490 = vmatprep.subr.bf16.mxu1 %v6178_v1 }
 0x275   : > { %5519 = vmatpush3.bf16.msra.mxu0 %v6100_v41  ;;  %5491 = vmatpush3.bf16.msra.mxu1 %v6101_v19 }
 0x276   : > { %5540 = vmatprep.subr.bf16.mxu1 %v6178_v1  ;;  %5568 = vmatprep.subr.bf16.mxu0 %v6178_v1 }
 0x277   : > { %5445 = vmatmul.mubr.msk.bf16.gmra.mrb[120].mxu1 %vm577_vm1, %v6977_v45  ;;  %5473 = vmatmul.mubr.msk.bf16.gmra.mrb[96].mxu0 %vm577_vm1, %v6693_v13  ;;  %v6107_v45 = vld [vmem:[%s8079_s7 + $0x18] sm:$0xff]  }
 0x278   : > { %5448 = vmatprep.mubr.msk.bf16.mxu1 %vm8084_vm0, %v6178_v1  ;;  %5476 = vmatprep.mubr.msk.bf16.mxu0 %vm8084_vm0, %v6178_v1 }
 0x27f   : > { %5449 = vmatmul.mubr.msk.bf16.gmra.mrb[124].mxu1 %vm577_vm1, %v1774_v40  ;;  %5477 = vmatmul.mubr.msk.bf16.gmra.mrb[100].mxu0 %vm577_vm1, %v6709_v20 }
 0x280   : > { %5452 = vmatprep.mubr.msk.bf16.mxu1 %vm8084_vm0, %v6178_v1  ;;  %5480 = vmatprep.mubr.msk.bf16.mxu0 %vm8084_vm0, %v6178_v1 }
 0x287   : > { %5453 = vmatmul.mubr.msk.bf16.gmra.mrb[128].mxu1 %vm577_vm1, %v1775_v53  ;;  %5481 = vmatmul.mubr.msk.bf16.gmra.mrb[104].mxu0 %vm577_vm1, %v6721_v54 }
 0x288   : > { %5492 = vmatprep.mubr.msk.bf16.mxu1 %vm8084_vm0, %v6178_v1  ;;  %5520 = vmatprep.mubr.msk.bf16.mxu0 %vm8084_vm0, %v6178_v1 }
 0x28f   : > { %5493 = vmatmul.mubr.msk.bf16.vlgmr.msra.gmra.mrb[132].mxu1 %vm577_vm1, %v6657_v44  ;;  %5521 = vmatmul.mubr.msk.bf16.vlgmr.msra.gmra.mrb[108].mxu0 %vm577_vm1, %v6657_v44  ;;  %v6102_v44 = vld [vmem:[%s8079_s7] sm:$0xff]  }
 0x290   : > { %5496 = vmatprep.mubr.msk.bf16.mxu1 %vm8084_vm0, %v6178_v1  ;;  %5524 = vmatprep.mubr.msk.bf16.mxu0 %vm8084_vm0, %v6178_v1 }
 0x291   : > { %5541 = vmatpush3.bf16.msra.mxu1 %v6102_v44 }
 0x292   : > { %5542 = vmatprep.subr.bf16.mxu1 %v6178_v1 }
 0x297   : > { %5497 = vmatmul.mubr.msk.bf16.gmra.mrb[136].mxu1 %vm577_vm1, %v6673_v18  ;;  %5525 = vmatmul.mubr.msk.bf16.gmra.mrb[112].mxu0 %vm577_vm1, %v6673_v18  ;;  %v6103_v18 = vld [vmem:[%s8079_s7 + $0x8] sm:$0xff]  }
 0x298   : > { %5500 = vmatprep.mubr.msk.bf16.mxu1 %vm8084_vm0, %v6178_v1  ;;  %5528 = vmatprep.mubr.msk.bf16.mxu0 %vm8084_vm0, %v6178_v1 }
 0x299   : > { %5543 = vmatpush3.bf16.msra.mxu1 %v6103_v18 }
 0x29a   : > { %5544 = vmatprep.subr.bf16.mxu1 %v6178_v1 }
 0x29f   : > { %5501 = vmatmul.mubr.msk.bf16.gmra.mrb[140].mxu1 %vm577_vm1, %v6693_v13  ;;  %5529 = vmatmul.mubr.msk.bf16.gmra.mrb[116].mxu0 %vm577_vm1, %v6693_v13  ;;  %v6105_v13 = vld [vmem:[%s8079_s7 + $0x20] sm:$0xff]  }
 0x2a0   : > { %5504 = vmatprep.mubr.msk.bf16.mxu1 %vm8084_vm0, %v6178_v1  ;;  %5532 = vmatprep.mubr.msk.bf16.mxu0 %vm8084_vm0, %v6178_v1 }
 0x2a1   : > { %5569 = vmatpush3.bf16.msra.mxu0 %v6105_v13 }
 0x2a2   : > { %5570 = vmatprep.subr.bf16.mxu0 %v6178_v1 }
 0x2a7   : > { %5505 = vmatmul.mubr.msk.bf16.gmra.mrb[144].mxu1 %vm577_vm1, %v6709_v20  ;;  %5533 = vmatmul.mubr.msk.bf16.gmra.mrb[120].mxu0 %vm577_vm1, %v6709_v20  ;;  %v6106_v20 = vld [vmem:[%s8079_s7 + $0x28] sm:$0xff]  }
 0x2a8   : > { %5508 = vmatprep.mubr.msk.bf16.mxu1 %vm8084_vm0, %v6178_v1  ;;  %5536 = vmatprep.mubr.msk.bf16.mxu0 %vm8084_vm0, %v6178_v1 }
 0x2a9   : > { %5571 = vmatpush3.bf16.msra.mxu0 %v6106_v20 }
 0x2aa   : > { %5572 = vmatprep.subr.bf16.mxu0 %v6178_v1 }
 0x2ad   : > { %5573 = vmatpush3.bf16.msra.mxu0 %v6108_v55 }
 0x2ae   : > { %5574 = vmatprep.subr.bf16.mxu0 %v6178_v1 }
 0x2af   : > { %5509 = vmatmul.mubr.msk.bf16.gmra.mrb[148].mxu1 %vm577_vm1, %v6721_v54  ;;  %5537 = vmatmul.mubr.msk.bf16.gmra.mrb[124].mxu0 %vm577_vm1, %v6721_v54  ;;  %v6104_v54 = vld [vmem:[%s8079_s7 + $0x10] sm:$0xff]  }
 0x2b0   : > { %5548 = vmatprep.mubr.msk.bf16.mxu1 %vm8084_vm0, %v6178_v1  ;;  %5576 = vmatprep.mubr.msk.bf16.mxu0 %vm8084_vm0, %v6178_v1 }
 0x2b1   : > { %5545 = vmatpush3.bf16.msra.mxu1 %v6104_v54  ;;  %5575 = vmatpush3.bf16.msra.mxu0 %v6109_v24 }
 0x2b2   : > { %5546 = vmatprep.subr.bf16.mxu1 %v6178_v1  ;;  %5624 = vmatprep.subr.bf16.mxu0 %v6178_v1 }
 0x2b5   : > { %5547 = vmatpush3.bf16.msra.mxu1 %v6107_v45 }
 0x2b6   : > { %5596 = vmatprep.subr.bf16.mxu1 %v6178_v1 }
 0x312   : > { %v1857_v61 = vpop.f32.mrb[92].mxu1  ;;  %v1963_v17 = vpop.f32.mrb[28].mxu0 }
 0x313   : > { %v2118_v43 = vrot.slane %v1857_v61, 7  ;;  %v5885_v42 = vadd.f32 %v6837_v7, %v1963_v17  ;;  %v5382_v12 = vpop.f32.mrb[93].mxu1  ;;  %v5410_v15 = vpop.f32.mrb[29].mxu0 }
 0x314   : > { %v1860_v4 = vpop.f32.mrb[94].mxu1  ;;  %v1966_v3 = vpop.f32.mrb[30].mxu0 }
 0x315   : > { %v2147_v14 = vsel %vm888_vm2, 0.0, %v2118_v43  ;;  %v2119_v48 = vrot.slane %v1860_v4, 7  ;;  %v5889_v5 = vadd.f32 %v6844_v23, %v1966_v3  ;;  %v5383_v26 = vpop.f32.mrb[95].mxu1  ;;  %v5411_v16 = vpop.f32.mrb[31].mxu0 }
 0x316   : > { %v7159_v8 = vadd.f32 %v5885_v42, %v2147_v14 }
 0x317   : > { %v2120_v0 = vsel %vm888_vm2, %v2118_v43, %v2119_v48 }
 0x318   : > { %v7162_v33 = vadd.f32 %v5889_v5, %v2120_v0 }
 0x31a   : > { %v1865_v35 = vpop.f32.mrb[96].mxu1  ;;  %v1971_v2 = vpop.f32.mrb[32].mxu0 }
 0x31b   : > { %v2121_v7 = vrot.slane %v1865_v35, 7  ;;  %v5893_v40 = vadd.f32 %v6850_v6, %v1971_v2  ;;  %v5386_v47 = vpop.f32.mrb[97].mxu1  ;;  %v5414_v50 = vpop.f32.mrb[33].mxu0 }
 0x31c   : > { %v1868_v53 = vpop.f32.mrb[98].mxu1  ;;  %v1974_v52 = vpop.f32.mrb[34].mxu0 }
 0x31d   : > { %v2122_v25 = vsel %vm888_vm2, %v2119_v48, %v2121_v7  ;;  %v2123_v23 = vrot.slane %v1868_v53, 7  ;;  %v5897_v63 = vadd.f32 %v6857_v28, %v1974_v52  ;;  %v5387_v39 = vpop.f32.mrb[99].mxu1  ;;  %v5415_v30 = vpop.f32.mrb[35].mxu0 }
 0x31e   : > { %v7167_v57 = vadd.f32 %v5893_v40, %v2122_v25 }
 0x31f   : > { %v2124_v41 = vsel %vm888_vm2, %v2121_v7, %v2123_v23 }
 0x320   : > { %v7170_v19 = vadd.f32 %v5897_v63, %v2124_v41 }
 0x322   : > { %v1873_v44 = vpop.f32.mrb[100].mxu1  ;;  %v1979_v18 = vpop.f32.mrb[36].mxu0 }
 0x323   : > { %v2125_v6 = vrot.slane %v1873_v44, 7  ;;  %v5901_v13 = vadd.f32 %v6864_v49, %v1979_v18  ;;  %v5390_v20 = vpop.f32.mrb[101].mxu1  ;;  %v5418_v54 = vpop.f32.mrb[37].mxu0 }
 0x324   : > { %v1876_v55 = vpop.f32.mrb[102].mxu1  ;;  %v1982_v45 = vpop.f32.mrb[38].mxu0 }
 0x325   : > { %v2126_v24 = vsel %vm888_vm2, %v2123_v23, %v2125_v6  ;;  %v2127_v28 = vrot.slane %v1876_v55, 7  ;;  %v5905_v61 = vadd.f32 %v6871_v37, %v1982_v45  ;;  %v5391_v17 = vpop.f32.mrb[103].mxu1  ;;  %v5419_v43 = vpop.f32.mrb[39].mxu0 }
 0x326   : > { %v7175_v42 = vadd.f32 %v5901_v13, %v2126_v24 }
 0x327   : > { %v2128_v12 = vsel %vm888_vm2, %v2125_v6, %v2127_v28 }
 0x328   : > { %v7178_v15 = vadd.f32 %v5905_v61, %v2128_v12 }
 0x32a   : > { %v1881_v4 = vpop.f32.mrb[104].mxu1  ;;  %v1987_v3 = vpop.f32.mrb[40].mxu0 }
 0x32b   : > { %v2129_v49 = vrot.slane %v1881_v4, 7  ;;  %v5909_v14 = vadd.f32 %v6878_v56, %v1987_v3  ;;  %v5394_v48 = vpop.f32.mrb[105].mxu1  ;;  %v5422_v5 = vpop.f32.mrb[41].mxu0 }
 0x32c   : > { %v1884_v26 = vpop.f32.mrb[106].mxu1  ;;  %v1990_v16 = vpop.f32.mrb[42].mxu0 }
 0x32d   : > { %v2130_v0 = vsel %vm888_vm2, %v2127_v28, %v2129_v49  ;;  %v2131_v37 = vrot.slane %v1884_v26, 7  ;;  %v5913_v35 = vadd.f32 %v6885_v11, %v1990_v16  ;;  %v5395_v2 = vpop.f32.mrb[107].mxu1  ;;  %v5423_v7 = vpop.f32.mrb[43].mxu0 }
 0x32e   : > { %v7183_v40 = vadd.f32 %v5909_v14, %v2130_v0 }
 0x32f   : > { %v2132_v47 = vsel %vm888_vm2, %v2129_v49, %v2131_v37 }
 0x330   : > { %v7186_v50 = vadd.f32 %v5913_v35, %v2132_v47 }
 0x332   : > { %v1889_v53 = vpop.f32.mrb[108].mxu1  ;;  %v1995_v52 = vpop.f32.mrb[44].mxu0 }
 0x333   : > { %v2133_v56 = vrot.slane %v1889_v53, 7  ;;  %v5917_v25 = vadd.f32 %v6893_v29, %v1995_v52  ;;  %v5398_v23 = vpop.f32.mrb[109].mxu1  ;;  %v5426_v63 = vpop.f32.mrb[45].mxu0  ;;  %v6138_v52 = vld [vmem:[%s6288_s12] sm:$0xff] }
 0x334   : > { %v1892_v39 = vpop.f32.mrb[110].mxu1  ;;  %v1998_v30 = vpop.f32.mrb[46].mxu0 }
 0x335   : > { %v2134_v41 = vsel %vm888_vm2, %v2131_v37, %v2133_v56  ;;  %v2135_v11 = vrot.slane %v1892_v39, 7  ;;  %v5921_v44 = vadd.f32 %v6896_v51, %v1998_v30  ;;  %v5399_v18 = vpop.f32.mrb[111].mxu1  ;;  %v5427_v6 = vpop.f32.mrb[47].mxu0 }
 0x336   : > { %v7191_v13 = vadd.f32 %v5917_v25, %v2134_v41 }
 0x337   : > { %v2136_v20 = vsel %vm888_vm2, %v2133_v56, %v2135_v11 }
 0x338   : > { %v7194_v54 = vadd.f32 %v5921_v44, %v2136_v20 }
 0x33a   : > { %v2069_v55 = vpop.f32.mrb[112].mxu1  ;;  %v7196_v45 = vpop.f32.mrb[88].mxu0 }
 0x33b   : > { %v5438_v29 = vpop.f32.mrb[113].mxu1  ;;  %v5466_v24 = vpop.f32.mrb[89].mxu0  ;;  %v2158_v17 = vrot.slane %v2069_v55, 1  ;;  %v2605_v43 = vrot.slane %v7196_v45, 7 }
 0x33c   : > { %v2072_v28 = vpop.f32.mrb[114].mxu1  ;;  %v2347_v61 = vpop.f32.mrb[90].mxu0 }
 0x33d   : > { %v2159_v12 = vrot.slane %v2072_v28, 1  ;;  %v2606_v51 = vrot.slane %v2347_v61, 7  ;;  %v5439_v4 = vpop.f32.mrb[115].mxu1  ;;  %v5467_v3 = vpop.f32.mrb[91].mxu0  ;;  %v6139_v28 = vld [vmem:[%s6288_s12 + $0x8] sm:$0xff] }
 0x33f   : > { %v2160_v49 = vsel %vm929_vm3, %v2158_v17, %v2159_v12  ;;  %v7203_v14 = vsel %vm888_vm2, %v2605_v43, %v2606_v51 }
 0x340   : > { %v5887_v48 = vadd.f32 %v7159_v8, %v2160_v49 }
 0x342   : > { %vm2218_vm14 = vcmp.ge.f32.partialorder %v5887_v48, 0.0  ;;  %v2228_v5 = vmul.f32 0.1, %v5887_v48  ;;  %v2077_v26 = vpop.f32.mrb[116].mxu1  ;;  %v2352_v16 = vpop.f32.mrb[92].mxu0 }
 0x343   : > { %v2161_v0 = vrot.slane %v2077_v26, 1  ;;  %v2608_v37 = vrot.slane %v2352_v16, 7  ;;  %v5442_v35 = vpop.f32.mrb[117].mxu1  ;;  %v5470_v2 = vpop.f32.mrb[93].mxu0 }
 0x344   : > { %v2238_v7 = vsel %vm2218_vm14, %v5887_v48, %v2228_v5  ;;  %v2080_v47 = vpop.f32.mrb[118].mxu1  ;;  %v2355_v53 = vpop.f32.mrb[94].mxu0  ;;  %v6140_v5 = vld [vmem:[%s6288_s12 + $0x10] sm:$0xff] }
 0x345   : > { %v2248_v56 = vadd.f32 %v6138_v52, %v2238_v7  ;;  %v2162_v8 = vsel %vm929_vm3, %v2159_v12, %v2161_v0  ;;  %v2163_v25 = vrot.slane %v2080_v47, 1  ;;  %v2610_v23 = vrot.slane %v2355_v53, 7  ;;  %v5443_v63 = vpop.f32.mrb[119].mxu1  ;;  %v5471_v39 = vpop.f32.mrb[95].mxu0 }
 0x346   : > { %v5891_v30 = vadd.f32 %v7162_v33, %v2162_v8  ;;  %v7216_v41 = vsel %vm888_vm2, %v2606_v51, %v2608_v37 }
 0x347   : > { %v2258_v11 = vsel %vm6496_vm4, %v2248_v56, 0.0  ;;  %v2164_v44 = vsel %vm929_vm3, %v2161_v0, %v2163_v25  ;;  %v7222_v18 = vsel %vm888_vm2, %v2608_v37, %v2610_v23 }
 0x348   : > { %2268 = vst.msk [vmem:[%s7210_s14] sm:$0xff] %vm577_vm1, %v2258_v11  ;;  %vm2219_vm15 = vcmp.ge.f32.partialorder %v5891_v30, 0.0  ;;  %v2229_v6 = vmul.f32 0.1, %v5891_v30  ;;  %v5895_v20 = vadd.f32 %v7167_v57, %v2164_v44 }
 0x34a   : > { %v2239_v55 = vsel %vm2219_vm15, %v5891_v30, %v2229_v6  ;;  %vm2220_vm14 = vcmp.ge.f32.partialorder %v5895_v20, 0.0  ;;  %v2230_v33 = vmul.f32 0.1, %v5895_v20  ;;  %v2085_v29 = vpop.f32.mrb[120].mxu1  ;;  %v2360_v24 = vpop.f32.mrb[96].mxu0  ;;  %v6141_v30 = vld [vmem:[%s6288_s12 + $0x18] sm:$0xff] }
 0x34b   : > { %v2249_v61 = vadd.f32 %v6139_v28, %v2239_v55  ;;  %v2165_v17 = vrot.slane %v2085_v29, 1  ;;  %v2612_v12 = vrot.slane %v2360_v24, 7  ;;  %v5446_v51 = vpop.f32.mrb[121].mxu1  ;;  %v5474_v4 = vpop.f32.mrb[97].mxu0  ;;  %v6142_v28 = vld [vmem:[%s6288_s12 + $0x20] sm:$0xff] }
 0x34c   : > { %v2240_v3 = vsel %vm2220_vm14, %v5895_v20, %v2230_v33  ;;  %v2088_v49 = vpop.f32.mrb[122].mxu1  ;;  %v2363_v48 = vpop.f32.mrb[98].mxu0 }
 0x34d   : > { %v2259_v57 = vsel %vm6500_vm5, %v2249_v61, 0.0  ;;  %v2250_v26 = vadd.f32 %v6140_v5, %v2240_v3  ;;  %v2166_v16 = vsel %vm929_vm3, %v2163_v25, %v2165_v17  ;;  %v2167_v0 = vrot.slane %v2088_v49, 1  ;;  %v5447_v37 = vpop.f32.mrb[123].mxu1  ;;  %v5475_v35 = vpop.f32.mrb[99].mxu0 }
 0x34e   : > { %2269 = vst.msk [vmem:[%s7210_s14 + $0x8] sm:$0xff] %vm577_vm1, %v2259_v57  ;;  %v5899_v2 = vadd.f32 %v7170_v19, %v2166_v16  ;;  %v2614_v7 = vrot.slane %v2363_v48, 7  ;;  %v7236_v47 = vsel %vm888_vm2, %v2610_v23, %v2612_v12 }
 0x34f   : > { %v2260_v53 = vsel %vm6525_vm6, %v2250_v26, 0.0  ;;  %v2168_v52 = vsel %vm929_vm3, %v2165_v17, %v2167_v0 }
 0x350   : > { %2270 = vst.msk [vmem:[%s7210_s14 + $0x10] sm:$0xff] %vm577_vm1, %v2260_v53  ;;  %vm2221_vm15 = vcmp.ge.f32.partialorder %v5899_v2, 0.0  ;;  %v2231_v56 = vmul.f32 0.1, %v5899_v2  ;;  %v5903_v8 = vadd.f32 %v7175_v42, %v2168_v52  ;;  %v7245_v25 = vsel %vm888_vm2, %v2612_v12, %v2614_v7 }
 0x352   : > { %v2241_v19 = vsel %vm2221_vm15, %v5899_v2, %v2231_v56  ;;  %vm2222_vm14 = vcmp.ge.f32.partialorder %v5903_v8, 0.0  ;;  %v2232_v63 = vmul.f32 0.1, %v5903_v8  ;;  %v2093_v23 = vpop.f32.mrb[124].mxu1  ;;  %v2368_v39 = vpop.f32.mrb[100].mxu0 }
 0x353   : > { %v2251_v11 = vadd.f32 %v6141_v30, %v2241_v19  ;;  %v2169_v44 = vrot.slane %v2093_v23, 1  ;;  %v2616_v6 = vrot.slane %v2368_v39, 7  ;;  %v5450_v20 = vpop.f32.mrb[125].mxu1  ;;  %v5478_v55 = vpop.f32.mrb[101].mxu0  ;;  %v6144_v30 = vld [vmem:[%s6288_s12 + $0x30] sm:$0xff] }
 0x354   : > { %v2242_v33 = vsel %vm2222_vm14, %v5903_v8, %v2232_v63  ;;  %v2096_v29 = vpop.f32.mrb[126].mxu1  ;;  %v2371_v42 = vpop.f32.mrb[102].mxu0 }
 0x355   : > { %v2261_v24 = vsel %vm6529_vm7, %v2251_v11, 0.0  ;;  %v2252_v61 = vadd.f32 %v6142_v28, %v2242_v33  ;;  %v2170_v17 = vsel %vm929_vm3, %v2167_v0, %v2169_v44  ;;  %v2171_v12 = vrot.slane %v2096_v29, 1  ;;  %v5451_v51 = vpop.f32.mrb[127].mxu1  ;;  %v5479_v4 = vpop.f32.mrb[103].mxu0 }
 0x356   : > { %2271 = vst.msk [vmem:[%s7210_s14 + $0x18] sm:$0xff] %vm577_vm1, %v2261_v24  ;;  %v5907_v3 = vadd.f32 %v7178_v15, %v2170_v17  ;;  %v2618_v49 = vrot.slane %v2371_v42, 7  ;;  %v7256_v48 = vsel %vm888_vm2, %v2614_v7, %v2616_v6  ;;  %v6143_v7 = vld [vmem:[%s6288_s12 + $0x28] sm:$0xff]  ;;  %v2634_v51 = vsel %vm888_vm2, 0.0, %v2605_v43 }
 0x357   : > { %v2262_v57 = vsel %vm6566_vm8, %v2252_v61, 0.0  ;;  %v2172_v5 = vsel %vm929_vm3, %v2169_v44, %v2171_v12 }
 0x358   : > { %2272 = vst.msk [vmem:[%s7210_s14 + $0x20] sm:$0xff] %vm577_vm1, %v2262_v57  ;;  %vm2223_vm15 = vcmp.ge.f32.partialorder %v5907_v3, 0.0  ;;  %v2233_v26 = vmul.f32 0.1, %v5907_v3  ;;  %v5911_v16 = vadd.f32 %v7183_v40, %v2172_v5  ;;  %v7265_v0 = vsel %vm888_vm2, %v2616_v6, %v2618_v49 }
 0x35a   : > { %v2243_v15 = vsel %vm2223_vm15, %v5907_v3, %v2233_v26  ;;  %vm2224_vm14 = vcmp.ge.f32.partialorder %v5911_v16, 0.0  ;;  %v2234_v37 = vmul.f32 0.1, %v5911_v16  ;;  %v2101_v35 = vpop.f32.mrb[128].mxu1  ;;  %v2376_v2 = vpop.f32.mrb[104].mxu0  ;;  %v6145_v26 = vld [vmem:[%s6288_s12 + $0x38] sm:$0xff] }
 0x35b   : > { %v2253_v53 = vadd.f32 %v6143_v7, %v2243_v15  ;;  %v2173_v52 = vrot.slane %v2101_v35, 1  ;;  %v2620_v56 = vrot.slane %v2376_v2, 7  ;;  %v5454_v8 = vpop.f32.mrb[129].mxu1  ;;  %v5482_v19 = vpop.f32.mrb[105].mxu0 }
 0x35c   : > { %v2244_v63 = vsel %vm2224_vm14, %v5911_v16, %v2234_v37  ;;  %v2104_v23 = vpop.f32.mrb[130].mxu1  ;;  %v2379_v40 = vpop.f32.mrb[106].mxu0 }
 0x35d   : > { %v2263_v39 = vsel %vm6570_vm9, %v2253_v53, 0.0  ;;  %v2254_v11 = vadd.f32 %v6144_v30, %v2244_v63  ;;  %v2174_v44 = vsel %vm929_vm3, %v2171_v12, %v2173_v52  ;;  %v2175_v6 = vrot.slane %v2104_v23, 1  ;;  %v5455_v20 = vpop.f32.mrb[131].mxu1  ;;  %v5483_v55 = vpop.f32.mrb[107].mxu0  ;;  %v6146_v53 = vld [vmem:[%s6288_s12 + $0x40] sm:$0xff]  ;;  %v6147_v63 = vld [vmem:[%s6288_s12 + $0x48] sm:$0xff] }
 0x35e   : > { %2273 = vst.msk [vmem:[%s7210_s14 + $0x28] sm:$0xff] %vm577_vm1, %v2263_v39  ;;  %v5915_v33 = vadd.f32 %v7186_v50, %v2174_v44  ;;  %v2622_v29 = vrot.slane %v2379_v40, 7  ;;  %v7276_v42 = vsel %vm888_vm2, %v2618_v49, %v2620_v56 }
 0x35f   : > { %v2264_v24 = vsel %vm6603_vm10, %v2254_v11, 0.0  ;;  %v2176_v28 = vsel %vm929_vm3, %v2173_v52, %v2175_v6  ;;  %v2187_v61 = vsel %vm929_vm3, %v2175_v6, 0.0 }
 0x360   : > { %2274 = vst.msk [vmem:[%s7210_s14 + $0x30] sm:$0xff] %vm577_vm1, %v2264_v24  ;;  %vm2225_vm15 = vcmp.ge.f32.partialorder %v5915_v33, 0.0  ;;  %v2235_v17 = vmul.f32 0.1, %v5915_v33  ;;  %v5919_v12 = vadd.f32 %v7191_v13, %v2176_v28  ;;  %v5923_v50 = vadd.f32 %v7194_v54, %v2187_v61 }
 0x361   : > { %v7290_v4 = vsel %vm888_vm2, %v2620_v56, %v2622_v29 }
 0x362   : > { %v2245_v3 = vsel %vm2225_vm15, %v5915_v33, %v2235_v17  ;;  %vm2226_vm14 = vcmp.ge.f32.partialorder %v5919_v12, 0.0  ;;  %vm2227_vm0 = vcmp.ge.f32.partialorder %v5923_v50, 0.0  ;;  %v2236_v49 = vmul.f32 0.1, %v5919_v12  ;;  %v2450_v57 = vpop.f32.mrb[132].mxu1  ;;  %v2556_v5 = vpop.f32.mrb[108].mxu0 }
 0x363   : > { %v2255_v16 = vadd.f32 %v6145_v26, %v2245_v3  ;;  %v2237_v13 = vmul.f32 0.1, %v5923_v50  ;;  %v2675_v54 = vadd.f32 %v2634_v51, %v2450_v57  ;;  %v5494_v15 = vpop.f32.mrb[133].mxu1  ;;  %v5522_v45 = vpop.f32.mrb[109].mxu0  ;;  %v2645_v40 = vrot.slane %v2556_v5, 1 }
 0x364   : > { %v2246_v37 = vsel %vm2226_vm14, %v5919_v12, %v2236_v49  ;;  %v2453_v43 = vpop.f32.mrb[134].mxu1  ;;  %v2559_v35 = vpop.f32.mrb[110].mxu0  ;;  %v6113_v15 = vld [vmem:[%s8080_s8] sm:$0xff]  }
 0x365   : > { %v2265_v2 = vsel %vm6607_vm11, %v2255_v16, 0.0  ;;  %v2247_v7 = vsel %vm2227_vm0, %v5923_v50, %v2237_v13  ;;  %v2256_v52 = vadd.f32 %v6146_v53, %v2246_v37  ;;  %v2676_v56 = vadd.f32 %v7203_v14, %v2453_v43  ;;  %v5523_v8 = vpop.f32.mrb[111].mxu0  ;;  %v5495_v19 = vpop.f32.mrb[135].mxu1  ;;  %v6110_v16 = vld [vmem:[%s8079_s7 + $0x40] sm:$0xff]   ;;  %v6111_v53 = vld [vmem:[%s8079_s7 + $0x48] sm:$0xff]  }
 0x366   : > { %2275 = vst.msk [vmem:[%s7210_s14 + $0x38] sm:$0xff] %vm577_vm1, %v2265_v2  ;;  %v2257_v23 = vadd.f32 %v6147_v63, %v2247_v7  ;;  %v2646_v39 = vrot.slane %v2559_v35, 1  ;;  %vm8106_vm0 = vmmov 0  }
 0x367   : > { %v2266_v30 = vsel %vm6631_vm12, %v2256_v52, 0.0 }
 0x368   : > { %v2267_v11 = vsel %vm6635_vm13, %v2257_v23, 0.0  ;;  %2276 = vst.msk [vmem:[%s7210_s14 + $0x40] sm:$0xff] %vm577_vm1, %v2266_v30  ;;  %v2647_v44 = vsel %vm929_vm3, %v2645_v40, %v2646_v39  ;;  %v6115_v23 = vld [vmem:[%s8080_s8 + $0x8] sm:$0xff]  }
 0x369   : > { %2277 = vst.msk [vmem:[%s7210_s14 + $0x48] sm:$0xff] %vm577_vm1, %v2267_v11  ;;  %v2685_v14 = vadd.f32 %v2675_v54, %v2647_v44  ;;  %v6112_v44 = vld [vmem:[%s8079_s7 + $0x50] sm:$0xff]  }
 0x36a   : > { %v2458_v6 = vpop.f32.mrb[136].mxu1  ;;  %v2564_v20 = vpop.f32.mrb[112].mxu0 }
 0x36b   : > { %v2677_v55 = vadd.f32 %v7216_v41, %v2458_v6  ;;  %v2648_v33 = vrot.slane %v2564_v20, 1  ;;  %v5498_v29 = vpop.f32.mrb[137].mxu1  ;;  %v5526_v24 = vpop.f32.mrb[113].mxu0  ;;  %v2695_v5 = vsel %vm6496_vm4, %v2685_v14, 0.0  ;;  %v6116_v20 = vld [vmem:[%s8080_s8 + $0x10] sm:$0xff]  }
 0x36c   : > { %v2461_v28 = vpop.f32.mrb[138].mxu1  ;;  %v2567_v61 = vpop.f32.mrb[114].mxu0 }
 0x36d   : > { %v2649_v17 = vsel %vm929_vm3, %v2646_v39, %v2648_v33  ;;  %v2678_v12 = vadd.f32 %v7222_v18, %v2461_v28  ;;  %v2650_v50 = vrot.slane %v2567_v61, 1  ;;  %v5527_v51 = vpop.f32.mrb[115].mxu0  ;;  %v5499_v3 = vpop.f32.mrb[139].mxu1 }
 0x36e   : > { %v2686_v49 = vadd.f32 %v2676_v56, %v2649_v17  ;;  %v6114_v3 = vld [vmem:[%s8079_s7 + $0x58] sm:$0xff]  }
 0x36f   : > { %v2651_v57 = vsel %vm929_vm3, %v2648_v33, %v2650_v50 }
 0x370   : > { %v2696_v41 = vsel %vm6500_vm5, %v2686_v49, 0.0  ;;  %v2687_v26 = vadd.f32 %v2677_v55, %v2651_v57  ;;  %v6117_v57 = vld [vmem:[%s8080_s8 + $0x18] sm:$0xff]  }
 0x371   : > { %v7320_v13 = vpack.c.bf16 %v2696_v41, %v2695_v5 }
 0x372   : > { %v2466_v18 = vpop.f32.mrb[140].mxu1  ;;  %v2572_v54 = vpop.f32.mrb[116].mxu0 }
 0x373   : > { %v2679_v45 = vadd.f32 %v7236_v47, %v2466_v18  ;;  %v2652_v37 = vrot.slane %v2572_v54, 1  ;;  %v5502_v43 = vpop.f32.mrb[141].mxu1  ;;  %v5530_v35 = vpop.f32.mrb[117].mxu0  ;;  %5549 = vmatmul.mubr.msk.bf16.vlgmr.msra.gmra.mrb[152].mxu1 %vm577_vm1, %v7320_v13  ;;  %5577 = vmatmul.mubr.msk.bf16.vlgmr.msra.gmra.mrb[128].mxu0 %vm577_vm1, %v7320_v13 }
 0x374   : > { %v2469_v2 = vpop.f32.mrb[142].mxu1  ;;  %v2575_v7 = vpop.f32.mrb[118].mxu0  ;;  %5597 = vmatpush3.bf16.msra.mxu1 %v6110_v16  ;;  %5552 = vmatprep.mubr.msk.bf16.mxu1 %vm8106_vm0, %v6178_v1 }
 0x375   : > { %v2653_v47 = vsel %vm929_vm3, %v2650_v50, %v2652_v37  ;;  %v2680_v52 = vadd.f32 %v7245_v25, %v2469_v2  ;;  %v2654_v56 = vrot.slane %v2575_v7, 1  ;;  %v5531_v8 = vpop.f32.mrb[119].mxu0  ;;  %v5503_v19 = vpop.f32.mrb[143].mxu1  ;;  %5580 = vmatprep.mubr.msk.bf16.mxu0 %vm8106_vm0, %v6178_v1  ;;  %5598 = vmatprep.subr.bf16.mxu1 %v6178_v1  ;;  %v2697_v25 = vsel %vm6525_vm6, %v2687_v26, 0.0 }
 0x376   : > { %v2688_v63 = vadd.f32 %v2678_v12, %v2653_v47  ;;  %5625 = vmatpush3.bf16.msra.mxu0 %v6113_v15 }
 0x377   : > { %v2655_v40 = vsel %vm929_vm3, %v2652_v37, %v2654_v56  ;;  %5626 = vmatprep.subr.bf16.mxu0 %v6178_v1 }
 0x378   : > { %v2698_v39 = vsel %vm6529_vm7, %v2688_v63, 0.0  ;;  %v2689_v30 = vadd.f32 %v2679_v45, %v2655_v40  ;;  %5599 = vmatpush3.bf16.msra.mxu1 %v6111_v53 }
 0x379   : > { %v7349_v11 = vpack.c.bf16 %v2698_v39, %v2697_v25  ;;  %5600 = vmatprep.subr.bf16.mxu1 %v6178_v1 }
 0x37a   : > { %v2474_v14 = vpop.f32.mrb[144].mxu1  ;;  %v2580_v6 = vpop.f32.mrb[120].mxu0  ;;  %5627 = vmatpush3.bf16.msra.mxu0 %v6115_v23  ;;  %v2699_v5 = vsel %vm6566_vm8, %v2689_v30, 0.0 }
 0x37b   : > { %v2681_v55 = vadd.f32 %v7256_v48, %v2474_v14  ;;  %v2656_v33 = vrot.slane %v2580_v6, 1  ;;  %v5506_v29 = vpop.f32.mrb[145].mxu1  ;;  %v5534_v24 = vpop.f32.mrb[121].mxu0  ;;  %5553 = vmatmul.mubr.msk.bf16.gmra.mrb[156].mxu1 %vm577_vm1, %v7349_v11  ;;  %5581 = vmatmul.mubr.msk.bf16.gmra.mrb[132].mxu0 %vm577_vm1, %v7349_v11  ;;  %v530_v14 = vld [vmem:[%s7420_s16] sm:$0xff]  ;;  %v531_v6 = vld [vmem:[%s7420_s16 + $0x8] sm:$0xff] }
 0x37c   : > { %v2477_v28 = vpop.f32.mrb[146].mxu1  ;;  %v2583_v61 = vpop.f32.mrb[122].mxu0  ;;  %5556 = vmatprep.mubr.msk.bf16.mxu1 %vm8106_vm0, %v6178_v1  ;;  %5584 = vmatprep.mubr.msk.bf16.mxu0 %vm8106_vm0, %v6178_v1  ;;  %v532_v29 = vld [vmem:[%s7420_s16 + $0x10] sm:$0xff]  ;;  %v533_v24 = vld [vmem:[%s7420_s16 + $0x18] sm:$0xff] }
 0x37d   : > { %v2657_v17 = vsel %vm929_vm3, %v2654_v56, %v2656_v33  ;;  %v2682_v48 = vadd.f32 %v7265_v0, %v2477_v28  ;;  %v2658_v12 = vrot.slane %v2583_v61, 1  ;;  %v5535_v50 = vpop.f32.mrb[123].mxu0  ;;  %v5507_v51 = vpop.f32.mrb[147].mxu1  ;;  %5601 = vmatpush3.bf16.msra.mxu1 %v6112_v44  ;;  %5628 = vmatprep.subr.bf16.mxu0 %v6178_v1  ;;  %v6119_v28 = vld [vmem:[%s8080_s8 + $0x48] sm:$0xff]   ;;  %v541_v61 = vpack.c.bf16 %v533_v24, %v532_v29 }
 0x37e   : > { %v2690_v49 = vadd.f32 %v2680_v52, %v2657_v17  ;;  %5602 = vmatprep.subr.bf16.mxu1 %v6178_v1  ;;  %5629 = vmatpush3.bf16.msra.mxu0 %v6116_v20  ;;  %v540_v20 = vpack.c.bf16 %v531_v6, %v530_v14  ;;  %v6120_v17 = vld [vmem:[%s8080_s8 + $0x50] sm:$0xff]   ;;  %v535_v50 = vld [vmem:[%s7420_s16 + $0x28] sm:$0xff]  ;;  %v6122_v51 = vld [vmem:[%s8080_s8 + $0x58] sm:$0xff]  }
 0x37f   : > { %v2659_v0 = vsel %vm929_vm3, %v2656_v33, %v2658_v12  ;;  %5630 = vmatprep.subr.bf16.mxu0 %v6178_v1  ;;  %v6121_v33 = vld [vmem:[%s8080_s8 + $0x20] sm:$0xff]   ;;  %v6127_v29 = vld [vmem:[%s8081_s9 + $0x8] sm:$0xff]  }
 0x380   : > { %v2700_v41 = vsel %vm6570_vm9, %v2690_v49, 0.0  ;;  %v2691_v26 = vadd.f32 %v2681_v55, %v2659_v0  ;;  %v6118_v55 = vld [vmem:[%s8080_s8 + $0x40] sm:$0xff]   ;;  %v536_v49 = vld [vmem:[%s7420_s16 + $0x30] sm:$0xff] }
 0x381   : > { %v7383_v16 = vpack.c.bf16 %v2700_v41, %v2699_v5  ;;  %5603 = vmatpush3.bf16.msra.mxu1 %v6114_v3  ;;  %v538_v5 = vld [vmem:[%s7420_s16 + $0x40] sm:$0xff]  ;;  %v539_v41 = vld [vmem:[%s7420_s16 + $0x48] sm:$0xff] }
 0x382   : > { %v2482_v18 = vpop.f32.mrb[148].mxu1  ;;  %v2588_v54 = vpop.f32.mrb[124].mxu0  ;;  %5631 = vmatpush3.bf16.msra.mxu0 %v6117_v57  ;;  %5680 = vmatprep.subr.bf16.mxu1 %v6178_v1  ;;  %v2701_v63 = vsel %vm6603_vm10, %v2691_v26, 0.0  ;;  %v537_v57 = vld [vmem:[%s7420_s16 + $0x38] sm:$0xff]  ;;  %v544_v26 = vpack.c.bf16 %v539_v41, %v538_v5  ;;  %v6129_v5 = vld [vmem:[%s8081_s9 + $0x40] sm:$0xff]  }
 0x383   : > { %v2683_v15 = vadd.f32 %v7276_v42, %v2482_v18  ;;  %v2660_v45 = vrot.slane %v2588_v54, 1  ;;  %v5510_v37 = vpop.f32.mrb[149].mxu1  ;;  %v5538_v43 = vpop.f32.mrb[125].mxu0  ;;  %5557 = vmatmul.mubr.msk.bf16.gmra.mrb[160].mxu1 %vm577_vm1, %v7383_v16  ;;  %5585 = vmatmul.mubr.msk.bf16.gmra.mrb[136].mxu0 %vm577_vm1, %v7383_v16  ;;  %v543_v0 = vpack.c.bf16 %v537_v57, %v536_v49  ;;  %v6149_v18 = vld [vmem:[%s8078_s6 + $0x20] sm:$0xff]   ;;  %v6150_v54 = vld [vmem:[%s8078_s6 + $0x8] sm:$0xff]  }
 0x384   : > { %v2485_v35 = vpop.f32.mrb[150].mxu1  ;;  %v2591_v2 = vpop.f32.mrb[126].mxu0  ;;  %5560 = vmatprep.mubr.msk.bf16.mxu1 %vm8106_vm0, %v6178_v1  ;;  %5588 = vmatprep.mubr.msk.bf16.mxu0 %vm8106_vm0, %v6178_v1  ;;  %v6153_v37 = vld [vmem:[%s8078_s6 + $0x30] sm:$0xff]   ;;  %v6154_v43 = vld [vmem:[%s8078_s6 + $0x18] sm:$0xff]  }
 0x385   : > { %v2661_v7 = vsel %vm929_vm3, %v2658_v12, %v2660_v45  ;;  %v2684_v42 = vadd.f32 %v7290_v4, %v2485_v35  ;;  %v2662_v53 = vrot.slane %v2591_v2, 1  ;;  %v5539_v47 = vpop.f32.mrb[127].mxu0  ;;  %v5511_v52 = vpop.f32.mrb[151].mxu1  ;;  %5652 = vmatprep.subr.bf16.mxu0 %v6178_v1  ;;  %v534_v12 = vld [vmem:[%s7420_s16 + $0x20] sm:$0xff]  ;;  %v6155_v35 = vld [vmem:[%s8078_s6 + $0x38] sm:$0xff]   ;;  %s7992_s16 = scalar_lea.vmem %s8083_s11, %s6277_s26 }
 0x386   : > { %v2692_v56 = vadd.f32 %v2682_v48, %v2661_v7  ;;  %v6124_v48 = vld [vmem:[%s8080_s8 + $0x30] sm:$0xff]   ;;  %v542_v3 = vpack.c.bf16 %v535_v50, %v534_v12  ;;  %v6156_v2 = vld [vmem:[%s8078_s6 + $0x40] sm:$0xff]   ;;  %v6157_v7 = vld [vmem:[%s8078_s6 + $0x48] sm:$0xff]  }
 0x387   : > { %v2663_v8 = vsel %vm929_vm3, %v2660_v45, %v2662_v53  ;;  %v2674_v19 = vsel %vm929_vm3, %v2662_v53, 0.0  ;;  %v6152_v45 = vld [vmem:[%s8078_s6 + $0x10] sm:$0xff]   ;;  %v6159_v53 = vld [vmem:[%s8078_s6 + $0x58] sm:$0xff]  }
 0x388   : > { %v2702_v23 = vsel %vm6607_vm11, %v2692_v56, 0.0  ;;  %v2693_v40 = vadd.f32 %v2683_v15, %v2663_v8  ;;  %v2694_v25 = vadd.f32 %v2684_v42, %v2674_v19  ;;  %v6151_v15 = vld [vmem:[%s8078_s6 + $0x28] sm:$0xff]   ;;  %v6158_v42 = vld [vmem:[%s8078_s6 + $0x50] sm:$0xff]  }
 0x389   : > { %v2708_v4 = vpack.c.bf16 %v2702_v23, %v2701_v63 }
 0x38a   : > { %v2703_v39 = vsel %vm6631_vm12, %v2693_v40, 0.0  ;;  %v2704_v30 = vsel %vm6635_vm13, %v2694_v25, 0.0 }
 0x38b   : > { %v7408_v44 = vpack.c.bf16 %v2704_v30, %v2703_v39  ;;  %5561 = vmatmul.mubr.msk.bf16.gmra.mrb[164].mxu1 %vm577_vm1, %v2708_v4  ;;  %5589 = vmatmul.mubr.msk.bf16.gmra.mrb[140].mxu0 %vm577_vm1, %v2708_v4 }
 0x38c   : > { %5564 = vmatprep.mubr.msk.bf16.mxu1 %vm8106_vm0, %v6178_v1  ;;  %5592 = vmatprep.mubr.msk.bf16.mxu0 %vm8106_vm0, %v6178_v1 }
 0x393   : > { %5565 = vmatmul.mubr.msk.bf16.gmra.mrb[168].mxu1 %vm577_vm1, %v7408_v44  ;;  %5593 = vmatmul.mubr.msk.bf16.gmra.mrb[144].mxu0 %vm577_vm1, %v7408_v44 }
 0x394   : > { %5604 = vmatprep.mubr.msk.bf16.mxu1 %vm8106_vm0, %v6178_v1  ;;  %5632 = vmatprep.mubr.msk.bf16.mxu0 %vm8106_vm0, %v6178_v1 }
 0x39b   : > { %5605 = vmatmul.mubr.msk.bf16.vlgmr.msra.gmra.mrb[172].mxu1 %vm577_vm1, %v7320_v13  ;;  %5633 = vmatmul.mubr.msk.bf16.vlgmr.msra.gmra.mrb[148].mxu0 %vm577_vm1, %v540_v20  ;;  %v6123_v13 = vld [vmem:[%s8080_s8 + $0x28] sm:$0xff]  }
 0x39c   : > { %5681 = vmatpush3.bf16.msra.mxu1 %v6118_v55  ;;  %5608 = vmatprep.mubr.msk.bf16.mxu1 %vm8106_vm0, %v6178_v1 }
 0x39d   : > { %5636 = vmatprep.mubr.msk.bf16.mxu0 %vm8106_vm0, %v6178_v1  ;;  %5682 = vmatprep.subr.bf16.mxu1 %v6178_v1 }
 0x39e   : > { %5653 = vmatpush3.bf16.msra.mxu0 %v6121_v33 }
 0x39f   : > { %5654 = vmatprep.subr.bf16.mxu0 %v6178_v1 }
 0x3a0   : > { %5683 = vmatpush3.bf16.msra.mxu1 %v6119_v28 }
 0x3a1   : > { %5684 = vmatprep.subr.bf16.mxu1 %v6178_v1 }
 0x3a2   : > { %5655 = vmatpush3.bf16.msra.mxu0 %v6123_v13 }
 0x3a3   : > { %5609 = vmatmul.mubr.msk.bf16.gmra.mrb[176].mxu1 %vm577_vm1, %v7349_v11  ;;  %5637 = vmatmul.mubr.msk.bf16.gmra.mrb[152].mxu0 %vm577_vm1, %v541_v61  ;;  %v6125_v11 = vld [vmem:[%s8080_s8 + $0x38] sm:$0xff]  }
 0x3a4   : > { %5612 = vmatprep.mubr.msk.bf16.mxu1 %vm8106_vm0, %v6178_v1  ;;  %5640 = vmatprep.mubr.msk.bf16.mxu0 %vm8106_vm0, %v6178_v1 }
 0x3a5   : > { %5685 = vmatpush3.bf16.msra.mxu1 %v6120_v17  ;;  %5656 = vmatprep.subr.bf16.mxu0 %v6178_v1 }
 0x3a6   : > { %5686 = vmatprep.subr.bf16.mxu1 %v6178_v1  ;;  %5657 = vmatpush3.bf16.msra.mxu0 %v6124_v48 }
 0x3a7   : > { %5658 = vmatprep.subr.bf16.mxu0 %v6178_v1 }
 0x3a9   : > { %5687 = vmatpush3.bf16.msra.mxu1 %v6122_v51 }
 0x3aa   : > { %5659 = vmatpush3.bf16.msra.mxu0 %v6125_v11  ;;  %5708 = vmatprep.subr.bf16.mxu1 %v6178_v1  ;;  %v6128_v11 = vld [vmem:[%s8081_s9 + $0x10] sm:$0xff]  }
 0x3ab   : > { %5613 = vmatmul.mubr.msk.bf16.gmra.mrb[180].mxu1 %vm577_vm1, %v7383_v16  ;;  %5641 = vmatmul.mubr.msk.bf16.gmra.mrb[156].mxu0 %vm577_vm1, %v542_v3  ;;  %v6148_v16 = vld [vmem:[%s8078_s6] sm:$0xff]  }
 0x3ac   : > { %5616 = vmatprep.mubr.msk.bf16.mxu1 %vm8106_vm0, %v6178_v1  ;;  %5644 = vmatprep.mubr.msk.bf16.mxu0 %vm8106_vm0, %v6178_v1 }
 0x3ad   : > { %5736 = vmatprep.subr.bf16.mxu0 %v6178_v1 }
 0x3b3   : > { %5617 = vmatmul.mubr.msk.bf16.gmra.mrb[184].mxu1 %vm577_vm1, %v2708_v4  ;;  %5645 = vmatmul.mubr.msk.bf16.gmra.mrb[160].mxu0 %vm577_vm1, %v543_v0  ;;  %v6126_v4 = vld [vmem:[%s8081_s9] sm:$0xff]  }
 0x3b4   : > { %5620 = vmatprep.mubr.msk.bf16.mxu1 %vm8106_vm0, %v6178_v1  ;;  %5648 = vmatprep.mubr.msk.bf16.mxu0 %vm8106_vm0, %v6178_v1 }
 0x3bb   : > { %5621 = vmatmul.mubr.msk.bf16.gmra.mrb[188].mxu1 %vm577_vm1, %v7408_v44  ;;  %5649 = vmatmul.mubr.msk.bf16.gmra.mrb[164].mxu0 %vm577_vm1, %v544_v26 }
 0x3bc   : > { %5688 = vmatprep.mubr.msk.bf16.mxu1 %vm8106_vm0, %v6178_v1  ;;  %5660 = vmatprep.mubr.msk.bf16.mxu0 %vm8106_vm0, %v6178_v1 }
 0x3c3   : > { %5689 = vmatmul.mubr.msk.bf16.vlgmr.msra.gmra.mrb[192].mxu1 %vm577_vm1, %v540_v20  ;;  %5661 = vmatmul.mubr.msk.bf16.vlgmr.msra.gmra.mrb[128].mxu0 %vm577_vm1, %v540_v20 }
 0x3c4   : > { %5709 = vmatpush3.bf16.msra.mxu1 %v6148_v16  ;;  %5692 = vmatprep.mubr.msk.bf16.mxu1 %vm8106_vm0, %v6178_v1 }
 0x3c5   : > { %5664 = vmatprep.mubr.msk.bf16.mxu0 %vm8106_vm0, %v6178_v1  ;;  %5710 = vmatprep.subr.bf16.mxu1 %v6178_v1 }
 0x3c6   : > { %5737 = vmatpush3.bf16.msra.mxu0 %v6149_v18 }
 0x3c7   : > { %5738 = vmatprep.subr.bf16.mxu0 %v6178_v1 }
 0x3c8   : > { %5711 = vmatpush3.bf16.msra.mxu1 %v6150_v54  ;;  %v6130_v54 = vld [vmem:[%s8081_s9 + $0x48] sm:$0xff]  }
 0x3c9   : > { %5712 = vmatprep.subr.bf16.mxu1 %v6178_v1 }
 0x3ca   : > { %5739 = vmatpush3.bf16.msra.mxu0 %v6151_v15 }
 0x3cb   : > { %5693 = vmatmul.mubr.msk.bf16.gmra.mrb[196].mxu1 %vm577_vm1, %v541_v61  ;;  %5665 = vmatmul.mubr.msk.bf16.gmra.mrb[132].mxu0 %vm577_vm1, %v541_v61 }
 0x3cc   : > { %5696 = vmatprep.mubr.msk.bf16.mxu1 %vm8106_vm0, %v6178_v1  ;;  %5668 = vmatprep.mubr.msk.bf16.mxu0 %vm8106_vm0, %v6178_v1 }
 0x3cd   : > { %5713 = vmatpush3.bf16.msra.mxu1 %v6152_v45  ;;  %5740 = vmatprep.subr.bf16.mxu0 %v6178_v1 }
 0x3ce   : > { %5714 = vmatprep.subr.bf16.mxu1 %v6178_v1  ;;  %5741 = vmatpush3.bf16.msra.mxu0 %v6153_v37 }
 0x3cf   : > { %5742 = vmatprep.subr.bf16.mxu0 %v6178_v1 }
 0x3d1   : > { %5715 = vmatpush3.bf16.msra.mxu1 %v6154_v43 }
 0x3d2   : > { %5743 = vmatpush3.bf16.msra.mxu0 %v6155_v35  ;;  %5764 = vmatprep.subr.bf16.mxu1 %v6178_v1 }
 0x3d3   : > { %5697 = vmatmul.mubr.msk.bf16.gmra.mrb[200].mxu1 %vm577_vm1, %v542_v3  ;;  %5669 = vmatmul.mubr.msk.bf16.gmra.mrb[136].mxu0 %vm577_vm1, %v542_v3 }
 0x3d4   : > { %5700 = vmatprep.mubr.msk.bf16.mxu1 %vm8106_vm0, %v6178_v1  ;;  %5672 = vmatprep.mubr.msk.bf16.mxu0 %vm8106_vm0, %v6178_v1 }
 0x3d5   : > { %5792 = vmatprep.subr.bf16.mxu0 %v6178_v1 }
 0x3db   : > { %5701 = vmatmul.mubr.msk.bf16.gmra.mrb[204].mxu1 %vm577_vm1, %v543_v0  ;;  %5673 = vmatmul.mubr.msk.bf16.gmra.mrb[140].mxu0 %vm577_vm1, %v543_v0 }
 0x3dc   : > { %5704 = vmatprep.mubr.msk.bf16.mxu1 %vm8106_vm0, %v6178_v1  ;;  %5676 = vmatprep.mubr.msk.bf16.mxu0 %vm8106_vm0, %v6178_v1 }
 0x3e3   : > { %5705 = vmatmul.mubr.msk.bf16.gmra.mrb[208].mxu1 %vm577_vm1, %v544_v26  ;;  %5677 = vmatmul.mubr.msk.bf16.gmra.mrb[144].mxu0 %vm577_vm1, %v544_v26 }
 0x3e4   : > { %5716 = vmatprep.mubr.msk.bf16.mxu1 %vm8106_vm0, %v6178_v1  ;;  %5744 = vmatprep.mubr.msk.bf16.mxu0 %vm8106_vm0, %v6178_v1 }
 0x3eb   : > { %5717 = vmatmul.mubr.msk.bf16.vlgmr.msra.gmra.mrb[212].mxu1 %vm577_vm1, %v6298_v9  ;;  %5745 = vmatmul.mubr.msk.bf16.vlgmr.msra.gmra.mrb[168].mxu0 %vm577_vm1, %v6298_v9 }
 0x3ec   : > { %5765 = vmatpush3.bf16.msra.mxu1 %v6156_v2  ;;  %5720 = vmatprep.mubr.msk.bf16.mxu1 %vm8106_vm0, %v6178_v1 }
 0x3ed   : > { %5748 = vmatprep.mubr.msk.bf16.mxu0 %vm8106_vm0, %v6178_v1  ;;  %5766 = vmatprep.subr.bf16.mxu1 %v6178_v1 }
 0x3ee   : > { %5793 = vmatpush3.bf16.msra.mxu0 %v6126_v4  ;;  %v6133_v4 = vld [vmem:[%s8081_s9 + $0x58] sm:$0xff]  }
 0x3ef   : > { %5794 = vmatprep.subr.bf16.mxu0 %v6178_v1 }
 0x3f0   : > { %5767 = vmatpush3.bf16.msra.mxu1 %v6157_v7 }
 0x3f1   : > { %5768 = vmatprep.subr.bf16.mxu1 %v6178_v1 }
 0x3f2   : > { %5795 = vmatpush3.bf16.msra.mxu0 %v6127_v29 }
 0x3f3   : > { %5721 = vmatmul.mubr.msk.bf16.gmra.mrb[216].mxu1 %vm577_vm1, %v6352_v21  ;;  %5749 = vmatmul.mubr.msk.bf16.gmra.mrb[172].mxu0 %vm577_vm1, %v6352_v21 }
 0x3f4   : > { %5724 = vmatprep.mubr.msk.bf16.mxu1 %vm8106_vm0, %v6178_v1  ;;  %5752 = vmatprep.mubr.msk.bf16.mxu0 %vm8106_vm0, %v6178_v1 }
 0x3f5   : > { %5769 = vmatpush3.bf16.msra.mxu1 %v6158_v42  ;;  %5796 = vmatprep.subr.bf16.mxu0 %v6178_v1  ;;  %v6132_v42 = vld [vmem:[%s8081_s9 + $0x50] sm:$0xff]  }
 0x3f6   : > { %5770 = vmatprep.subr.bf16.mxu1 %v6178_v1  ;;  %5797 = vmatpush3.bf16.msra.mxu0 %v6128_v11 }
 0x3f7   : > { %5798 = vmatprep.subr.bf16.mxu0 %v6178_v1 }
 0x3f9   : > { %5771 = vmatpush3.bf16.msra.mxu1 %v6159_v53 }
 0x3fa   : > { %5848 = vmatprep.subr.bf16.mxu1 %v6178_v1 }
 0x3fb   : > { %5725 = vmatmul.mubr.msk.bf16.gmra.mrb[220].mxu1 %vm577_vm1, %v6300_v10  ;;  %5753 = vmatmul.mubr.msk.bf16.gmra.mrb[176].mxu0 %vm577_vm1, %v6300_v10 }
 0x3fc   : > { %5728 = vmatprep.mubr.msk.bf16.mxu1 %vm8106_vm0, %v6178_v1  ;;  %5756 = vmatprep.mubr.msk.bf16.mxu0 %vm8106_vm0, %v6178_v1 }
 0x403   : > { %5729 = vmatmul.mubr.msk.bf16.gmra.mrb[224].mxu1 %vm577_vm1, %v6354_v22  ;;  %5757 = vmatmul.mubr.msk.bf16.gmra.mrb[180].mxu0 %vm577_vm1, %v6354_v22 }
 0x404   : > { %5732 = vmatprep.mubr.msk.bf16.mxu1 %vm8106_vm0, %v6178_v1  ;;  %5760 = vmatprep.mubr.msk.bf16.mxu0 %vm8106_vm0, %v6178_v1 }
 0x40b   : > { %5733 = vmatmul.mubr.msk.bf16.gmra.mrb[228].mxu1 %vm577_vm1, %v6384_v27  ;;  %5761 = vmatmul.mubr.msk.bf16.gmra.mrb[184].mxu0 %vm577_vm1, %v6384_v27 }
 0x40c   : > { %5772 = vmatprep.mubr.msk.bf16.mxu1 %vm8106_vm0, %v6178_v1  ;;  %5800 = vmatprep.mubr.msk.bf16.mxu0 %vm8106_vm0, %v6178_v1 }
 0x413   : > { %5773 = vmatmul.mubr.msk.bf16.vlgmr.msra.gmra.mrb[232].mxu1 %vm577_vm1, %v6298_v9 }
 0x414   : > { %5776 = vmatprep.mubr.msk.bf16.mxu1 %vm8106_vm0, %v6178_v1  ;;  %5849 = vmatpush3.bf16.msra.mxu1 %v6129_v5 }
 0x415   : > { %5850 = vmatprep.subr.bf16.mxu1 %v6178_v1 }
 0x418   : > { %5851 = vmatpush3.bf16.msra.mxu1 %v6130_v54 }
 0x419   : > { %5852 = vmatprep.subr.bf16.mxu1 %v6178_v1 }
 0x41b   : > { %5777 = vmatmul.mubr.msk.bf16.gmra.mrb[236].mxu1 %vm577_vm1, %v6352_v21 }
 0x41c   : > { %5780 = vmatprep.mubr.msk.bf16.mxu1 %vm8106_vm0, %v6178_v1  ;;  %5853 = vmatpush3.bf16.msra.mxu1 %v6132_v42 }
 0x41d   : > { %5854 = vmatprep.subr.bf16.mxu1 %v6178_v1 }
 0x420   : > { %5855 = vmatpush3.bf16.msra.mxu1 %v6133_v4 }
 0x423   : > { %5781 = vmatmul.mubr.msk.bf16.gmra.mrb[240].mxu1 %vm577_vm1, %v6300_v10 }
 0x424   : > { %5784 = vmatprep.mubr.msk.bf16.mxu1 %vm8106_vm0, %v6178_v1 }
 0x42b   : > { %5785 = vmatmul.mubr.msk.bf16.gmra.mrb[244].mxu1 %vm577_vm1, %v6354_v22 }
 0x42c   : > { %5788 = vmatprep.mubr.msk.bf16.mxu1 %vm8106_vm0, %v6178_v1 }
 0x433   : > { %5789 = vmatmul.mubr.msk.bf16.gmra.mrb[248].mxu1 %vm577_vm1, %v6384_v27 }
 0x434   : > { %5856 = vmatprep.mubr.msk.bf16.mxu1 %vm8106_vm0, %v6178_v1 }
 0x446   : > { %v7644_v9 = vpop.f32.mrb[152].mxu1 }
 0x447   : > { %v5550_v21 = vpop.f32.mrb[153].mxu1  ;;  %v3052_v10 = vrot.slane %v7644_v9, 7 }
 0x448   : > { %v2794_v47 = vpop.f32.mrb[154].mxu1 }
 0x449   : > { %v3053_v52 = vrot.slane %v2794_v47, 7  ;;  %v5551_v56 = vpop.f32.mrb[155].mxu1 }
 0x44b   : > { %v7650_v22 = vsel %vm888_vm2, %v3052_v10, %v3053_v52 }
 0x44e   : > { %v2799_v8 = vpop.f32.mrb[156].mxu1 }
 0x44f   : > { %v3055_v19 = vrot.slane %v2799_v8, 7  ;;  %v5554_v63 = vpop.f32.mrb[157].mxu1  ;;  %v3081_v8 = vsel %vm888_vm2, 0.0, %v3052_v10 }
 0x450   : > { %v2802_v27 = vpop.f32.mrb[158].mxu1 }
 0x451   : > { %v7653_v23 = vsel %vm888_vm2, %v3053_v52, %v3055_v19  ;;  %v3057_v40 = vrot.slane %v2802_v27, 7  ;;  %v5555_v25 = vpop.f32.mrb[159].mxu1 }
 0x452   : > { %v6131_v25 = vld [vmem:[%s8081_s9 + $0x18] sm:$0xff]  }
 0x453   : > { %v7659_v39 = vsel %vm888_vm2, %v3055_v19, %v3057_v40  ;;  %5799 = vmatpush3.bf16.msra.mxu0 %v6131_v25 }
 0x454   : > { %5820 = vmatprep.subr.bf16.mxu0 %v6178_v1 }
 0x456   : > { %v2807_v30 = vpop.f32.mrb[160].mxu1 }
 0x457   : > { %v3059_v44 = vrot.slane %v2807_v30, 7  ;;  %v5558_v14 = vpop.f32.mrb[161].mxu1 }
 0x458   : > { %v2810_v6 = vpop.f32.mrb[162].mxu1 }
 0x459   : > { %v7663_v20 = vsel %vm888_vm2, %v3057_v40, %v3059_v44  ;;  %v3061_v55 = vrot.slane %v2810_v6, 7  ;;  %v5559_v33 = vpop.f32.mrb[163].mxu1 }
 0x45b   : > { %v7669_v24 = vsel %vm888_vm2, %v3059_v44, %v3061_v55 }
 0x45e   : > { %v2815_v28 = vpop.f32.mrb[164].mxu1 }
 0x45f   : > { %v3063_v13 = vrot.slane %v2815_v28, 7  ;;  %v5562_v61 = vpop.f32.mrb[165].mxu1 }
 0x460   : > { %v2818_v17 = vpop.f32.mrb[166].mxu1 }
 0x461   : > { %v7673_v48 = vsel %vm888_vm2, %v3061_v55, %v3063_v13  ;;  %v3065_v12 = vrot.slane %v2818_v17, 7  ;;  %v5563_v50 = vpop.f32.mrb[167].mxu1 }
 0x463   : > { %v7676_v51 = vsel %vm888_vm2, %v3063_v13, %v3065_v12 }
 0x466   : > { %v2823_v3 = vpop.f32.mrb[168].mxu1 }
 0x467   : > { %v3067_v49 = vrot.slane %v2823_v3, 7  ;;  %v5566_v57 = vpop.f32.mrb[169].mxu1 }
 0x468   : > { %v2826_v0 = vpop.f32.mrb[170].mxu1 }
 0x469   : > { %v7686_v41 = vsel %vm888_vm2, %v3065_v12, %v3067_v49  ;;  %v3069_v26 = vrot.slane %v2826_v0, 7  ;;  %v5567_v16 = vpop.f32.mrb[171].mxu1 }
 0x46b   : > { %v7689_v18 = vsel %vm888_vm2, %v3067_v49, %v3069_v26 }
 0x46e   : > { %v3003_v15 = vpop.f32.mrb[172].mxu1  ;;  %v3223_v45 = vpop.f32.mrb[148].mxu0 }
 0x46f   : > { %v5606_v37 = vpop.f32.mrb[173].mxu1  ;;  %v3484_v43 = vrot.slane %v3223_v45, 7  ;;  %v5634_v35 = vpop.f32.mrb[149].mxu0  ;;  %v3092_v53 = vrot.slane %v3003_v15, 1 }
 0x470   : > { %v3006_v2 = vpop.f32.mrb[174].mxu1  ;;  %v3226_v7 = vpop.f32.mrb[150].mxu0 }
 0x471   : > { %v3093_v21 = vrot.slane %v3006_v2, 1  ;;  %v5607_v47 = vpop.f32.mrb[175].mxu1  ;;  %v3485_v52 = vrot.slane %v3226_v7, 7  ;;  %v5635_v56 = vpop.f32.mrb[151].mxu0  ;;  %v3513_v63 = vsel %vm888_vm2, 0.0, %v3484_v43 }
 0x473   : > { %v3094_v19 = vsel %vm929_vm3, %v3092_v53, %v3093_v21  ;;  %v3486_v27 = vsel %vm888_vm2, %v3484_v43, %v3485_v52 }
 0x474   : > { %v5924_v40 = vadd.f32 %v3094_v19, %v3081_v8 }
 0x476   : > { %v7712_v9 = vadd.f32 %v5924_v40, %v3513_v63  ;;  %v3011_v10 = vpop.f32.mrb[176].mxu1  ;;  %v3231_v30 = vpop.f32.mrb[152].mxu0 }
 0x477   : > { %v3095_v44 = vrot.slane %v3011_v10, 1  ;;  %v5610_v14 = vpop.f32.mrb[177].mxu1  ;;  %v3487_v6 = vrot.slane %v3231_v30, 7  ;;  %v5638_v55 = vpop.f32.mrb[153].mxu0 }
 0x478   : > { %v3014_v33 = vpop.f32.mrb[178].mxu1  ;;  %v3234_v29 = vpop.f32.mrb[154].mxu0 }
 0x479   : > { %v3096_v28 = vsel %vm929_vm3, %v3093_v21, %v3095_v44  ;;  %v3097_v13 = vrot.slane %v3014_v33, 1  ;;  %v5611_v61 = vpop.f32.mrb[179].mxu1  ;;  %v3488_v17 = vsel %vm888_vm2, %v3485_v52, %v3487_v6  ;;  %v3489_v12 = vrot.slane %v3234_v29, 7  ;;  %v5639_v50 = vpop.f32.mrb[155].mxu0 }
 0x47a   : > { %v5930_v11 = vadd.f32 %v3096_v28, %v7650_v22 }
 0x47b   : > { %v3098_v3 = vsel %vm929_vm3, %v3095_v44, %v3097_v13  ;;  %v3490_v49 = vsel %vm888_vm2, %v3487_v6, %v3489_v12 }
 0x47c   : > { %v5936_v57 = vadd.f32 %v3098_v3, %v7653_v23  ;;  %v7721_v0 = vadd.f32 %v5930_v11, %v3486_v27 }
 0x47e   : > { %v3019_v5 = vpop.f32.mrb[180].mxu1  ;;  %v3239_v26 = vpop.f32.mrb[156].mxu0  ;;  %v7723_v16 = vadd.f32 %v5936_v57, %v3488_v17 }
 0x47f   : > { %v3099_v54 = vrot.slane %v3019_v5, 1  ;;  %v5614_v15 = vpop.f32.mrb[181].mxu1  ;;  %v3491_v45 = vrot.slane %v3239_v26, 7  ;;  %v5642_v37 = vpop.f32.mrb[157].mxu0 }
 0x480   : > { %v3022_v43 = vpop.f32.mrb[182].mxu1  ;;  %v3242_v35 = vpop.f32.mrb[158].mxu0 }
 0x481   : > { %v3100_v22 = vsel %vm929_vm3, %v3097_v13, %v3099_v54  ;;  %v3101_v2 = vrot.slane %v3022_v43, 1  ;;  %v5615_v7 = vpop.f32.mrb[183].mxu1  ;;  %v3492_v42 = vsel %vm888_vm2, %v3489_v12, %v3491_v45  ;;  %v3493_v53 = vrot.slane %v3242_v35, 7  ;;  %v5643_v23 = vpop.f32.mrb[159].mxu0 }
 0x482   : > { %v5942_v21 = vadd.f32 %v3100_v22, %v7659_v39 }
 0x483   : > { %v3102_v47 = vsel %vm929_vm3, %v3099_v54, %v3101_v2  ;;  %v3494_v52 = vsel %vm888_vm2, %v3491_v45, %v3493_v53 }
 0x484   : > { %v5948_v56 = vadd.f32 %v3102_v47, %v7663_v20  ;;  %v7731_v8 = vadd.f32 %v5942_v21, %v3490_v49 }
 0x486   : > { %v3027_v19 = vpop.f32.mrb[184].mxu1  ;;  %v3247_v63 = vpop.f32.mrb[160].mxu0  ;;  %v7733_v27 = vadd.f32 %v5948_v56, %v3492_v42 }
 0x487   : > { %v3103_v40 = vrot.slane %v3027_v19, 1  ;;  %v5618_v25 = vpop.f32.mrb[185].mxu1  ;;  %v3495_v4 = vrot.slane %v3247_v63, 7  ;;  %v5646_v10 = vpop.f32.mrb[161].mxu0 }
 0x488   : > { %v3030_v30 = vpop.f32.mrb[186].mxu1  ;;  %v3250_v44 = vpop.f32.mrb[162].mxu0 }
 0x489   : > { %v3104_v39 = vsel %vm929_vm3, %v3101_v2, %v3103_v40  ;;  %v3105_v14 = vrot.slane %v3030_v30, 1  ;;  %v5619_v6 = vpop.f32.mrb[187].mxu1  ;;  %v3496_v55 = vsel %vm888_vm2, %v3493_v53, %v3495_v4  ;;  %v3497_v33 = vrot.slane %v3250_v44, 7  ;;  %v5647_v20 = vpop.f32.mrb[163].mxu0 }
 0x48a   : > { %v5954_v29 = vadd.f32 %v3104_v39, %v7669_v24 }
 0x48b   : > { %v3106_v28 = vsel %vm929_vm3, %v3103_v40, %v3105_v14  ;;  %v3498_v13 = vsel %vm888_vm2, %v3495_v4, %v3497_v33 }
 0x48c   : > { %v5960_v61 = vadd.f32 %v3106_v28, %v7673_v48  ;;  %v5955_v17 = vadd.f32 %v5954_v29, %v3494_v52 }
 0x48e   : > { %v3035_v12 = vpop.f32.mrb[188].mxu1  ;;  %v3255_v50 = vpop.f32.mrb[164].mxu0  ;;  %v5961_v11 = vadd.f32 %v5960_v61, %v3496_v55 }
 0x48f   : > { %v3107_v3 = vrot.slane %v3035_v12, 1  ;;  %v5622_v49 = vpop.f32.mrb[189].mxu1  ;;  %v3499_v57 = vrot.slane %v3255_v50, 7  ;;  %v5650_v5 = vpop.f32.mrb[165].mxu0 }
 0x490   : > { %v3038_v26 = vpop.f32.mrb[190].mxu1  ;;  %v3258_v54 = vpop.f32.mrb[166].mxu0 }
 0x491   : > { %v3108_v15 = vsel %vm929_vm3, %v3105_v14, %v3107_v3  ;;  %v3109_v45 = vrot.slane %v3038_v26, 1  ;;  %v3500_v24 = vsel %vm888_vm2, %v3497_v33, %v3499_v57  ;;  %v5623_v37 = vpop.f32.mrb[191].mxu1  ;;  %v3501_v43 = vrot.slane %v3258_v54, 7  ;;  %v5651_v35 = vpop.f32.mrb[167].mxu0 }
 0x492   : > { %v5966_v48 = vadd.f32 %v3108_v15, %v7676_v51 }
 0x493   : > { %v3110_v22 = vsel %vm929_vm3, %v3107_v3, %v3109_v45  ;;  %v3121_v2 = vsel %vm929_vm3, %v3109_v45, 0.0  ;;  %v3502_v7 = vsel %vm888_vm2, %v3499_v57, %v3501_v43 }
 0x494   : > { %v5972_v42 = vadd.f32 %v3110_v22, %v7686_v41  ;;  %v5978_v53 = vadd.f32 %v3121_v2, %v7689_v18  ;;  %v5967_v23 = vadd.f32 %v5966_v48, %v3498_v13 }
 0x496   : > { %v3435_v21 = vpop.f32.mrb[192].mxu1  ;;  %v5973_v47 = vadd.f32 %v5972_v42, %v3500_v24  ;;  %v5979_v52 = vadd.f32 %v5978_v53, %v3502_v7 }
 0x497   : > { %v5690_v56 = vpop.f32.mrb[193].mxu1  ;;  %v3524_v63 = vrot.slane %v3435_v21, 1 }
 0x498   : > { %v3438_v19 = vpop.f32.mrb[194].mxu1 }
 0x499   : > { %v3525_v40 = vrot.slane %v3438_v19, 1  ;;  %v5691_v25 = vpop.f32.mrb[195].mxu1 }
 0x49b   : > { %v3526_v51 = vsel %vm929_vm3, %v3524_v63, %v3525_v40 }
 0x49c   : > { %v7751_v4 = vadd.f32 %v7712_v9, %v3526_v51 }
 0x49e   : > { %v3443_v10 = vpop.f32.mrb[196].mxu1 }
 0x49f   : > { %v3527_v30 = vrot.slane %v3443_v10, 1  ;;  %v5694_v44 = vpop.f32.mrb[197].mxu1 }
 0x4a0   : > { %v3446_v41 = vpop.f32.mrb[198].mxu1 }
 0x4a1   : > { %v3529_v39 = vrot.slane %v3446_v41, 1  ;;  %v5695_v18 = vpop.f32.mrb[199].mxu1  ;;  %v3528_v14 = vsel %vm929_vm3, %v3525_v40, %v3527_v30 }
 0x4a2   : > { %v7755_v6 = vadd.f32 %v7721_v0, %v3528_v14 }
 0x4a3   : > { %v3530_v55 = vsel %vm929_vm3, %v3527_v30, %v3529_v39 }
 0x4a4   : > { %v7759_v33 = vadd.f32 %v7723_v16, %v3530_v55 }
 0x4a6   : > { %v3451_v20 = vpop.f32.mrb[200].mxu1 }
 0x4a7   : > { %v3531_v29 = vrot.slane %v3451_v20, 1  ;;  %v5698_v9 = vpop.f32.mrb[201].mxu1 }
 0x4a8   : > { %v3454_v28 = vpop.f32.mrb[202].mxu1 }
 0x4a9   : > { %v3533_v13 = vrot.slane %v3454_v28, 1  ;;  %v5699_v61 = vpop.f32.mrb[203].mxu1  ;;  %v3532_v12 = vsel %vm929_vm3, %v3529_v39, %v3531_v29 }
 0x4aa   : > { %v7763_v50 = vadd.f32 %v7731_v8, %v3532_v12 }
 0x4ab   : > { %v3534_v3 = vsel %vm929_vm3, %v3531_v29, %v3533_v13 }
 0x4ac   : > { %v7767_v0 = vadd.f32 %v7733_v27, %v3534_v3 }
 0x4ae   : > { %v3459_v49 = vpop.f32.mrb[204].mxu1 }
 0x4af   : > { %v3535_v57 = vrot.slane %v3459_v49, 1  ;;  %v5702_v16 = vpop.f32.mrb[205].mxu1 }
 0x4b0   : > { %v3462_v5 = vpop.f32.mrb[206].mxu1 }
 0x4b1   : > { %v3537_v26 = vrot.slane %v3462_v5, 1  ;;  %v5703_v54 = vpop.f32.mrb[207].mxu1  ;;  %v3536_v15 = vsel %vm929_vm3, %v3533_v13, %v3535_v57 }
 0x4b2   : > { %v7770_v45 = vadd.f32 %v5955_v17, %v3536_v15 }
 0x4b3   : > { %v3538_v24 = vsel %vm929_vm3, %v3535_v57, %v3537_v26 }
 0x4b4   : > { %v7773_v37 = vadd.f32 %v5961_v11, %v3538_v24 }
 0x4b6   : > { %v3467_v8 = vpop.f32.mrb[208].mxu1 }
 0x4b7   : > { %v3539_v43 = vrot.slane %v3467_v8, 1  ;;  %v5706_v35 = vpop.f32.mrb[209].mxu1 }
 0x4b8   : > { %v3470_v48 = vpop.f32.mrb[210].mxu1 }
 0x4b9   : > { %v3541_v27 = vrot.slane %v3470_v48, 1  ;;  %v5707_v22 = vpop.f32.mrb[211].mxu1  ;;  %v3540_v2 = vsel %vm929_vm3, %v3537_v26, %v3539_v43 }
 0x4ba   : > { %v7776_v7 = vadd.f32 %v5967_v23, %v3540_v2 }
 0x4bb   : > { %v3553_v42 = vsel %vm929_vm3, %v3541_v27, 0.0  ;;  %v3542_v53 = vsel %vm929_vm3, %v3539_v43, %v3541_v27 }
 0x4bc   : > { %v7780_v17 = vadd.f32 %v5973_v47, %v3542_v53  ;;  %v7782_v21 = vadd.f32 %v5979_v52, %v3553_v42 }
 0x4be   : > { %v3618_v11 = vpop.f32.mrb[212].mxu1  ;;  %v3691_v56 = vpop.f32.mrb[168].mxu0 }
 0x4bf   : > { %v3813_v19 = vrot.slane %v3618_v11, 7  ;;  %v5718_v63 = vpop.f32.mrb[213].mxu1  ;;  %v5746_v40 = vpop.f32.mrb[169].mxu0 }
 0x4c0   : > { %v3621_v25 = vpop.f32.mrb[214].mxu1  ;;  %v3694_v51 = vpop.f32.mrb[170].mxu0 }
 0x4c1   : > { %v3814_v10 = vrot.slane %v3621_v25, 7  ;;  %v5719_v30 = vpop.f32.mrb[215].mxu1  ;;  %v3842_v23 = vsel %vm888_vm2, 0.0, %v3813_v19  ;;  %v5747_v44 = vpop.f32.mrb[171].mxu0 }
 0x4c2   : > { %v7785_v41 = vadd.f32 %v3842_v23, %v3691_v56 }
 0x4c3   : > { %v3815_v39 = vsel %vm888_vm2, %v3813_v19, %v3814_v10 }
 0x4c4   : > { %v7788_v47 = vadd.f32 %v3815_v39, %v3694_v51 }
 0x4c6   : > { %v3626_v52 = vpop.f32.mrb[216].mxu1  ;;  %v3699_v18 = vpop.f32.mrb[172].mxu0 }
 0x4c7   : > { %v3816_v14 = vrot.slane %v3626_v52, 7  ;;  %v5722_v55 = vpop.f32.mrb[217].mxu1  ;;  %v5750_v20 = vpop.f32.mrb[173].mxu0 }
 0x4c8   : > { %v3629_v29 = vpop.f32.mrb[218].mxu1  ;;  %v3702_v9 = vpop.f32.mrb[174].mxu0 }
 0x4c9   : > { %v3818_v28 = vrot.slane %v3629_v29, 7  ;;  %v5723_v13 = vpop.f32.mrb[219].mxu1  ;;  %v3817_v61 = vsel %vm888_vm2, %v3814_v10, %v3816_v14  ;;  %v5751_v12 = vpop.f32.mrb[175].mxu0 }
 0x4ca   : > { %v7791_v3 = vadd.f32 %v3817_v61, %v3699_v18 }
 0x4cb   : > { %v3819_v49 = vsel %vm888_vm2, %v3816_v14, %v3818_v28 }
 0x4cc   : > { %v7794_v57 = vadd.f32 %v3819_v49, %v3702_v9 }
 0x4ce   : > { %v3634_v16 = vpop.f32.mrb[220].mxu1  ;;  %v3707_v5 = vpop.f32.mrb[176].mxu0 }
 0x4cf   : > { %v3820_v26 = vrot.slane %v3634_v16, 7  ;;  %v5726_v54 = vpop.f32.mrb[221].mxu1  ;;  %v5754_v15 = vpop.f32.mrb[177].mxu0 }
 0x4d0   : > { %v3637_v24 = vpop.f32.mrb[222].mxu1  ;;  %v3710_v8 = vpop.f32.mrb[178].mxu0 }
 0x4d1   : > { %v3822_v43 = vrot.slane %v3637_v24, 7  ;;  %v5727_v35 = vpop.f32.mrb[223].mxu1  ;;  %v3821_v48 = vsel %vm888_vm2, %v3818_v28, %v3820_v26  ;;  %v5755_v27 = vpop.f32.mrb[179].mxu0 }
 0x4d2   : > { %v7797_v22 = vadd.f32 %v3821_v48, %v3707_v5 }
 0x4d3   : > { %v3823_v2 = vsel %vm888_vm2, %v3820_v26, %v3822_v43 }
 0x4d4   : > { %v7800_v42 = vadd.f32 %v3823_v2, %v3710_v8 }
 0x4d6   : > { %v3642_v53 = vpop.f32.mrb[224].mxu1  ;;  %v3715_v11 = vpop.f32.mrb[180].mxu0 }
 0x4d7   : > { %v3824_v56 = vrot.slane %v3642_v53, 7  ;;  %v5730_v19 = vpop.f32.mrb[225].mxu1  ;;  %v5758_v63 = vpop.f32.mrb[181].mxu0 }
 0x4d8   : > { %v3645_v40 = vpop.f32.mrb[226].mxu1  ;;  %v3718_v25 = vpop.f32.mrb[182].mxu0 }
 0x4d9   : > { %v3826_v51 = vrot.slane %v3645_v40, 7  ;;  %v5731_v10 = vpop.f32.mrb[227].mxu1  ;;  %v3825_v30 = vsel %vm888_vm2, %v3822_v43, %v3824_v56  ;;  %v5759_v23 = vpop.f32.mrb[183].mxu0 }
 0x4da   : > { %v7803_v44 = vadd.f32 %v3825_v30, %v3715_v11  ;;  %v6134_v23 = vld [vmem:[%s8081_s9 + $0x20] sm:$0xff]  }
 0x4db   : > { %v3827_v39 = vsel %vm888_vm2, %v3824_v56, %v3826_v51 }
 0x4dc   : > { %v7806_v52 = vadd.f32 %v3827_v39, %v3718_v25 }
 0x4de   : > { %v3650_v18 = vpop.f32.mrb[228].mxu1  ;;  %v3723_v14 = vpop.f32.mrb[184].mxu0 }
 0x4df   : > { %v3828_v55 = vrot.slane %v3650_v18, 7  ;;  %v5734_v20 = vpop.f32.mrb[229].mxu1  ;;  %v5762_v29 = vpop.f32.mrb[185].mxu0 }
 0x4e0   : > { %v3653_v9 = vpop.f32.mrb[230].mxu1  ;;  %v3726_v28 = vpop.f32.mrb[186].mxu0 }
 0x4e1   : > { %v3830_v13 = vrot.slane %v3653_v9, 7  ;;  %v5735_v61 = vpop.f32.mrb[231].mxu1  ;;  %v3829_v12 = vsel %vm888_vm2, %v3826_v51, %v3828_v55  ;;  %v5763_v49 = vpop.f32.mrb[187].mxu0 }
 0x4e2   : > { %v7809_v16 = vadd.f32 %v3829_v12, %v3723_v14 }
 0x4e3   : > { %v3831_v5 = vsel %vm888_vm2, %v3828_v55, %v3830_v13 }
 0x4e4   : > { %v7812_v26 = vadd.f32 %v3831_v5, %v3726_v28 }
 0x4e6   : > { %v3764_v54 = vpop.f32.mrb[232].mxu1 }
 0x4e7   : > { %v5774_v15 = vpop.f32.mrb[233].mxu1  ;;  %v3853_v8 = vrot.slane %v3764_v54, 1  ;;  %v6136_v54 = vld [vmem:[%s8081_s9 + $0x30] sm:$0xff]  }
 0x4e8   : > { %v3767_v24 = vpop.f32.mrb[234].mxu1 }
 0x4e9   : > { %v3854_v43 = vrot.slane %v3767_v24, 1  ;;  %v5775_v35 = vpop.f32.mrb[235].mxu1 }
 0x4eb   : > { %v3855_v48 = vsel %vm929_vm3, %v3853_v8, %v3854_v43 }
 0x4ec   : > { %v3893_v27 = vadd.f32 %v7785_v41, %v3855_v48  ;;  %v6137_v48 = vld [vmem:[%s8081_s9 + $0x38] sm:$0xff]  }
 0x4ee   : > { %v3772_v2 = vpop.f32.mrb[236].mxu1  ;;  %v3903_v10 = vsel %vm6496_vm4, %v3893_v27, 0.0 }
 0x4ef   : > { %v3856_v53 = vrot.slane %v3772_v2, 1  ;;  %v5778_v11 = vpop.f32.mrb[237].mxu1 }
 0x4f0   : > { %v3775_v56 = vpop.f32.mrb[238].mxu1 }
 0x4f1   : > { %v3857_v19 = vsel %vm929_vm3, %v3854_v43, %v3856_v53  ;;  %v3858_v63 = vrot.slane %v3775_v56, 1  ;;  %v5779_v40 = vpop.f32.mrb[239].mxu1 }
 0x4f2   : > { %v3894_v25 = vadd.f32 %v7788_v47, %v3857_v19 }
 0x4f3   : > { %v3859_v51 = vsel %vm929_vm3, %v3856_v53, %v3858_v63 }
 0x4f4   : > { %v3904_v30 = vsel %vm6500_vm5, %v3894_v25, 0.0  ;;  %v3895_v41 = vadd.f32 %v7791_v3, %v3859_v51  ;;  %v6135_v3 = vld [vmem:[%s8081_s9 + $0x28] sm:$0xff]  }
 0x4f5   : > { %v7827_v39 = vpack.c.bf16 %v3904_v30, %v3903_v10 }
 0x4f6   : > { %v3780_v18 = vpop.f32.mrb[240].mxu1  ;;  %v3905_v61 = vsel %vm6525_vm6, %v3895_v41, 0.0 }
 0x4f7   : > { %v3860_v14 = vrot.slane %v3780_v18, 1  ;;  %v5782_v55 = vpop.f32.mrb[241].mxu1  ;;  %5801 = vmatmul.mubr.msk.bf16.vlgmr.msra.gmra.mrb[188].mxu0 %vm577_vm1, %v7827_v39  ;;  %5857 = vmatmul.mubr.msk.bf16.vlgmr.msra.gmra.mrb[252].mxu1 %vm577_vm1, %v7827_v39 }
 0x4f8   : > { %v3783_v47 = vpop.f32.mrb[242].mxu1  ;;  %5821 = vmatpush3.bf16.msra.mxu0 %v6134_v23  ;;  %5804 = vmatprep.mubr.msk.bf16.mxu0 %vm8106_vm0, %v6178_v1 }
 0x4f9   : > { %v3861_v20 = vsel %vm929_vm3, %v3858_v63, %v3860_v14  ;;  %v3862_v29 = vrot.slane %v3783_v47, 1  ;;  %v5783_v9 = vpop.f32.mrb[243].mxu1  ;;  %5860 = vmatprep.mubr.msk.bf16.mxu1 %vm8106_vm0, %v6178_v1  ;;  %5822 = vmatprep.subr.bf16.mxu0 %v6178_v1 }
 0x4fa   : > { %v3896_v28 = vadd.f32 %v7794_v57, %v3861_v20 }
 0x4fb   : > { %v3863_v13 = vsel %vm929_vm3, %v3860_v14, %v3862_v29 }
 0x4fc   : > { %v3906_v12 = vsel %vm6529_vm7, %v3896_v28, 0.0  ;;  %v3897_v49 = vadd.f32 %v7797_v22, %v3863_v13  ;;  %5823 = vmatpush3.bf16.msra.mxu0 %v6135_v3 }
 0x4fd   : > { %v3914_v5 = vpack.c.bf16 %v3906_v12, %v3905_v61  ;;  %5824 = vmatprep.subr.bf16.mxu0 %v6178_v1 }
 0x4fe   : > { %v3788_v15 = vpop.f32.mrb[244].mxu1  ;;  %v3907_v53 = vsel %vm6566_vm8, %v3897_v49, 0.0 }
 0x4ff   : > { %v3864_v57 = vrot.slane %v3788_v15, 1  ;;  %v5786_v24 = vpop.f32.mrb[245].mxu1  ;;  %5805 = vmatmul.mubr.msk.bf16.gmra.mrb[192].mxu0 %vm577_vm1, %v3914_v5  ;;  %5861 = vmatmul.mubr.msk.bf16.gmra.mrb[0].mxu1 %vm577_vm1, %v3914_v5 }
 0x500   : > { %v3791_v8 = vpop.f32.mrb[246].mxu1  ;;  %5808 = vmatprep.mubr.msk.bf16.mxu0 %vm8106_vm0, %v6178_v1  ;;  %5864 = vmatprep.mubr.msk.bf16.mxu1 %vm8106_vm0, %v6178_v1 }
 0x501   : > { %v3865_v22 = vsel %vm929_vm3, %v3862_v29, %v3864_v57  ;;  %v3866_v43 = vrot.slane %v3791_v8, 1  ;;  %v5787_v35 = vpop.f32.mrb[247].mxu1  ;;  %5825 = vmatpush3.bf16.msra.mxu0 %v6136_v54 }
 0x502   : > { %v3898_v27 = vadd.f32 %v7800_v42, %v3865_v22  ;;  %5826 = vmatprep.subr.bf16.mxu0 %v6178_v1 }
 0x503   : > { %v3867_v2 = vsel %vm929_vm3, %v3864_v57, %v3866_v43 }
 0x504   : > { %v3908_v11 = vsel %vm6570_vm9, %v3898_v27, 0.0  ;;  %v3899_v56 = vadd.f32 %v7803_v44, %v3867_v2 }
 0x505   : > { %v3915_v19 = vpack.c.bf16 %v3908_v11, %v3907_v53  ;;  %5827 = vmatpush3.bf16.msra.mxu0 %v6137_v48 }
 0x506   : > { %v3796_v63 = vpop.f32.mrb[248].mxu1  ;;  %v3909_v18 = vsel %vm6603_vm10, %v3899_v56, 0.0 }
 0x507   : > { %v3868_v40 = vrot.slane %v3796_v63, 1  ;;  %v5790_v25 = vpop.f32.mrb[249].mxu1  ;;  %5809 = vmatmul.mubr.msk.bf16.gmra.mrb[196].mxu0 %vm577_vm1, %v3915_v19  ;;  %5865 = vmatmul.mubr.msk.bf16.gmra.mrb[4].mxu1 %vm577_vm1, %v3915_v19 }
 0x508   : > { %v3799_v42 = vpop.f32.mrb[250].mxu1  ;;  %5812 = vmatprep.mubr.msk.bf16.mxu0 %vm8106_vm0, %v6178_v1  ;;  %5868 = vmatprep.mubr.msk.bf16.mxu1 %vm8106_vm0, %v6178_v1 }
 0x509   : > { %v3869_v51 = vsel %vm929_vm3, %v3866_v43, %v3868_v40  ;;  %v3870_v10 = vrot.slane %v3799_v42, 1  ;;  %v5791_v44 = vpop.f32.mrb[251].mxu1 }
 0x50a   : > { %v3900_v30 = vadd.f32 %v7806_v52, %v3869_v51 }
 0x50b   : > { %v3871_v41 = vsel %vm929_vm3, %v3868_v40, %v3870_v10  ;;  %v3882_v23 = vsel %vm929_vm3, %v3870_v10, 0.0 }
 0x50c   : > { %v3910_v14 = vsel %vm6607_vm11, %v3900_v30, 0.0  ;;  %v3901_v55 = vadd.f32 %v7809_v16, %v3871_v41  ;;  %v3902_v47 = vadd.f32 %v7812_v26, %v3882_v23 }
 0x50d   : > { %v3916_v3 = vpack.c.bf16 %v3910_v14, %v3909_v18 }
 0x50e   : > { %v3911_v20 = vsel %vm6631_vm12, %v3901_v55, 0.0  ;;  %v3912_v52 = vsel %vm6635_vm13, %v3902_v47, 0.0 }
 0x50f   : > { %v3917_v29 = vpack.c.bf16 %v3912_v52, %v3911_v20  ;;  %5813 = vmatmul.mubr.msk.bf16.gmra.mrb[200].mxu0 %vm577_vm1, %v3916_v3  ;;  %5869 = vmatmul.mubr.msk.bf16.gmra.mrb[8].mxu1 %vm577_vm1, %v3916_v3 }
 0x510   : > { %5816 = vmatprep.mubr.msk.bf16.mxu0 %vm8106_vm0, %v6178_v1  ;;  %5872 = vmatprep.mubr.msk.bf16.mxu1 %vm8106_vm0, %v6178_v1 }
 0x517   : > { %5817 = vmatmul.mubr.msk.bf16.gmra.mrb[204].mxu0 %vm577_vm1, %v3917_v29  ;;  %5873 = vmatmul.mubr.msk.bf16.gmra.mrb[12].mxu1 %vm577_vm1, %v3917_v29 }
 0x518   : > { %5828 = vmatprep.mubr.msk.bf16.mxu0 %vm8106_vm0, %v6178_v1 }
 0x51f   : > { %5829 = vmatmul.mubr.msk.bf16.vlgmr.msra.gmra.mrb[128].mxu0 %vm577_vm1, %v7827_v39 }
 0x520   : > { %5832 = vmatprep.mubr.msk.bf16.mxu0 %vm8106_vm0, %v6178_v1 }
 0x527   : > { %5833 = vmatmul.mubr.msk.bf16.gmra.mrb[132].mxu0 %vm577_vm1, %v3914_v5 }
 0x528   : > { %5836 = vmatprep.mubr.msk.bf16.mxu0 %vm8106_vm0, %v6178_v1 }
 0x52f   : > { %5837 = vmatmul.mubr.msk.bf16.gmra.mrb[136].mxu0 %vm577_vm1, %v3915_v19 }
 0x530   : > { %5840 = vmatprep.mubr.msk.bf16.mxu0 %vm8106_vm0, %v6178_v1 }
 0x537   : > { %5841 = vmatmul.mubr.msk.bf16.gmra.mrb[140].mxu0 %vm577_vm1, %v3916_v3 }
 0x538   : > { %5844 = vmatprep.mubr.msk.bf16.mxu0 %vm8106_vm0, %v6178_v1 }
 0x53f   : > { %5845 = vmatmul.mubr.msk.bf16.gmra.mrb[144].mxu0 %vm577_vm1, %v3917_v29 }
 0x5ca   : > { %v7915_v16 = vpop.f32.mrb[188].mxu0  ;;  %v4211_v26 = vpop.f32.mrb[252].mxu1 }
 0x5cb   : > { %v5802_v39 = vpop.f32.mrb[189].mxu0  ;;  %v5858_v9 = vpop.f32.mrb[253].mxu1  ;;  %v4260_v61 = vrot.slane %v7915_v16, 7  ;;  %v4300_v12 = vrot.slane %v4211_v26, 1 }
 0x5cc   : > { %v4002_v28 = vpop.f32.mrb[190].mxu0  ;;  %v4214_v13 = vpop.f32.mrb[254].mxu1 }
 0x5cd   : > { %v4261_v49 = vrot.slane %v4002_v28, 7  ;;  %v4301_v5 = vrot.slane %v4214_v13, 1  ;;  %v5803_v54 = vpop.f32.mrb[191].mxu0  ;;  %v5859_v15 = vpop.f32.mrb[255].mxu1 }
 0x5cf   : > { %v7919_v57 = vsel %vm929_vm3, %v4300_v12, %v4301_v5  ;;  %v7924_v1 = vsel %vm888_vm2, %v4260_v61, %v4261_v49 }
 0x5d2   : > { %v4007_v24 = vpop.f32.mrb[192].mxu0  ;;  %v4219_v8 = vpop.f32.mrb[0].mxu1 }
 0x5d3   : > { %v4263_v22 = vrot.slane %v4007_v24, 7  ;;  %v4303_v43 = vrot.slane %v4219_v8, 1  ;;  %v5806_v35 = vpop.f32.mrb[193].mxu0  ;;  %v5862_v48 = vpop.f32.mrb[1].mxu1 }
 0x5d4   : > { %v4010_v27 = vpop.f32.mrb[194].mxu0  ;;  %v4222_v2 = vpop.f32.mrb[2].mxu1 }
 0x5d5   : > { %v7927_v53 = vsel %vm929_vm3, %v4301_v5, %v4303_v43  ;;  %v4265_v11 = vrot.slane %v4010_v27, 7  ;;  %v4305_v56 = vrot.slane %v4222_v2, 1  ;;  %v5807_v19 = vpop.f32.mrb[195].mxu0  ;;  %v5863_v63 = vpop.f32.mrb[3].mxu1  ;;  %v7930_v40 = vsel %vm888_vm2, %v4261_v49, %v4263_v22 }
 0x5d7   : > { %v7933_v25 = vsel %vm929_vm3, %v4303_v43, %v4305_v56  ;;  %v7936_v42 = vsel %vm888_vm2, %v4263_v22, %v4265_v11 }
 0x5da   : > { %v4015_v51 = vpop.f32.mrb[196].mxu0  ;;  %v4227_v10 = vpop.f32.mrb[4].mxu1 }
 0x5db   : > { %v4267_v44 = vrot.slane %v4015_v51, 7  ;;  %v4307_v30 = vrot.slane %v4227_v10, 1  ;;  %v5810_v41 = vpop.f32.mrb[197].mxu0  ;;  %v5866_v23 = vpop.f32.mrb[5].mxu1 }
 0x5dc   : > { %v4018_v18 = vpop.f32.mrb[198].mxu0  ;;  %v4230_v14 = vpop.f32.mrb[6].mxu1 }
 0x5dd   : > { %v7939_v55 = vsel %vm929_vm3, %v4305_v56, %v4307_v30  ;;  %v4269_v47 = vrot.slane %v4018_v18, 7  ;;  %v4309_v3 = vrot.slane %v4230_v14, 1  ;;  %v5811_v20 = vpop.f32.mrb[199].mxu0  ;;  %v5867_v52 = vpop.f32.mrb[7].mxu1  ;;  %v7942_v29 = vsel %vm888_vm2, %v4265_v11, %v4267_v44 }
 0x5df   : > { %v7945_v26 = vsel %vm929_vm3, %v4307_v30, %v4309_v3  ;;  %v7948_v39 = vsel %vm888_vm2, %v4267_v44, %v4269_v47 }
 0x5e2   : > { %v4023_v9 = vpop.f32.mrb[200].mxu0  ;;  %v4235_v28 = vpop.f32.mrb[8].mxu1 }
 0x5e3   : > { %v4271_v13 = vrot.slane %v4023_v9, 7  ;;  %v4311_v12 = vrot.slane %v4235_v28, 1  ;;  %v5814_v49 = vpop.f32.mrb[201].mxu0  ;;  %v5870_v5 = vpop.f32.mrb[9].mxu1 }
 0x5e4   : > { %v4026_v54 = vpop.f32.mrb[202].mxu0  ;;  %v4238_v15 = vpop.f32.mrb[10].mxu1 }
 0x5e5   : > { %v7951_v24 = vsel %vm929_vm3, %v4309_v3, %v4311_v12  ;;  %v4273_v8 = vrot.slane %v4026_v54, 7  ;;  %v4313_v22 = vrot.slane %v4238_v15, 1  ;;  %v5815_v43 = vpop.f32.mrb[203].mxu0  ;;  %v5871_v35 = vpop.f32.mrb[11].mxu1  ;;  %v7954_v48 = vsel %vm888_vm2, %v4269_v47, %v4271_v13 }
 0x5e7   : > { %v7957_v27 = vsel %vm929_vm3, %v4311_v12, %v4313_v22  ;;  %v7960_v2 = vsel %vm888_vm2, %v4271_v13, %v4273_v8  ;;  %v4289_v12 = vsel %vm888_vm2, 0.0, %v4260_v61 }
 0x5ea   : > { %v4031_v11 = vpop.f32.mrb[204].mxu0  ;;  %v4243_v56 = vpop.f32.mrb[12].mxu1 }
 0x5eb   : > { %v4275_v19 = vrot.slane %v4031_v11, 7  ;;  %v4315_v63 = vrot.slane %v4243_v56, 1  ;;  %v5818_v51 = vpop.f32.mrb[205].mxu0  ;;  %v5874_v10 = vpop.f32.mrb[13].mxu1 }
 0x5ec   : > { %v4034_v44 = vpop.f32.mrb[206].mxu0  ;;  %v7962_v30 = vpop.f32.mrb[14].mxu1  ;;  %v6161_v10 = vld [vmem:[%s6647_s24 + $0x8] sm:$0xff] }
 0x5ed   : > { %v7965_v41 = vsel %vm929_vm3, %v4313_v22, %v4315_v63  ;;  %v4277_v23 = vrot.slane %v4034_v44, 7  ;;  %v4317_v18 = vrot.slane %v7962_v30, 1  ;;  %v5819_v14 = vpop.f32.mrb[207].mxu0  ;;  %v5875_v47 = vpop.f32.mrb[15].mxu1  ;;  %v7969_v3 = vsel %vm888_vm2, %v4273_v8, %v4275_v19 }
 0x5ef   : > { %v7974_v20 = vsel %vm929_vm3, %v4315_v63, %v4317_v18  ;;  %v7977_v52 = vsel %vm888_vm2, %v4275_v19, %v4277_v23 }
 0x5f2   : > { %v4105_v9 = vpop.f32.mrb[128].mxu0 }
 0x5f3   : > { %v5927_v28 = vadd.f32 %v7751_v4, %v4105_v9  ;;  %v5830_v13 = vpop.f32.mrb[129].mxu0 }
 0x5f4   : > { %v4108_v49 = vpop.f32.mrb[130].mxu0 }
 0x5f5   : > { %v5928_v5 = vadd.f32 %v5927_v28, %v4289_v12  ;;  %v5933_v54 = vadd.f32 %v7755_v6, %v4108_v49  ;;  %v5831_v15 = vpop.f32.mrb[131].mxu0  ;;  %v6160_v6 = vld [vmem:[%s6647_s24] sm:$0xff] }
 0x5f7   : > { %v5929_v8 = vadd.f32 %v5928_v5, %v7919_v57  ;;  %v5934_v22 = vadd.f32 %v5933_v54, %v7924_v1 }
 0x5f9   : > { %vm4360_vm15 = vcmp.ge.f32.partialorder %v5929_v8, 0.0  ;;  %v4370_v43 = vmul.f32 0.1, %v5929_v8  ;;  %v5935_v4 = vadd.f32 %v5934_v22, %v7927_v53 }
 0x5fa   : > { %v4113_v35 = vpop.f32.mrb[132].mxu0 }
 0x5fb   : > { %v4380_v16 = vsel %vm4360_vm15, %v5929_v8, %v4370_v43  ;;  %vm4361_vm14 = vcmp.ge.f32.partialorder %v5935_v4, 0.0  ;;  %v4371_v61 = vmul.f32 0.1, %v5935_v4  ;;  %v5939_v11 = vadd.f32 %v7759_v33, %v4113_v35  ;;  %v5834_v56 = vpop.f32.mrb[133].mxu0  ;;  %v6163_v8 = vld [vmem:[%s6647_s24 + $0x18] sm:$0xff] }
 0x5fc   : > { %v4390_v57 = vadd.f32 %v6160_v6, %v4380_v16  ;;  %v4116_v1 = vpop.f32.mrb[134].mxu0 }
 0x5fd   : > { %v4381_v19 = vsel %vm4361_vm14, %v5935_v4, %v4371_v61  ;;  %v5940_v53 = vadd.f32 %v5939_v11, %v7930_v40  ;;  %v5945_v63 = vadd.f32 %v7763_v50, %v4116_v1  ;;  %v5835_v51 = vpop.f32.mrb[135].mxu0 }
 0x5fe   : > { %v4400_v33 = vsel %vm6496_vm4, %v4390_v57, 0.0  ;;  %v4391_v44 = vadd.f32 %v6161_v10, %v4381_v19  ;;  %v6165_v19 = vld [vmem:[%s6647_s24 + $0x28] sm:$0xff] }
 0x5ff   : > { %4410 = vst.msk [vmem:[%s7992_s16] sm:$0xff] %vm577_vm1, %v4400_v33  ;;  %v5941_v23 = vadd.f32 %v5940_v53, %v7933_v25  ;;  %v5946_v14 = vadd.f32 %v5945_v63, %v7936_v42  ;;  %v6162_v42 = vld [vmem:[%s6647_s24 + $0x10] sm:$0xff] }
 0x600   : > { %v4401_v47 = vsel %vm6500_vm5, %v4391_v44, 0.0 }
 0x601   : > { %4411 = vst.msk [vmem:[%s7992_s16 + $0x8] sm:$0xff] %vm577_vm1, %v4401_v47  ;;  %vm4362_vm2 = vcmp.ge.f32.partialorder %v5941_v23, 0.0  ;;  %v4372_v50 = vmul.f32 0.1, %v5941_v23  ;;  %v5947_v38 = vadd.f32 %v5946_v14, %v7939_v55 }
 0x602   : > { %v4121_v40 = vpop.f32.mrb[136].mxu0 }
 0x603   : > { %v4382_v9 = vsel %vm4362_vm2, %v5941_v23, %v4372_v50  ;;  %vm4363_vm4 = vcmp.ge.f32.partialorder %v5947_v38, 0.0  ;;  %v4373_v28 = vmul.f32 0.1, %v5947_v38  ;;  %v5951_v13 = vadd.f32 %v7767_v0, %v4121_v40  ;;  %v5838_v25 = vpop.f32.mrb[137].mxu0  ;;  %v6167_v40 = vld [vmem:[%s6647_s24 + $0x38] sm:$0xff] }
 0x604   : > { %v4392_v12 = vadd.f32 %v6162_v42, %v4382_v9  ;;  %v4124_v59 = vpop.f32.mrb[138].mxu0 }
 0x605   : > { %v4383_v49 = vsel %vm4363_vm4, %v5947_v38, %v4373_v28  ;;  %v5952_v5 = vadd.f32 %v5951_v13, %v7942_v29  ;;  %v5957_v54 = vadd.f32 %v7770_v45, %v4124_v59  ;;  %v5839_v15 = vpop.f32.mrb[139].mxu0  ;;  %v6169_v59 = vld [vmem:[%s6647_s24 + $0x48] sm:$0xff] }
 0x606   : > { %v4402_v55 = vsel %vm6525_vm6, %v4392_v12, 0.0  ;;  %v4393_v22 = vadd.f32 %v6163_v8, %v4383_v49 }
 0x607   : > { %4412 = vst.msk [vmem:[%s7992_s16 + $0x10] sm:$0xff] %vm577_vm1, %v4402_v55  ;;  %v5953_v0 = vadd.f32 %v5952_v5, %v7945_v26  ;;  %v5958_v43 = vadd.f32 %v5957_v54, %v7948_v39  ;;  %v6164_v39 = vld [vmem:[%s6647_s24 + $0x20] sm:$0xff] }
 0x608   : > { %v4403_v4 = vsel %vm6529_vm7, %v4393_v22, 0.0 }
 0x609   : > { %4413 = vst.msk [vmem:[%s7992_s16 + $0x18] sm:$0xff] %vm577_vm1, %v4403_v4  ;;  %vm4364_vm5 = vcmp.ge.f32.partialorder %v5953_v0, 0.0  ;;  %v4374_v45 = vmul.f32 0.1, %v5953_v0  ;;  %v5959_v62 = vadd.f32 %v5958_v43, %v7951_v24 }
 0x60a   : > { %v4129_v29 = vpop.f32.mrb[140].mxu0 }
 0x60b   : > { %v4384_v35 = vsel %vm4364_vm5, %v5953_v0, %v4374_v45  ;;  %vm4365_vm6 = vcmp.ge.f32.partialorder %v5959_v62, 0.0  ;;  %v4375_v16 = vmul.f32 0.1, %v5959_v62  ;;  %v5963_v61 = vadd.f32 %v7773_v37, %v4129_v29  ;;  %v5842_v26 = vpop.f32.mrb[141].mxu0 }
 0x60c   : > { %v4394_v11 = vadd.f32 %v6164_v39, %v4384_v35  ;;  %v4132_v46 = vpop.f32.mrb[142].mxu0 }
 0x60d   : > { %v4385_v56 = vsel %vm4365_vm6, %v5959_v62, %v4375_v16  ;;  %v5964_v6 = vadd.f32 %v5963_v61, %v7954_v48  ;;  %v5969_v57 = vadd.f32 %v7776_v7, %v4132_v46  ;;  %v5843_v1 = vpop.f32.mrb[143].mxu0 }
 0x60e   : > { %v4404_v24 = vsel %vm6566_vm8, %v4394_v11, 0.0  ;;  %v4395_v53 = vadd.f32 %v6165_v19, %v4385_v56 }
 0x60f   : > { %4414 = vst.msk [vmem:[%s7992_s16 + $0x20] sm:$0xff] %vm577_vm1, %v4404_v24  ;;  %v5965_v37 = vadd.f32 %v5964_v6, %v7957_v27  ;;  %v5970_v63 = vadd.f32 %v5969_v57, %v7960_v2  ;;  %v6166_v2 = vld [vmem:[%s6647_s24 + $0x30] sm:$0xff] }
 0x610   : > { %v4405_v51 = vsel %vm6570_vm9, %v4395_v53, 0.0 }
 0x611   : > { %4415 = vst.msk [vmem:[%s7992_s16 + $0x28] sm:$0xff] %vm577_vm1, %v4405_v51  ;;  %vm4366_vm7 = vcmp.ge.f32.partialorder %v5965_v37, 0.0  ;;  %v4376_v7 = vmul.f32 0.1, %v5965_v37  ;;  %v5971_v31 = vadd.f32 %v5970_v63, %v7965_v41 }
 0x612   : > { %v4137_v48 = vpop.f32.mrb[144].mxu0 }
 0x613   : > { %v4386_v33 = vsel %vm4366_vm7, %v5965_v37, %v4376_v7  ;;  %vm4367_vm8 = vcmp.ge.f32.partialorder %v5971_v31, 0.0  ;;  %v4377_v10 = vmul.f32 0.1, %v5971_v31  ;;  %v5975_v44 = vadd.f32 %v7780_v17, %v4137_v48  ;;  %v5846_v27 = vpop.f32.mrb[145].mxu0 }
 0x614   : > { %v4396_v23 = vadd.f32 %v6166_v2, %v4386_v33  ;;  %v4140_v32 = vpop.f32.mrb[146].mxu0 }
 0x615   : > { %v4387_v14 = vsel %vm4367_vm8, %v5971_v31, %v4377_v10  ;;  %v5976_v47 = vadd.f32 %v5975_v44, %v7969_v3  ;;  %v5981_v50 = vadd.f32 %v7782_v21, %v4140_v32  ;;  %v5847_v38 = vpop.f32.mrb[147].mxu0  ;;  %v4329_v3 = vsel %vm929_vm3, %v4317_v18, 0.0 }
 0x616   : > { %v4406_v41 = vsel %vm6603_vm10, %v4396_v23, 0.0  ;;  %v4397_v9 = vadd.f32 %v6167_v40, %v4387_v14 }
 0x617   : > { %4416 = vst.msk [vmem:[%s7992_s16 + $0x30] sm:$0xff] %vm577_vm1, %v4406_v41  ;;  %v5977_v17 = vadd.f32 %v5976_v47, %v7974_v20  ;;  %v5982_v28 = vadd.f32 %v5981_v50, %v7977_v52  ;;  %v6168_v20 = vld [vmem:[%s6647_s24 + $0x40] sm:$0xff] }
 0x618   : > { %v4407_v21 = vsel %vm6607_vm11, %v4397_v9, 0.0 }
 0x619   : > { %4417 = vst.msk [vmem:[%s7992_s16 + $0x38] sm:$0xff] %vm577_vm1, %v4407_v21  ;;  %vm4368_vm9 = vcmp.ge.f32.partialorder %v5977_v17, 0.0  ;;  %v4378_v58 = vmul.f32 0.1, %v5977_v17  ;;  %v5983_v13 = vadd.f32 %v5982_v28, %v4329_v3 }
 0x61b   : > { %v4388_v25 = vsel %vm4368_vm9, %v5977_v17, %v4378_v58  ;;  %vm4369_vm10 = vcmp.ge.f32.partialorder %v5983_v13, 0.0  ;;  %v4379_v42 = vmul.f32 0.1, %v5983_v13 }
 0x61c   : > { %v4398_v12 = vadd.f32 %v6168_v20, %v4388_v25 }
 0x61d   : > { %v4389_v52 = vsel %vm4369_vm10, %v5983_v13, %v4379_v42 }
 0x61e   : > { %v4408_v30 = vsel %vm6631_vm12, %v4398_v12, 0.0  ;;  %v4399_v18 = vadd.f32 %v6169_v59, %v4389_v52 }
 0x61f   : > { %4418 = vst.msk [vmem:[%s7992_s16 + $0x40] sm:$0xff] %vm577_vm1, %v4408_v30 }
 0x620   : > { %v4409_v60 = vsel %vm6635_vm13, %v4399_v18, 0.0 }
 0x621   : > { %4419 = vst.msk [vmem:[%s7992_s16 + $0x48] sm:$0xff] %vm577_vm1, %v4409_v60 }
 0x622 PF: > { %s22_s17 = sadd.s32 1, %s6176_s17  }
 0x623   : > { %p19_p4 = scmp.ge.s32.totalorder %s22_s17, 4  }
 0x625   :  { %21 = sbr.rel (!%p19_p4) target bundleno = 1 (0x1), region = 122 }

</bundles_post_ra>
